<compile_context>
chip_gen: v7x
topology: tpu7x:2x2x1
jax: 0.10.0
libtpu: 0.0.40
codegen_flags: <defaults>
</compile_context>

<pallas_src>
import jax
import jax.numpy as jnp
from jax.experimental import pallas as pl
from jax.experimental.pallas import tpu as pltpu

NUM_INPUTS = 784
NUM_OUTPUTS = 10
LANE = 128


def _pad128(d):
    return ((d + LANE - 1) // LANE) * LANE


def make_snn_forward(n_layers, beta, threshold, batch, hidden, time_steps):
    """Builds the Pallas forward for the given static config."""
    assert n_layers >= 3
    assert threshold > 0.0, "padded zero lanes must never cross threshold"
    n_lif = n_layers                  # number of snn.Leaky layers
    n_lin = n_layers - 1              # number of nn.Linear layers
    # true / lane-padded feature dims of each LIF layer's membrane
    dims = [NUM_INPUTS] + [hidden] * (n_lif - 2) + [NUM_OUTPUTS]
    pdims = [_pad128(d) for d in dims]
    beta = float(beta)
    threshold = float(threshold)
    inv_t = 1.0 / float(time_steps)

    def kernel(*refs):
        x_ref = refs[0]
        wb_refs = refs[1:1 + 2 * n_lin]        # interleaved (W, b) refs
        spk_out_ref = refs[1 + 2 * n_lin]      # (T, batch, 128) resident block
        var_ref = refs[2 + 2 * n_lin]          # (n_lif, 128), written once

        # init_leaky() -> zero membranes; all state carried as values.
        mems = [jnp.zeros((batch, pdims[i]), jnp.float32) for i in range(n_lif)]
        spks = [jnp.zeros((batch, pdims[i]), jnp.float32) for i in range(n_lif)]
        acc_sq = [jnp.zeros((batch, pdims[i]), jnp.float32) for i in range(n_lif - 1)]
        acc_s1sq = [jnp.float32(0.0) for _ in range(n_lif - 1)]

        # TODO(synk): for large time_steps switch to lax.fori_loop(unroll=k)
        # to bound trace size; T is small here so full unroll is optimal.
        for t in range(time_steps):
            cur = x_ref[...]
            for i in range(n_lif):
                # reset_t == heaviside(mem_{t-1} - thr) == spk_{t-1} (zeros at t=0)
                mem = beta * mems[i] + cur - spks[i] * threshold
                spk = (mem > threshold).astype(jnp.float32)
                mems[i] = mem
                spks[i] = spk

                if i == n_lif - 1:
                    # output layer: record spikes (static index, VMEM-resident)
                    spk_out_ref[t] = spk
                else:
                    # deferred sum-of-squares; only the scalar s1 reduce stays here
                    acc_sq[i] = acc_sq[i] + mem * mem
                    s1 = jnp.sum(mem)
                    acc_s1sq[i] = acc_s1sq[i] + s1 * s1
                    # cur = Linear_i(spk): operands straight from VMEM refs,
                    # f32 on the MXU with f32 accumulation.
                    cur = (jnp.dot(spk, wb_refs[2 * i][...],
                                   preferred_element_type=jnp.float32)
                           + wb_refs[2 * i + 1][...])

        # Single consolidated write of the time-averaged variances.
        # Padded lanes of mem are exactly 0, so s1/s2 are unaffected; use TRUE
        # element counts for the unbiased-variance constants.
        row_idx = jax.lax.broadcasted_iota(jnp.int32, (n_lif, LANE), 0)
        var_arr = jnp.zeros((n_lif, LANE), jnp.float32)   # output LIF row stays 0
        for i in range(n_lif - 1):
            n_elem = float(batch * dims[i])
            s2 = jnp.sum(acc_sq[i])
            v = (s2 - acc_s1sq[i] * (1.0 / n_elem)) * (1.0 / (n_elem - 1.0)) * inv_t
            var_arr = jnp.where(row_idx == i, v, var_arr)
        var_ref[...] = var_arr

    def fwd(x, weights, biases):
        # Lane-dense zero padding in the wrapper (semantics unchanged because the
        # padded rows/cols/lanes are exactly 0 and threshold > 0).
        x_p = jnp.pad(x, ((0, 0), (0, pdims[0] - dims[0])))
        args = [x_p]
        in_specs = [pl.BlockSpec((batch, pdims[0]), lambda t: (0, 0))]
        for i in range(n_lin):
            di, do = pdims[i], pdims[i + 1]
            w_p = jnp.zeros((di, do), jnp.float32).at[
                :dims[i], :dims[i + 1]].set(weights[i].astype(jnp.float32))
            b_p = jnp.zeros((1, do), jnp.float32).at[
                :, :dims[i + 1]].set(biases[i].astype(jnp.float32))
            args += [w_p, b_p]
            in_specs += [pl.BlockSpec((di, do), lambda t: (0, 0)),
                         pl.BlockSpec((1, do), lambda t: (0, 0))]

        out_shape = (
            jax.ShapeDtypeStruct((time_steps, batch, pdims[-1]), jnp.float32),
            jax.ShapeDtypeStruct((n_lif, LANE), jnp.float32),
        )
        out_specs = (
            # resident full-array blocks: one writeback at kernel end
            pl.BlockSpec((time_steps, batch, pdims[-1]), lambda t: (0, 0, 0)),
            pl.BlockSpec((n_lif, LANE), lambda t: (0, 0)),
        )

        # TODO(synk): the only large remaining lever is structural — stack many
        # samples and add a leading batch-tile grid axis marked "parallel"
        # (also engages v7x's 2nd TensorCore); if hidden is scaled up, switch
        # the constant weight specs to pipeline_mode=pl.Buffered(1) and set
        # vmem_limit_bytes for v7x's 64 MiB VMEM. Unnecessary at this config.
        spk_out, var_rows = pl.pallas_call(
            kernel,
            out_shape=out_shape,
            grid_spec=pltpu.PrefetchScalarGridSpec(
                num_scalar_prefetch=0,
                grid=(1,),                  # whole forward is one invocation
                in_specs=in_specs,
                out_specs=out_specs,
            ),
            compiler_params=pltpu.CompilerParams(
                dimension_semantics=("arbitrary",)),
        )(*args)

        # Slice the lane padding back off; kernel already averaged over time and
        # zeroed the output-LIF variance slot.
        return var_rows[:, 0], spk_out[:, :, :NUM_OUTPUTS]

    return fwd


def init_params(key, n_layers, hidden):
    """Deterministic PyTorch-default-style (uniform +/- 1/sqrt(fan_in)) init."""
    dims = [NUM_INPUTS] + [hidden] * (n_layers - 2) + [NUM_OUTPUTS]
    weights, biases = [], []
    for i in range(n_layers - 1):
        d_in, d_out = dims[i], dims[i + 1]
        key, k_w, k_b = jax.random.split(key, 3)
        bound = 1.0 / (d_in ** 0.5)
        weights.append(
            jax.random.uniform(k_w, (d_in, d_out), jnp.float32, -bound, bound))
        biases.append(
            jax.random.uniform(k_b, (1, d_out), jnp.float32, -bound, bound))
    return weights, biases


if __name__ == "__main__":
    # TODO(synk): the PyTorch module's custom `init_func` hook is replaced by a
    # deterministic uniform init (synthetic weights, no checkpoint load).
    n_layers = 4          # -> 4 LIF layers, 3 Linear layers (784->H, H->H, H->10)
    batch = 8
    hidden = 32
    time_steps = 6
    beta = 0.9
    threshold = 1.0

    key = jax.random.PRNGKey(0)
    k_x, k_p = jax.random.split(key)
    x = jax.random.uniform(k_x, (batch, NUM_INPUTS), jnp.float32, 0.0, 2.0)
    weights, biases = init_params(k_p, n_layers, hidden)

    fwd = make_snn_forward(n_layers, beta, threshold, batch, hidden, time_steps)
    var_mems_list, spike_out = jax.block_until_ready(fwd(x, weights, biases))

    assert spike_out.shape == (time_steps, batch, NUM_OUTPUTS)
    assert var_mems_list.shape == (n_layers,)
    assert bool(jnp.all(jnp.isfinite(var_mems_list)))
    assert bool(jnp.all((spike_out == 0.0) | (spike_out == 1.0)))
    assert float(var_mems_list[-1]) == 0.0   # output LIF slot: count == 0
    print("KERNEL_OK")
</pallas_src>

<mosaic_0001>
module attributes {stable_mosaic.version = 11 : i64} {
  func.func @kernel(%arg0: i32, %arg1: memref<8x896xf32, #tpu.memory_space<vmem>>, %arg2: memref<896x128xf32, #tpu.memory_space<vmem>>, %arg3: memref<1x128xf32, #tpu.memory_space<vmem>>, %arg4: memref<128x128xf32, #tpu.memory_space<vmem>>, %arg5: memref<1x128xf32, #tpu.memory_space<vmem>>, %arg6: memref<128x128xf32, #tpu.memory_space<vmem>>, %arg7: memref<1x128xf32, #tpu.memory_space<vmem>>, %arg8: memref<6x8x128xf32, #tpu.memory_space<vmem>>, %arg9: memref<4x128xf32, #tpu.memory_space<vmem>>) attributes {dimension_semantics = [#tpu.dimension_semantics<arbitrary>], iteration_bounds = array<i64: 1>, scalar_prefetch = 0 : i64, scratch_operands = 0 : i64, tpu.core_type = #tpu.core_type<tc>, window_params = [{pipeline_mode = #tpu.pipeline_mode<synchronous>, transform_indices = @transform_0, window_bounds = array<i64: 8, 896>}, {pipeline_mode = #tpu.pipeline_mode<synchronous>, transform_indices = @transform_1, window_bounds = array<i64: 896, 128>}, {pipeline_mode = #tpu.pipeline_mode<synchronous>, transform_indices = @transform_2, window_bounds = array<i64: 1, 128>}, {pipeline_mode = #tpu.pipeline_mode<synchronous>, transform_indices = @transform_3, window_bounds = array<i64: 128, 128>}, {pipeline_mode = #tpu.pipeline_mode<synchronous>, transform_indices = @transform_4, window_bounds = array<i64: 1, 128>}, {pipeline_mode = #tpu.pipeline_mode<synchronous>, transform_indices = @transform_5, window_bounds = array<i64: 128, 128>}, {pipeline_mode = #tpu.pipeline_mode<synchronous>, transform_indices = @transform_6, window_bounds = array<i64: 1, 128>}, {pipeline_mode = #tpu.pipeline_mode<synchronous>, transform_indices = @transform_7, window_bounds = array<i64: 6, 8, 128>}, {pipeline_mode = #tpu.pipeline_mode<synchronous>, transform_indices = @transform_8, window_bounds = array<i64: 4, 128>}]} {
    %cst = arith.constant 0.000000e+00 : f32
    %0 = vector.broadcast %cst : f32 to vector<8x896xf32>
    %cst_0 = arith.constant 0.000000e+00 : f32
    %1 = vector.broadcast %cst_0 : f32 to vector<8x128xf32>
    %cst_1 = arith.constant 0.000000e+00 : f32
    %2 = vector.broadcast %cst_1 : f32 to vector<8x128xf32>
    %cst_2 = arith.constant 0.000000e+00 : f32
    %3 = vector.broadcast %cst_2 : f32 to vector<8x128xf32>
    %cst_3 = arith.constant 0.000000e+00 : f32
    %4 = vector.broadcast %cst_3 : f32 to vector<8x896xf32>
    %cst_4 = arith.constant 0.000000e+00 : f32
    %5 = vector.broadcast %cst_4 : f32 to vector<8x128xf32>
    %cst_5 = arith.constant 0.000000e+00 : f32
    %6 = vector.broadcast %cst_5 : f32 to vector<8x128xf32>
    %cst_6 = arith.constant 0.000000e+00 : f32
    %7 = vector.broadcast %cst_6 : f32 to vector<8x128xf32>
    %cst_7 = arith.constant 0.000000e+00 : f32
    %8 = vector.broadcast %cst_7 : f32 to vector<8x896xf32>
    %cst_8 = arith.constant 0.000000e+00 : f32
    %9 = vector.broadcast %cst_8 : f32 to vector<8x128xf32>
    %cst_9 = arith.constant 0.000000e+00 : f32
    %10 = vector.broadcast %cst_9 : f32 to vector<8x128xf32>
    %c0 = arith.constant 0 : index
    %c0_10 = arith.constant 0 : index
    %11 = vector.load %arg1[%c0, %c0_10] : memref<8x896xf32, #tpu.memory_space<vmem>>, vector<8x896xf32>
    %cst_11 = arith.constant 0.899999976 : f32
    %12 = vector.broadcast %cst_11 : f32 to vector<8x896xf32>
    %13 = arith.mulf %12, %0 : vector<8x896xf32>
    %14 = arith.addf %13, %11 : vector<8x896xf32>
    %cst_12 = arith.constant 1.000000e+00 : f32
    %15 = vector.broadcast %cst_12 : f32 to vector<8x896xf32>
    %16 = arith.mulf %4, %15 : vector<8x896xf32>
    %17 = arith.subf %14, %16 : vector<8x896xf32>
    %cst_13 = arith.constant 1.000000e+00 : f32
    %18 = vector.broadcast %cst_13 : f32 to vector<8x896xf32>
    %19 = arith.cmpf ogt, %17, %18 : vector<8x896xf32>
    %20 = arith.extui %19 : vector<8x896xi1> to vector<8x896xi32>
    %21 = arith.sitofp %20 : vector<8x896xi32> to vector<8x896xf32>
    %22 = arith.mulf %17, %17 : vector<8x896xf32>
    %23 = arith.addf %8, %22 : vector<8x896xf32>
    %24 = vector.shape_cast %17 : vector<8x896xf32> to vector<1x8x896xf32>
    %cst_14 = arith.constant dense<0.000000e+00> : vector<1xf32>
    %25 = vector.multi_reduction <add>, %24, %cst_14 [1, 2] : vector<1x8x896xf32> to vector<1xf32>
    %26 = vector.shape_cast %25 : vector<1xf32> to vector<1x1x1xf32>
    %27 = vector.extract %26[0, 0, 0] : f32 from vector<1x1x1xf32>
    %28 = arith.mulf %27, %27 : f32
    %cst_15 = arith.constant 0.000000e+00 : f32
    %29 = arith.addf %cst_15, %28 : f32
    %c0_16 = arith.constant 0 : index
    %c0_17 = arith.constant 0 : index
    %30 = vector.load %arg2[%c0_16, %c0_17] : memref<896x128xf32, #tpu.memory_space<vmem>>, vector<896x128xf32>
    %cst_18 = arith.constant dense<0.000000e+00> : vector<8x128xf32>
    %31 = tpu.matmul %21, %30, %cst_18 {dimension_numbers = #tpu.dot_dimension_numbers<[1], [0], [0], [1], [0, 0, 1, 1], [], []>} : vector<8x896xf32>, vector<896x128xf32>, vector<8x128xf32> -> vector<8x128xf32>
    %c0_19 = arith.constant 0 : index
    %c0_20 = arith.constant 0 : index
    %32 = vector.load %arg3[%c0_19, %c0_20] : memref<1x128xf32, #tpu.memory_space<vmem>>, vector<1x128xf32>
    %33 = vector.broadcast %32 : vector<1x128xf32> to vector<8x128xf32>
    %34 = arith.addf %31, %33 : vector<8x128xf32>
    %cst_21 = arith.constant 0.899999976 : f32
    %35 = vector.broadcast %cst_21 : f32 to vector<8x128xf32>
    %36 = arith.mulf %35, %1 : vector<8x128xf32>
    %37 = arith.addf %36, %34 : vector<8x128xf32>
    %cst_22 = arith.constant 1.000000e+00 : f32
    %38 = vector.broadcast %cst_22 : f32 to vector<8x128xf32>
    %39 = arith.mulf %5, %38 : vector<8x128xf32>
    %40 = arith.subf %37, %39 : vector<8x128xf32>
    %cst_23 = arith.constant 1.000000e+00 : f32
    %41 = vector.broadcast %cst_23 : f32 to vector<8x128xf32>
    %42 = arith.cmpf ogt, %40, %41 : vector<8x128xf32>
    %43 = arith.extui %42 : vector<8x128xi1> to vector<8x128xi32>
    %44 = arith.sitofp %43 : vector<8x128xi32> to vector<8x128xf32>
    %45 = arith.mulf %40, %40 : vector<8x128xf32>
    %46 = arith.addf %9, %45 : vector<8x128xf32>
    %47 = vector.shape_cast %40 : vector<8x128xf32> to vector<1x8x128xf32>
    %cst_24 = arith.constant dense<0.000000e+00> : vector<1xf32>
    %48 = vector.multi_reduction <add>, %47, %cst_24 [1, 2] : vector<1x8x128xf32> to vector<1xf32>
    %49 = vector.shape_cast %48 : vector<1xf32> to vector<1x1x1xf32>
    %50 = vector.extract %49[0, 0, 0] : f32 from vector<1x1x1xf32>
    %51 = arith.mulf %50, %50 : f32
    %cst_25 = arith.constant 0.000000e+00 : f32
    %52 = arith.addf %cst_25, %51 : f32
    %c0_26 = arith.constant 0 : index
    %c0_27 = arith.constant 0 : index
    %53 = vector.load %arg4[%c0_26, %c0_27] : memref<128x128xf32, #tpu.memory_space<vmem>>, vector<128x128xf32>
    %cst_28 = arith.constant dense<0.000000e+00> : vector<8x128xf32>
    %54 = tpu.matmul %44, %53, %cst_28 {dimension_numbers = #tpu.dot_dimension_numbers<[1], [0], [0], [1], [0, 0, 1, 1], [], []>} : vector<8x128xf32>, vector<128x128xf32>, vector<8x128xf32> -> vector<8x128xf32>
    %c0_29 = arith.constant 0 : index
    %c0_30 = arith.constant 0 : index
    %55 = vector.load %arg5[%c0_29, %c0_30] : memref<1x128xf32, #tpu.memory_space<vmem>>, vector<1x128xf32>
    %56 = vector.broadcast %55 : vector<1x128xf32> to vector<8x128xf32>
    %57 = arith.addf %54, %56 : vector<8x128xf32>
    %cst_31 = arith.constant 0.899999976 : f32
    %58 = vector.broadcast %cst_31 : f32 to vector<8x128xf32>
    %59 = arith.mulf %58, %2 : vector<8x128xf32>
    %60 = arith.addf %59, %57 : vector<8x128xf32>
    %cst_32 = arith.constant 1.000000e+00 : f32
    %61 = vector.broadcast %cst_32 : f32 to vector<8x128xf32>
    %62 = arith.mulf %6, %61 : vector<8x128xf32>
    %63 = arith.subf %60, %62 : vector<8x128xf32>
    %cst_33 = arith.constant 1.000000e+00 : f32
    %64 = vector.broadcast %cst_33 : f32 to vector<8x128xf32>
    %65 = arith.cmpf ogt, %63, %64 : vector<8x128xf32>
    %66 = arith.extui %65 : vector<8x128xi1> to vector<8x128xi32>
    %67 = arith.sitofp %66 : vector<8x128xi32> to vector<8x128xf32>
    %68 = arith.mulf %63, %63 : vector<8x128xf32>
    %69 = arith.addf %10, %68 : vector<8x128xf32>
    %70 = vector.shape_cast %63 : vector<8x128xf32> to vector<1x8x128xf32>
    %cst_34 = arith.constant dense<0.000000e+00> : vector<1xf32>
    %71 = vector.multi_reduction <add>, %70, %cst_34 [1, 2] : vector<1x8x128xf32> to vector<1xf32>
    %72 = vector.shape_cast %71 : vector<1xf32> to vector<1x1x1xf32>
    %73 = vector.extract %72[0, 0, 0] : f32 from vector<1x1x1xf32>
    %74 = arith.mulf %73, %73 : f32
    %cst_35 = arith.constant 0.000000e+00 : f32
    %75 = arith.addf %cst_35, %74 : f32
    %c0_36 = arith.constant 0 : index
    %c0_37 = arith.constant 0 : index
    %76 = vector.load %arg6[%c0_36, %c0_37] : memref<128x128xf32, #tpu.memory_space<vmem>>, vector<128x128xf32>
    %cst_38 = arith.constant dense<0.000000e+00> : vector<8x128xf32>
    %77 = tpu.matmul %67, %76, %cst_38 {dimension_numbers = #tpu.dot_dimension_numbers<[1], [0], [0], [1], [0, 0, 1, 1], [], []>} : vector<8x128xf32>, vector<128x128xf32>, vector<8x128xf32> -> vector<8x128xf32>
    %c0_39 = arith.constant 0 : index
    %c0_40 = arith.constant 0 : index
    %78 = vector.load %arg7[%c0_39, %c0_40] : memref<1x128xf32, #tpu.memory_space<vmem>>, vector<1x128xf32>
    %79 = vector.broadcast %78 : vector<1x128xf32> to vector<8x128xf32>
    %80 = arith.addf %77, %79 : vector<8x128xf32>
    %cst_41 = arith.constant 0.899999976 : f32
    %81 = vector.broadcast %cst_41 : f32 to vector<8x128xf32>
    %82 = arith.mulf %81, %3 : vector<8x128xf32>
    %83 = arith.addf %82, %80 : vector<8x128xf32>
    %cst_42 = arith.constant 1.000000e+00 : f32
    %84 = vector.broadcast %cst_42 : f32 to vector<8x128xf32>
    %85 = arith.mulf %7, %84 : vector<8x128xf32>
    %86 = arith.subf %83, %85 : vector<8x128xf32>
    %cst_43 = arith.constant 1.000000e+00 : f32
    %87 = vector.broadcast %cst_43 : f32 to vector<8x128xf32>
    %88 = arith.cmpf ogt, %86, %87 : vector<8x128xf32>
    %89 = arith.extui %88 : vector<8x128xi1> to vector<8x128xi32>
    %90 = arith.sitofp %89 : vector<8x128xi32> to vector<8x128xf32>
    %c0_44 = arith.constant 0 : index
    %c0_45 = arith.constant 0 : index
    %c0_46 = arith.constant 0 : index
    %91 = vector.load %arg8[%c0_44, %c0_45, %c0_46] : memref<6x8x128xf32, #tpu.memory_space<vmem>>, vector<1x8x128xf32>
    %92 = vector.shape_cast %91 : vector<1x8x128xf32> to vector<8x128xf32>
    %93 = vector.shape_cast %90 : vector<8x128xf32> to vector<1x8x128xf32>
    tpu.vector_store %arg8[%c0_44, %c0_45, %c0_46], %93 {strides = array<i32>} : memref<6x8x128xf32, #tpu.memory_space<vmem>>, vector<1x8x128xf32>,
    %c0_47 = arith.constant 0 : index
    %c0_48 = arith.constant 0 : index
    %94 = vector.load %arg1[%c0_47, %c0_48] : memref<8x896xf32, #tpu.memory_space<vmem>>, vector<8x896xf32>
    %cst_49 = arith.constant 0.899999976 : f32
    %95 = vector.broadcast %cst_49 : f32 to vector<8x896xf32>
    %96 = arith.mulf %95, %17 : vector<8x896xf32>
    %97 = arith.addf %96, %94 : vector<8x896xf32>
    %cst_50 = arith.constant 1.000000e+00 : f32
    %98 = vector.broadcast %cst_50 : f32 to vector<8x896xf32>
    %99 = arith.mulf %21, %98 : vector<8x896xf32>
    %100 = arith.subf %97, %99 : vector<8x896xf32>
    %cst_51 = arith.constant 1.000000e+00 : f32
    %101 = vector.broadcast %cst_51 : f32 to vector<8x896xf32>
    %102 = arith.cmpf ogt, %100, %101 : vector<8x896xf32>
    %103 = arith.extui %102 : vector<8x896xi1> to vector<8x896xi32>
    %104 = arith.sitofp %103 : vector<8x896xi32> to vector<8x896xf32>
    %105 = arith.mulf %100, %100 : vector<8x896xf32>
    %106 = arith.addf %23, %105 : vector<8x896xf32>
    %107 = vector.shape_cast %100 : vector<8x896xf32> to vector<1x8x896xf32>
    %cst_52 = arith.constant dense<0.000000e+00> : vector<1xf32>
    %108 = vector.multi_reduction <add>, %107, %cst_52 [1, 2] : vector<1x8x896xf32> to vector<1xf32>
    %109 = vector.shape_cast %108 : vector<1xf32> to vector<1x1x1xf32>
    %110 = vector.extract %109[0, 0, 0] : f32 from vector<1x1x1xf32>
    %111 = arith.mulf %110, %110 : f32
    %112 = arith.addf %29, %111 : f32
    %c0_53 = arith.constant 0 : index
    %c0_54 = arith.constant 0 : index
    %113 = vector.load %arg2[%c0_53, %c0_54] : memref<896x128xf32, #tpu.memory_space<vmem>>, vector<896x128xf32>
    %cst_55 = arith.constant dense<0.000000e+00> : vector<8x128xf32>
    %114 = tpu.matmul %104, %113, %cst_55 {dimension_numbers = #tpu.dot_dimension_numbers<[1], [0], [0], [1], [0, 0, 1, 1], [], []>} : vector<8x896xf32>, vector<896x128xf32>, vector<8x128xf32> -> vector<8x128xf32>
    %c0_56 = arith.constant 0 : index
    %c0_57 = arith.constant 0 : index
    %115 = vector.load %arg3[%c0_56, %c0_57] : memref<1x128xf32, #tpu.memory_space<vmem>>, vector<1x128xf32>
    %116 = vector.broadcast %115 : vector<1x128xf32> to vector<8x128xf32>
    %117 = arith.addf %114, %116 : vector<8x128xf32>
    %cst_58 = arith.constant 0.899999976 : f32
    %118 = vector.broadcast %cst_58 : f32 to vector<8x128xf32>
    %119 = arith.mulf %118, %40 : vector<8x128xf32>
    %120 = arith.addf %119, %117 : vector<8x128xf32>
    %cst_59 = arith.constant 1.000000e+00 : f32
    %121 = vector.broadcast %cst_59 : f32 to vector<8x128xf32>
    %122 = arith.mulf %44, %121 : vector<8x128xf32>
    %123 = arith.subf %120, %122 : vector<8x128xf32>
    %cst_60 = arith.constant 1.000000e+00 : f32
    %124 = vector.broadcast %cst_60 : f32 to vector<8x128xf32>
    %125 = arith.cmpf ogt, %123, %124 : vector<8x128xf32>
    %126 = arith.extui %125 : vector<8x128xi1> to vector<8x128xi32>
    %127 = arith.sitofp %126 : vector<8x128xi32> to vector<8x128xf32>
    %128 = arith.mulf %123, %123 : vector<8x128xf32>
    %129 = arith.addf %46, %128 : vector<8x128xf32>
    %130 = vector.shape_cast %123 : vector<8x128xf32> to vector<1x8x128xf32>
    %cst_61 = arith.constant dense<0.000000e+00> : vector<1xf32>
    %131 = vector.multi_reduction <add>, %130, %cst_61 [1, 2] : vector<1x8x128xf32> to vector<1xf32>
    %132 = vector.shape_cast %131 : vector<1xf32> to vector<1x1x1xf32>
    %133 = vector.extract %132[0, 0, 0] : f32 from vector<1x1x1xf32>
    %134 = arith.mulf %133, %133 : f32
    %135 = arith.addf %52, %134 : f32
    %c0_62 = arith.constant 0 : index
    %c0_63 = arith.constant 0 : index
    %136 = vector.load %arg4[%c0_62, %c0_63] : memref<128x128xf32, #tpu.memory_space<vmem>>, vector<128x128xf32>
    %cst_64 = arith.constant dense<0.000000e+00> : vector<8x128xf32>
    %137 = tpu.matmul %127, %136, %cst_64 {dimension_numbers = #tpu.dot_dimension_numbers<[1], [0], [0], [1], [0, 0, 1, 1], [], []>} : vector<8x128xf32>, vector<128x128xf32>, vector<8x128xf32> -> vector<8x128xf32>
    %c0_65 = arith.constant 0 : index
    %c0_66 = arith.constant 0 : index
    %138 = vector.load %arg5[%c0_65, %c0_66] : memref<1x128xf32, #tpu.memory_space<vmem>>, vector<1x128xf32>
    %139 = vector.broadcast %138 : vector<1x128xf32> to vector<8x128xf32>
    %140 = arith.addf %137, %139 : vector<8x128xf32>
    %cst_67 = arith.constant 0.899999976 : f32
    %141 = vector.broadcast %cst_67 : f32 to vector<8x128xf32>
    %142 = arith.mulf %141, %63 : vector<8x128xf32>
    %143 = arith.addf %142, %140 : vector<8x128xf32>
    %cst_68 = arith.constant 1.000000e+00 : f32
    %144 = vector.broadcast %cst_68 : f32 to vector<8x128xf32>
    %145 = arith.mulf %67, %144 : vector<8x128xf32>
    %146 = arith.subf %143, %145 : vector<8x128xf32>
    %cst_69 = arith.constant 1.000000e+00 : f32
    %147 = vector.broadcast %cst_69 : f32 to vector<8x128xf32>
    %148 = arith.cmpf ogt, %146, %147 : vector<8x128xf32>
    %149 = arith.extui %148 : vector<8x128xi1> to vector<8x128xi32>
    %150 = arith.sitofp %149 : vector<8x128xi32> to vector<8x128xf32>
    %151 = arith.mulf %146, %146 : vector<8x128xf32>
    %152 = arith.addf %69, %151 : vector<8x128xf32>
    %153 = vector.shape_cast %146 : vector<8x128xf32> to vector<1x8x128xf32>
    %cst_70 = arith.constant dense<0.000000e+00> : vector<1xf32>
    %154 = vector.multi_reduction <add>, %153, %cst_70 [1, 2] : vector<1x8x128xf32> to vector<1xf32>
    %155 = vector.shape_cast %154 : vector<1xf32> to vector<1x1x1xf32>
    %156 = vector.extract %155[0, 0, 0] : f32 from vector<1x1x1xf32>
    %157 = arith.mulf %156, %156 : f32
    %158 = arith.addf %75, %157 : f32
    %c0_71 = arith.constant 0 : index
    %c0_72 = arith.constant 0 : index
    %159 = vector.load %arg6[%c0_71, %c0_72] : memref<128x128xf32, #tpu.memory_space<vmem>>, vector<128x128xf32>
    %cst_73 = arith.constant dense<0.000000e+00> : vector<8x128xf32>
    %160 = tpu.matmul %150, %159, %cst_73 {dimension_numbers = #tpu.dot_dimension_numbers<[1], [0], [0], [1], [0, 0, 1, 1], [], []>} : vector<8x128xf32>, vector<128x128xf32>, vector<8x128xf32> -> vector<8x128xf32>
    %c0_74 = arith.constant 0 : index
    %c0_75 = arith.constant 0 : index
    %161 = vector.load %arg7[%c0_74, %c0_75] : memref<1x128xf32, #tpu.memory_space<vmem>>, vector<1x128xf32>
    %162 = vector.broadcast %161 : vector<1x128xf32> to vector<8x128xf32>
    %163 = arith.addf %160, %162 : vector<8x128xf32>
    %cst_76 = arith.constant 0.899999976 : f32
    %164 = vector.broadcast %cst_76 : f32 to vector<8x128xf32>
    %165 = arith.mulf %164, %86 : vector<8x128xf32>
    %166 = arith.addf %165, %163 : vector<8x128xf32>
    %cst_77 = arith.constant 1.000000e+00 : f32
    %167 = vector.broadcast %cst_77 : f32 to vector<8x128xf32>
    %168 = arith.mulf %90, %167 : vector<8x128xf32>
    %169 = arith.subf %166, %168 : vector<8x128xf32>
    %cst_78 = arith.constant 1.000000e+00 : f32
    %170 = vector.broadcast %cst_78 : f32 to vector<8x128xf32>
    %171 = arith.cmpf ogt, %169, %170 : vector<8x128xf32>
    %172 = arith.extui %171 : vector<8x128xi1> to vector<8x128xi32>
    %173 = arith.sitofp %172 : vector<8x128xi32> to vector<8x128xf32>
    %c1 = arith.constant 1 : index
    %c0_79 = arith.constant 0 : index
    %c0_80 = arith.constant 0 : index
    %174 = vector.load %arg8[%c1, %c0_79, %c0_80] : memref<6x8x128xf32, #tpu.memory_space<vmem>>, vector<1x8x128xf32>
    %175 = vector.shape_cast %174 : vector<1x8x128xf32> to vector<8x128xf32>
    %176 = vector.shape_cast %173 : vector<8x128xf32> to vector<1x8x128xf32>
    tpu.vector_store %arg8[%c1, %c0_79, %c0_80], %176 {strides = array<i32>} : memref<6x8x128xf32, #tpu.memory_space<vmem>>, vector<1x8x128xf32>,
    %c0_81 = arith.constant 0 : index
    %c0_82 = arith.constant 0 : index
    %177 = vector.load %arg1[%c0_81, %c0_82] : memref<8x896xf32, #tpu.memory_space<vmem>>, vector<8x896xf32>
    %cst_83 = arith.constant 0.899999976 : f32
    %178 = vector.broadcast %cst_83 : f32 to vector<8x896xf32>
    %179 = arith.mulf %178, %100 : vector<8x896xf32>
    %180 = arith.addf %179, %177 : vector<8x896xf32>
    %cst_84 = arith.constant 1.000000e+00 : f32
    %181 = vector.broadcast %cst_84 : f32 to vector<8x896xf32>
    %182 = arith.mulf %104, %181 : vector<8x896xf32>
    %183 = arith.subf %180, %182 : vector<8x896xf32>
    %cst_85 = arith.constant 1.000000e+00 : f32
    %184 = vector.broadcast %cst_85 : f32 to vector<8x896xf32>
    %185 = arith.cmpf ogt, %183, %184 : vector<8x896xf32>
    %186 = arith.extui %185 : vector<8x896xi1> to vector<8x896xi32>
    %187 = arith.sitofp %186 : vector<8x896xi32> to vector<8x896xf32>
    %188 = arith.mulf %183, %183 : vector<8x896xf32>
    %189 = arith.addf %106, %188 : vector<8x896xf32>
    %190 = vector.shape_cast %183 : vector<8x896xf32> to vector<1x8x896xf32>
    %cst_86 = arith.constant dense<0.000000e+00> : vector<1xf32>
    %191 = vector.multi_reduction <add>, %190, %cst_86 [1, 2] : vector<1x8x896xf32> to vector<1xf32>
    %192 = vector.shape_cast %191 : vector<1xf32> to vector<1x1x1xf32>
    %193 = vector.extract %192[0, 0, 0] : f32 from vector<1x1x1xf32>
    %194 = arith.mulf %193, %193 : f32
    %195 = arith.addf %112, %194 : f32
    %c0_87 = arith.constant 0 : index
    %c0_88 = arith.constant 0 : index
    %196 = vector.load %arg2[%c0_87, %c0_88] : memref<896x128xf32, #tpu.memory_space<vmem>>, vector<896x128xf32>
    %cst_89 = arith.constant dense<0.000000e+00> : vector<8x128xf32>
    %197 = tpu.matmul %187, %196, %cst_89 {dimension_numbers = #tpu.dot_dimension_numbers<[1], [0], [0], [1], [0, 0, 1, 1], [], []>} : vector<8x896xf32>, vector<896x128xf32>, vector<8x128xf32> -> vector<8x128xf32>
    %c0_90 = arith.constant 0 : index
    %c0_91 = arith.constant 0 : index
    %198 = vector.load %arg3[%c0_90, %c0_91] : memref<1x128xf32, #tpu.memory_space<vmem>>, vector<1x128xf32>
    %199 = vector.broadcast %198 : vector<1x128xf32> to vector<8x128xf32>
    %200 = arith.addf %197, %199 : vector<8x128xf32>
    %cst_92 = arith.constant 0.899999976 : f32
    %201 = vector.broadcast %cst_92 : f32 to vector<8x128xf32>
    %202 = arith.mulf %201, %123 : vector<8x128xf32>
    %203 = arith.addf %202, %200 : vector<8x128xf32>
    %cst_93 = arith.constant 1.000000e+00 : f32
    %204 = vector.broadcast %cst_93 : f32 to vector<8x128xf32>
    %205 = arith.mulf %127, %204 : vector<8x128xf32>
    %206 = arith.subf %203, %205 : vector<8x128xf32>
    %cst_94 = arith.constant 1.000000e+00 : f32
    %207 = vector.broadcast %cst_94 : f32 to vector<8x128xf32>
    %208 = arith.cmpf ogt, %206, %207 : vector<8x128xf32>
    %209 = arith.extui %208 : vector<8x128xi1> to vector<8x128xi32>
    %210 = arith.sitofp %209 : vector<8x128xi32> to vector<8x128xf32>
    %211 = arith.mulf %206, %206 : vector<8x128xf32>
    %212 = arith.addf %129, %211 : vector<8x128xf32>
    %213 = vector.shape_cast %206 : vector<8x128xf32> to vector<1x8x128xf32>
    %cst_95 = arith.constant dense<0.000000e+00> : vector<1xf32>
    %214 = vector.multi_reduction <add>, %213, %cst_95 [1, 2] : vector<1x8x128xf32> to vector<1xf32>
    %215 = vector.shape_cast %214 : vector<1xf32> to vector<1x1x1xf32>
    %216 = vector.extract %215[0, 0, 0] : f32 from vector<1x1x1xf32>
    %217 = arith.mulf %216, %216 : f32
    %218 = arith.addf %135, %217 : f32
    %c0_96 = arith.constant 0 : index
    %c0_97 = arith.constant 0 : index
    %219 = vector.load %arg4[%c0_96, %c0_97] : memref<128x128xf32, #tpu.memory_space<vmem>>, vector<128x128xf32>
    %cst_98 = arith.constant dense<0.000000e+00> : vector<8x128xf32>
    %220 = tpu.matmul %210, %219, %cst_98 {dimension_numbers = #tpu.dot_dimension_numbers<[1], [0], [0], [1], [0, 0, 1, 1], [], []>} : vector<8x128xf32>, vector<128x128xf32>, vector<8x128xf32> -> vector<8x128xf32>
    %c0_99 = arith.constant 0 : index
    %c0_100 = arith.constant 0 : index
    %221 = vector.load %arg5[%c0_99, %c0_100] : memref<1x128xf32, #tpu.memory_space<vmem>>, vector<1x128xf32>
    %222 = vector.broadcast %221 : vector<1x128xf32> to vector<8x128xf32>
    %223 = arith.addf %220, %222 : vector<8x128xf32>
    %cst_101 = arith.constant 0.899999976 : f32
    %224 = vector.broadcast %cst_101 : f32 to vector<8x128xf32>
    %225 = arith.mulf %224, %146 : vector<8x128xf32>
    %226 = arith.addf %225, %223 : vector<8x128xf32>
    %cst_102 = arith.constant 1.000000e+00 : f32
    %227 = vector.broadcast %cst_102 : f32 to vector<8x128xf32>
    %228 = arith.mulf %150, %227 : vector<8x128xf32>
    %229 = arith.subf %226, %228 : vector<8x128xf32>
    %cst_103 = arith.constant 1.000000e+00 : f32
    %230 = vector.broadcast %cst_103 : f32 to vector<8x128xf32>
    %231 = arith.cmpf ogt, %229, %230 : vector<8x128xf32>
    %232 = arith.extui %231 : vector<8x128xi1> to vector<8x128xi32>
    %233 = arith.sitofp %232 : vector<8x128xi32> to vector<8x128xf32>
    %234 = arith.mulf %229, %229 : vector<8x128xf32>
    %235 = arith.addf %152, %234 : vector<8x128xf32>
    %236 = vector.shape_cast %229 : vector<8x128xf32> to vector<1x8x128xf32>
    %cst_104 = arith.constant dense<0.000000e+00> : vector<1xf32>
    %237 = vector.multi_reduction <add>, %236, %cst_104 [1, 2] : vector<1x8x128xf32> to vector<1xf32>
    %238 = vector.shape_cast %237 : vector<1xf32> to vector<1x1x1xf32>
    %239 = vector.extract %238[0, 0, 0] : f32 from vector<1x1x1xf32>
    %240 = arith.mulf %239, %239 : f32
    %241 = arith.addf %158, %240 : f32
    %c0_105 = arith.constant 0 : index
    %c0_106 = arith.constant 0 : index
    %242 = vector.load %arg6[%c0_105, %c0_106] : memref<128x128xf32, #tpu.memory_space<vmem>>, vector<128x128xf32>
    %cst_107 = arith.constant dense<0.000000e+00> : vector<8x128xf32>
    %243 = tpu.matmul %233, %242, %cst_107 {dimension_numbers = #tpu.dot_dimension_numbers<[1], [0], [0], [1], [0, 0, 1, 1], [], []>} : vector<8x128xf32>, vector<128x128xf32>, vector<8x128xf32> -> vector<8x128xf32>
    %c0_108 = arith.constant 0 : index
    %c0_109 = arith.constant 0 : index
    %244 = vector.load %arg7[%c0_108, %c0_109] : memref<1x128xf32, #tpu.memory_space<vmem>>, vector<1x128xf32>
    %245 = vector.broadcast %244 : vector<1x128xf32> to vector<8x128xf32>
    %246 = arith.addf %243, %245 : vector<8x128xf32>
    %cst_110 = arith.constant 0.899999976 : f32
    %247 = vector.broadcast %cst_110 : f32 to vector<8x128xf32>
    %248 = arith.mulf %247, %169 : vector<8x128xf32>
    %249 = arith.addf %248, %246 : vector<8x128xf32>
    %cst_111 = arith.constant 1.000000e+00 : f32
    %250 = vector.broadcast %cst_111 : f32 to vector<8x128xf32>
    %251 = arith.mulf %173, %250 : vector<8x128xf32>
    %252 = arith.subf %249, %251 : vector<8x128xf32>
    %cst_112 = arith.constant 1.000000e+00 : f32
    %253 = vector.broadcast %cst_112 : f32 to vector<8x128xf32>
    %254 = arith.cmpf ogt, %252, %253 : vector<8x128xf32>
    %255 = arith.extui %254 : vector<8x128xi1> to vector<8x128xi32>
    %256 = arith.sitofp %255 : vector<8x128xi32> to vector<8x128xf32>
    %c2 = arith.constant 2 : index
    %c0_113 = arith.constant 0 : index
    %c0_114 = arith.constant 0 : index
    %257 = vector.load %arg8[%c2, %c0_113, %c0_114] : memref<6x8x128xf32, #tpu.memory_space<vmem>>, vector<1x8x128xf32>
    %258 = vector.shape_cast %257 : vector<1x8x128xf32> to vector<8x128xf32>
    %259 = vector.shape_cast %256 : vector<8x128xf32> to vector<1x8x128xf32>
    tpu.vector_store %arg8[%c2, %c0_113, %c0_114], %259 {strides = array<i32>} : memref<6x8x128xf32, #tpu.memory_space<vmem>>, vector<1x8x128xf32>,
    %c0_115 = arith.constant 0 : index
    %c0_116 = arith.constant 0 : index
    %260 = vector.load %arg1[%c0_115, %c0_116] : memref<8x896xf32, #tpu.memory_space<vmem>>, vector<8x896xf32>
    %cst_117 = arith.constant 0.899999976 : f32
    %261 = vector.broadcast %cst_117 : f32 to vector<8x896xf32>
    %262 = arith.mulf %261, %183 : vector<8x896xf32>
    %263 = arith.addf %262, %260 : vector<8x896xf32>
    %cst_118 = arith.constant 1.000000e+00 : f32
    %264 = vector.broadcast %cst_118 : f32 to vector<8x896xf32>
    %265 = arith.mulf %187, %264 : vector<8x896xf32>
    %266 = arith.subf %263, %265 : vector<8x896xf32>
    %cst_119 = arith.constant 1.000000e+00 : f32
    %267 = vector.broadcast %cst_119 : f32 to vector<8x896xf32>
    %268 = arith.cmpf ogt, %266, %267 : vector<8x896xf32>
    %269 = arith.extui %268 : vector<8x896xi1> to vector<8x896xi32>
    %270 = arith.sitofp %269 : vector<8x896xi32> to vector<8x896xf32>
    %271 = arith.mulf %266, %266 : vector<8x896xf32>
    %272 = arith.addf %189, %271 : vector<8x896xf32>
    %273 = vector.shape_cast %266 : vector<8x896xf32> to vector<1x8x896xf32>
    %cst_120 = arith.constant dense<0.000000e+00> : vector<1xf32>
    %274 = vector.multi_reduction <add>, %273, %cst_120 [1, 2] : vector<1x8x896xf32> to vector<1xf32>
    %275 = vector.shape_cast %274 : vector<1xf32> to vector<1x1x1xf32>
    %276 = vector.extract %275[0, 0, 0] : f32 from vector<1x1x1xf32>
    %277 = arith.mulf %276, %276 : f32
    %278 = arith.addf %195, %277 : f32
    %c0_121 = arith.constant 0 : index
    %c0_122 = arith.constant 0 : index
    %279 = vector.load %arg2[%c0_121, %c0_122] : memref<896x128xf32, #tpu.memory_space<vmem>>, vector<896x128xf32>
    %cst_123 = arith.constant dense<0.000000e+00> : vector<8x128xf32>
    %280 = tpu.matmul %270, %279, %cst_123 {dimension_numbers = #tpu.dot_dimension_numbers<[1], [0], [0], [1], [0, 0, 1, 1], [], []>} : vector<8x896xf32>, vector<896x128xf32>, vector<8x128xf32> -> vector<8x128xf32>
    %c0_124 = arith.constant 0 : index
    %c0_125 = arith.constant 0 : index
    %281 = vector.load %arg3[%c0_124, %c0_125] : memref<1x128xf32, #tpu.memory_space<vmem>>, vector<1x128xf32>
    %282 = vector.broadcast %281 : vector<1x128xf32> to vector<8x128xf32>
    %283 = arith.addf %280, %282 : vector<8x128xf32>
    %cst_126 = arith.constant 0.899999976 : f32
    %284 = vector.broadcast %cst_126 : f32 to vector<8x128xf32>
    %285 = arith.mulf %284, %206 : vector<8x128xf32>
    %286 = arith.addf %285, %283 : vector<8x128xf32>
    %cst_127 = arith.constant 1.000000e+00 : f32
    %287 = vector.broadcast %cst_127 : f32 to vector<8x128xf32>
    %288 = arith.mulf %210, %287 : vector<8x128xf32>
    %289 = arith.subf %286, %288 : vector<8x128xf32>
    %cst_128 = arith.constant 1.000000e+00 : f32
    %290 = vector.broadcast %cst_128 : f32 to vector<8x128xf32>
    %291 = arith.cmpf ogt, %289, %290 : vector<8x128xf32>
    %292 = arith.extui %291 : vector<8x128xi1> to vector<8x128xi32>
    %293 = arith.sitofp %292 : vector<8x128xi32> to vector<8x128xf32>
    %294 = arith.mulf %289, %289 : vector<8x128xf32>
    %295 = arith.addf %212, %294 : vector<8x128xf32>
    %296 = vector.shape_cast %289 : vector<8x128xf32> to vector<1x8x128xf32>
    %cst_129 = arith.constant dense<0.000000e+00> : vector<1xf32>
    %297 = vector.multi_reduction <add>, %296, %cst_129 [1, 2] : vector<1x8x128xf32> to vector<1xf32>
    %298 = vector.shape_cast %297 : vector<1xf32> to vector<1x1x1xf32>
    %299 = vector.extract %298[0, 0, 0] : f32 from vector<1x1x1xf32>
    %300 = arith.mulf %299, %299 : f32
    %301 = arith.addf %218, %300 : f32
    %c0_130 = arith.constant 0 : index
    %c0_131 = arith.constant 0 : index
    %302 = vector.load %arg4[%c0_130, %c0_131] : memref<128x128xf32, #tpu.memory_space<vmem>>, vector<128x128xf32>
    %cst_132 = arith.constant dense<0.000000e+00> : vector<8x128xf32>
    %303 = tpu.matmul %293, %302, %cst_132 {dimension_numbers = #tpu.dot_dimension_numbers<[1], [0], [0], [1], [0, 0, 1, 1], [], []>} : vector<8x128xf32>, vector<128x128xf32>, vector<8x128xf32> -> vector<8x128xf32>
    %c0_133 = arith.constant 0 : index
    %c0_134 = arith.constant 0 : index
    %304 = vector.load %arg5[%c0_133, %c0_134] : memref<1x128xf32, #tpu.memory_space<vmem>>, vector<1x128xf32>
    %305 = vector.broadcast %304 : vector<1x128xf32> to vector<8x128xf32>
    %306 = arith.addf %303, %305 : vector<8x128xf32>
    %cst_135 = arith.constant 0.899999976 : f32
    %307 = vector.broadcast %cst_135 : f32 to vector<8x128xf32>
    %308 = arith.mulf %307, %229 : vector<8x128xf32>
    %309 = arith.addf %308, %306 : vector<8x128xf32>
    %cst_136 = arith.constant 1.000000e+00 : f32
    %310 = vector.broadcast %cst_136 : f32 to vector<8x128xf32>
    %311 = arith.mulf %233, %310 : vector<8x128xf32>
    %312 = arith.subf %309, %311 : vector<8x128xf32>
    %cst_137 = arith.constant 1.000000e+00 : f32
    %313 = vector.broadcast %cst_137 : f32 to vector<8x128xf32>
    %314 = arith.cmpf ogt, %312, %313 : vector<8x128xf32>
    %315 = arith.extui %314 : vector<8x128xi1> to vector<8x128xi32>
    %316 = arith.sitofp %315 : vector<8x128xi32> to vector<8x128xf32>
    %317 = arith.mulf %312, %312 : vector<8x128xf32>
    %318 = arith.addf %235, %317 : vector<8x128xf32>
    %319 = vector.shape_cast %312 : vector<8x128xf32> to vector<1x8x128xf32>
    %cst_138 = arith.constant dense<0.000000e+00> : vector<1xf32>
    %320 = vector.multi_reduction <add>, %319, %cst_138 [1, 2] : vector<1x8x128xf32> to vector<1xf32>
    %321 = vector.shape_cast %320 : vector<1xf32> to vector<1x1x1xf32>
    %322 = vector.extract %321[0, 0, 0] : f32 from vector<1x1x1xf32>
    %323 = arith.mulf %322, %322 : f32
    %324 = arith.addf %241, %323 : f32
    %c0_139 = arith.constant 0 : index
    %c0_140 = arith.constant 0 : index
    %325 = vector.load %arg6[%c0_139, %c0_140] : memref<128x128xf32, #tpu.memory_space<vmem>>, vector<128x128xf32>
    %cst_141 = arith.constant dense<0.000000e+00> : vector<8x128xf32>
    %326 = tpu.matmul %316, %325, %cst_141 {dimension_numbers = #tpu.dot_dimension_numbers<[1], [0], [0], [1], [0, 0, 1, 1], [], []>} : vector<8x128xf32>, vector<128x128xf32>, vector<8x128xf32> -> vector<8x128xf32>
    %c0_142 = arith.constant 0 : index
    %c0_143 = arith.constant 0 : index
    %327 = vector.load %arg7[%c0_142, %c0_143] : memref<1x128xf32, #tpu.memory_space<vmem>>, vector<1x128xf32>
    %328 = vector.broadcast %327 : vector<1x128xf32> to vector<8x128xf32>
    %329 = arith.addf %326, %328 : vector<8x128xf32>
    %cst_144 = arith.constant 0.899999976 : f32
    %330 = vector.broadcast %cst_144 : f32 to vector<8x128xf32>
    %331 = arith.mulf %330, %252 : vector<8x128xf32>
    %332 = arith.addf %331, %329 : vector<8x128xf32>
    %cst_145 = arith.constant 1.000000e+00 : f32
    %333 = vector.broadcast %cst_145 : f32 to vector<8x128xf32>
    %334 = arith.mulf %256, %333 : vector<8x128xf32>
    %335 = arith.subf %332, %334 : vector<8x128xf32>
    %cst_146 = arith.constant 1.000000e+00 : f32
    %336 = vector.broadcast %cst_146 : f32 to vector<8x128xf32>
    %337 = arith.cmpf ogt, %335, %336 : vector<8x128xf32>
    %338 = arith.extui %337 : vector<8x128xi1> to vector<8x128xi32>
    %339 = arith.sitofp %338 : vector<8x128xi32> to vector<8x128xf32>
    %c3 = arith.constant 3 : index
    %c0_147 = arith.constant 0 : index
    %c0_148 = arith.constant 0 : index
    %340 = vector.load %arg8[%c3, %c0_147, %c0_148] : memref<6x8x128xf32, #tpu.memory_space<vmem>>, vector<1x8x128xf32>
    %341 = vector.shape_cast %340 : vector<1x8x128xf32> to vector<8x128xf32>
    %342 = vector.shape_cast %339 : vector<8x128xf32> to vector<1x8x128xf32>
    tpu.vector_store %arg8[%c3, %c0_147, %c0_148], %342 {strides = array<i32>} : memref<6x8x128xf32, #tpu.memory_space<vmem>>, vector<1x8x128xf32>,
    %c0_149 = arith.constant 0 : index
    %c0_150 = arith.constant 0 : index
    %343 = vector.load %arg1[%c0_149, %c0_150] : memref<8x896xf32, #tpu.memory_space<vmem>>, vector<8x896xf32>
    %cst_151 = arith.constant 0.899999976 : f32
    %344 = vector.broadcast %cst_151 : f32 to vector<8x896xf32>
    %345 = arith.mulf %344, %266 : vector<8x896xf32>
    %346 = arith.addf %345, %343 : vector<8x896xf32>
    %cst_152 = arith.constant 1.000000e+00 : f32
    %347 = vector.broadcast %cst_152 : f32 to vector<8x896xf32>
    %348 = arith.mulf %270, %347 : vector<8x896xf32>
    %349 = arith.subf %346, %348 : vector<8x896xf32>
    %cst_153 = arith.constant 1.000000e+00 : f32
    %350 = vector.broadcast %cst_153 : f32 to vector<8x896xf32>
    %351 = arith.cmpf ogt, %349, %350 : vector<8x896xf32>
    %352 = arith.extui %351 : vector<8x896xi1> to vector<8x896xi32>
    %353 = arith.sitofp %352 : vector<8x896xi32> to vector<8x896xf32>
    %354 = arith.mulf %349, %349 : vector<8x896xf32>
    %355 = arith.addf %272, %354 : vector<8x896xf32>
    %356 = vector.shape_cast %349 : vector<8x896xf32> to vector<1x8x896xf32>
    %cst_154 = arith.constant dense<0.000000e+00> : vector<1xf32>
    %357 = vector.multi_reduction <add>, %356, %cst_154 [1, 2] : vector<1x8x896xf32> to vector<1xf32>
    %358 = vector.shape_cast %357 : vector<1xf32> to vector<1x1x1xf32>
    %359 = vector.extract %358[0, 0, 0] : f32 from vector<1x1x1xf32>
    %360 = arith.mulf %359, %359 : f32
    %361 = arith.addf %278, %360 : f32
    %c0_155 = arith.constant 0 : index
    %c0_156 = arith.constant 0 : index
    %362 = vector.load %arg2[%c0_155, %c0_156] : memref<896x128xf32, #tpu.memory_space<vmem>>, vector<896x128xf32>
    %cst_157 = arith.constant dense<0.000000e+00> : vector<8x128xf32>
    %363 = tpu.matmul %353, %362, %cst_157 {dimension_numbers = #tpu.dot_dimension_numbers<[1], [0], [0], [1], [0, 0, 1, 1], [], []>} : vector<8x896xf32>, vector<896x128xf32>, vector<8x128xf32> -> vector<8x128xf32>
    %c0_158 = arith.constant 0 : index
    %c0_159 = arith.constant 0 : index
    %364 = vector.load %arg3[%c0_158, %c0_159] : memref<1x128xf32, #tpu.memory_space<vmem>>, vector<1x128xf32>
    %365 = vector.broadcast %364 : vector<1x128xf32> to vector<8x128xf32>
    %366 = arith.addf %363, %365 : vector<8x128xf32>
    %cst_160 = arith.constant 0.899999976 : f32
    %367 = vector.broadcast %cst_160 : f32 to vector<8x128xf32>
    %368 = arith.mulf %367, %289 : vector<8x128xf32>
    %369 = arith.addf %368, %366 : vector<8x128xf32>
    %cst_161 = arith.constant 1.000000e+00 : f32
    %370 = vector.broadcast %cst_161 : f32 to vector<8x128xf32>
    %371 = arith.mulf %293, %370 : vector<8x128xf32>
    %372 = arith.subf %369, %371 : vector<8x128xf32>
    %cst_162 = arith.constant 1.000000e+00 : f32
    %373 = vector.broadcast %cst_162 : f32 to vector<8x128xf32>
    %374 = arith.cmpf ogt, %372, %373 : vector<8x128xf32>
    %375 = arith.extui %374 : vector<8x128xi1> to vector<8x128xi32>
    %376 = arith.sitofp %375 : vector<8x128xi32> to vector<8x128xf32>
    %377 = arith.mulf %372, %372 : vector<8x128xf32>
    %378 = arith.addf %295, %377 : vector<8x128xf32>
    %379 = vector.shape_cast %372 : vector<8x128xf32> to vector<1x8x128xf32>
    %cst_163 = arith.constant dense<0.000000e+00> : vector<1xf32>
    %380 = vector.multi_reduction <add>, %379, %cst_163 [1, 2] : vector<1x8x128xf32> to vector<1xf32>
    %381 = vector.shape_cast %380 : vector<1xf32> to vector<1x1x1xf32>
    %382 = vector.extract %381[0, 0, 0] : f32 from vector<1x1x1xf32>
    %383 = arith.mulf %382, %382 : f32
    %384 = arith.addf %301, %383 : f32
    %c0_164 = arith.constant 0 : index
    %c0_165 = arith.constant 0 : index
    %385 = vector.load %arg4[%c0_164, %c0_165] : memref<128x128xf32, #tpu.memory_space<vmem>>, vector<128x128xf32>
    %cst_166 = arith.constant dense<0.000000e+00> : vector<8x128xf32>
    %386 = tpu.matmul %376, %385, %cst_166 {dimension_numbers = #tpu.dot_dimension_numbers<[1], [0], [0], [1], [0, 0, 1, 1], [], []>} : vector<8x128xf32>, vector<128x128xf32>, vector<8x128xf32> -> vector<8x128xf32>
    %c0_167 = arith.constant 0 : index
    %c0_168 = arith.constant 0 : index
    %387 = vector.load %arg5[%c0_167, %c0_168] : memref<1x128xf32, #tpu.memory_space<vmem>>, vector<1x128xf32>
    %388 = vector.broadcast %387 : vector<1x128xf32> to vector<8x128xf32>
    %389 = arith.addf %386, %388 : vector<8x128xf32>
    %cst_169 = arith.constant 0.899999976 : f32
    %390 = vector.broadcast %cst_169 : f32 to vector<8x128xf32>
    %391 = arith.mulf %390, %312 : vector<8x128xf32>
    %392 = arith.addf %391, %389 : vector<8x128xf32>
    %cst_170 = arith.constant 1.000000e+00 : f32
    %393 = vector.broadcast %cst_170 : f32 to vector<8x128xf32>
    %394 = arith.mulf %316, %393 : vector<8x128xf32>
    %395 = arith.subf %392, %394 : vector<8x128xf32>
    %cst_171 = arith.constant 1.000000e+00 : f32
    %396 = vector.broadcast %cst_171 : f32 to vector<8x128xf32>
    %397 = arith.cmpf ogt, %395, %396 : vector<8x128xf32>
    %398 = arith.extui %397 : vector<8x128xi1> to vector<8x128xi32>
    %399 = arith.sitofp %398 : vector<8x128xi32> to vector<8x128xf32>
    %400 = arith.mulf %395, %395 : vector<8x128xf32>
    %401 = arith.addf %318, %400 : vector<8x128xf32>
    %402 = vector.shape_cast %395 : vector<8x128xf32> to vector<1x8x128xf32>
    %cst_172 = arith.constant dense<0.000000e+00> : vector<1xf32>
    %403 = vector.multi_reduction <add>, %402, %cst_172 [1, 2] : vector<1x8x128xf32> to vector<1xf32>
    %404 = vector.shape_cast %403 : vector<1xf32> to vector<1x1x1xf32>
    %405 = vector.extract %404[0, 0, 0] : f32 from vector<1x1x1xf32>
    %406 = arith.mulf %405, %405 : f32
    %407 = arith.addf %324, %406 : f32
    %c0_173 = arith.constant 0 : index
    %c0_174 = arith.constant 0 : index
    %408 = vector.load %arg6[%c0_173, %c0_174] : memref<128x128xf32, #tpu.memory_space<vmem>>, vector<128x128xf32>
    %cst_175 = arith.constant dense<0.000000e+00> : vector<8x128xf32>
    %409 = tpu.matmul %399, %408, %cst_175 {dimension_numbers = #tpu.dot_dimension_numbers<[1], [0], [0], [1], [0, 0, 1, 1], [], []>} : vector<8x128xf32>, vector<128x128xf32>, vector<8x128xf32> -> vector<8x128xf32>
    %c0_176 = arith.constant 0 : index
    %c0_177 = arith.constant 0 : index
    %410 = vector.load %arg7[%c0_176, %c0_177] : memref<1x128xf32, #tpu.memory_space<vmem>>, vector<1x128xf32>
    %411 = vector.broadcast %410 : vector<1x128xf32> to vector<8x128xf32>
    %412 = arith.addf %409, %411 : vector<8x128xf32>
    %cst_178 = arith.constant 0.899999976 : f32
    %413 = vector.broadcast %cst_178 : f32 to vector<8x128xf32>
    %414 = arith.mulf %413, %335 : vector<8x128xf32>
    %415 = arith.addf %414, %412 : vector<8x128xf32>
    %cst_179 = arith.constant 1.000000e+00 : f32
    %416 = vector.broadcast %cst_179 : f32 to vector<8x128xf32>
    %417 = arith.mulf %339, %416 : vector<8x128xf32>
    %418 = arith.subf %415, %417 : vector<8x128xf32>
    %cst_180 = arith.constant 1.000000e+00 : f32
    %419 = vector.broadcast %cst_180 : f32 to vector<8x128xf32>
    %420 = arith.cmpf ogt, %418, %419 : vector<8x128xf32>
    %421 = arith.extui %420 : vector<8x128xi1> to vector<8x128xi32>
    %422 = arith.sitofp %421 : vector<8x128xi32> to vector<8x128xf32>
    %c4 = arith.constant 4 : index
    %c0_181 = arith.constant 0 : index
    %c0_182 = arith.constant 0 : index
    %423 = vector.load %arg8[%c4, %c0_181, %c0_182] : memref<6x8x128xf32, #tpu.memory_space<vmem>>, vector<1x8x128xf32>
    %424 = vector.shape_cast %423 : vector<1x8x128xf32> to vector<8x128xf32>
    %425 = vector.shape_cast %422 : vector<8x128xf32> to vector<1x8x128xf32>
    tpu.vector_store %arg8[%c4, %c0_181, %c0_182], %425 {strides = array<i32>} : memref<6x8x128xf32, #tpu.memory_space<vmem>>, vector<1x8x128xf32>,
    %c0_183 = arith.constant 0 : index
    %c0_184 = arith.constant 0 : index
    %426 = vector.load %arg1[%c0_183, %c0_184] : memref<8x896xf32, #tpu.memory_space<vmem>>, vector<8x896xf32>
    %cst_185 = arith.constant 0.899999976 : f32
    %427 = vector.broadcast %cst_185 : f32 to vector<8x896xf32>
    %428 = arith.mulf %427, %349 : vector<8x896xf32>
    %429 = arith.addf %428, %426 : vector<8x896xf32>
    %cst_186 = arith.constant 1.000000e+00 : f32
    %430 = vector.broadcast %cst_186 : f32 to vector<8x896xf32>
    %431 = arith.mulf %353, %430 : vector<8x896xf32>
    %432 = arith.subf %429, %431 : vector<8x896xf32>
    %cst_187 = arith.constant 1.000000e+00 : f32
    %433 = vector.broadcast %cst_187 : f32 to vector<8x896xf32>
    %434 = arith.cmpf ogt, %432, %433 : vector<8x896xf32>
    %435 = arith.extui %434 : vector<8x896xi1> to vector<8x896xi32>
    %436 = arith.sitofp %435 : vector<8x896xi32> to vector<8x896xf32>
    %437 = arith.mulf %432, %432 : vector<8x896xf32>
    %438 = arith.addf %355, %437 : vector<8x896xf32>
    %439 = vector.shape_cast %432 : vector<8x896xf32> to vector<1x8x896xf32>
    %cst_188 = arith.constant dense<0.000000e+00> : vector<1xf32>
    %440 = vector.multi_reduction <add>, %439, %cst_188 [1, 2] : vector<1x8x896xf32> to vector<1xf32>
    %441 = vector.shape_cast %440 : vector<1xf32> to vector<1x1x1xf32>
    %442 = vector.extract %441[0, 0, 0] : f32 from vector<1x1x1xf32>
    %443 = arith.mulf %442, %442 : f32
    %444 = arith.addf %361, %443 : f32
    %c0_189 = arith.constant 0 : index
    %c0_190 = arith.constant 0 : index
    %445 = vector.load %arg2[%c0_189, %c0_190] : memref<896x128xf32, #tpu.memory_space<vmem>>, vector<896x128xf32>
    %cst_191 = arith.constant dense<0.000000e+00> : vector<8x128xf32>
    %446 = tpu.matmul %436, %445, %cst_191 {dimension_numbers = #tpu.dot_dimension_numbers<[1], [0], [0], [1], [0, 0, 1, 1], [], []>} : vector<8x896xf32>, vector<896x128xf32>, vector<8x128xf32> -> vector<8x128xf32>
    %c0_192 = arith.constant 0 : index
    %c0_193 = arith.constant 0 : index
    %447 = vector.load %arg3[%c0_192, %c0_193] : memref<1x128xf32, #tpu.memory_space<vmem>>, vector<1x128xf32>
    %448 = vector.broadcast %447 : vector<1x128xf32> to vector<8x128xf32>
    %449 = arith.addf %446, %448 : vector<8x128xf32>
    %cst_194 = arith.constant 0.899999976 : f32
    %450 = vector.broadcast %cst_194 : f32 to vector<8x128xf32>
    %451 = arith.mulf %450, %372 : vector<8x128xf32>
    %452 = arith.addf %451, %449 : vector<8x128xf32>
    %cst_195 = arith.constant 1.000000e+00 : f32
    %453 = vector.broadcast %cst_195 : f32 to vector<8x128xf32>
    %454 = arith.mulf %376, %453 : vector<8x128xf32>
    %455 = arith.subf %452, %454 : vector<8x128xf32>
    %cst_196 = arith.constant 1.000000e+00 : f32
    %456 = vector.broadcast %cst_196 : f32 to vector<8x128xf32>
    %457 = arith.cmpf ogt, %455, %456 : vector<8x128xf32>
    %458 = arith.extui %457 : vector<8x128xi1> to vector<8x128xi32>
    %459 = arith.sitofp %458 : vector<8x128xi32> to vector<8x128xf32>
    %460 = arith.mulf %455, %455 : vector<8x128xf32>
    %461 = arith.addf %378, %460 : vector<8x128xf32>
    %462 = vector.shape_cast %455 : vector<8x128xf32> to vector<1x8x128xf32>
    %cst_197 = arith.constant dense<0.000000e+00> : vector<1xf32>
    %463 = vector.multi_reduction <add>, %462, %cst_197 [1, 2] : vector<1x8x128xf32> to vector<1xf32>
    %464 = vector.shape_cast %463 : vector<1xf32> to vector<1x1x1xf32>
    %465 = vector.extract %464[0, 0, 0] : f32 from vector<1x1x1xf32>
    %466 = arith.mulf %465, %465 : f32
    %467 = arith.addf %384, %466 : f32
    %c0_198 = arith.constant 0 : index
    %c0_199 = arith.constant 0 : index
    %468 = vector.load %arg4[%c0_198, %c0_199] : memref<128x128xf32, #tpu.memory_space<vmem>>, vector<128x128xf32>
    %cst_200 = arith.constant dense<0.000000e+00> : vector<8x128xf32>
    %469 = tpu.matmul %459, %468, %cst_200 {dimension_numbers = #tpu.dot_dimension_numbers<[1], [0], [0], [1], [0, 0, 1, 1], [], []>} : vector<8x128xf32>, vector<128x128xf32>, vector<8x128xf32> -> vector<8x128xf32>
    %c0_201 = arith.constant 0 : index
    %c0_202 = arith.constant 0 : index
    %470 = vector.load %arg5[%c0_201, %c0_202] : memref<1x128xf32, #tpu.memory_space<vmem>>, vector<1x128xf32>
    %471 = vector.broadcast %470 : vector<1x128xf32> to vector<8x128xf32>
    %472 = arith.addf %469, %471 : vector<8x128xf32>
    %cst_203 = arith.constant 0.899999976 : f32
    %473 = vector.broadcast %cst_203 : f32 to vector<8x128xf32>
    %474 = arith.mulf %473, %395 : vector<8x128xf32>
    %475 = arith.addf %474, %472 : vector<8x128xf32>
    %cst_204 = arith.constant 1.000000e+00 : f32
    %476 = vector.broadcast %cst_204 : f32 to vector<8x128xf32>
    %477 = arith.mulf %399, %476 : vector<8x128xf32>
    %478 = arith.subf %475, %477 : vector<8x128xf32>
    %cst_205 = arith.constant 1.000000e+00 : f32
    %479 = vector.broadcast %cst_205 : f32 to vector<8x128xf32>
    %480 = arith.cmpf ogt, %478, %479 : vector<8x128xf32>
    %481 = arith.extui %480 : vector<8x128xi1> to vector<8x128xi32>
    %482 = arith.sitofp %481 : vector<8x128xi32> to vector<8x128xf32>
    %483 = arith.mulf %478, %478 : vector<8x128xf32>
    %484 = arith.addf %401, %483 : vector<8x128xf32>
    %485 = vector.shape_cast %478 : vector<8x128xf32> to vector<1x8x128xf32>
    %cst_206 = arith.constant dense<0.000000e+00> : vector<1xf32>
    %486 = vector.multi_reduction <add>, %485, %cst_206 [1, 2] : vector<1x8x128xf32> to vector<1xf32>
    %487 = vector.shape_cast %486 : vector<1xf32> to vector<1x1x1xf32>
    %488 = vector.extract %487[0, 0, 0] : f32 from vector<1x1x1xf32>
    %489 = arith.mulf %488, %488 : f32
    %490 = arith.addf %407, %489 : f32
    %c0_207 = arith.constant 0 : index
    %c0_208 = arith.constant 0 : index
    %491 = vector.load %arg6[%c0_207, %c0_208] : memref<128x128xf32, #tpu.memory_space<vmem>>, vector<128x128xf32>
    %cst_209 = arith.constant dense<0.000000e+00> : vector<8x128xf32>
    %492 = tpu.matmul %482, %491, %cst_209 {dimension_numbers = #tpu.dot_dimension_numbers<[1], [0], [0], [1], [0, 0, 1, 1], [], []>} : vector<8x128xf32>, vector<128x128xf32>, vector<8x128xf32> -> vector<8x128xf32>
    %c0_210 = arith.constant 0 : index
    %c0_211 = arith.constant 0 : index
    %493 = vector.load %arg7[%c0_210, %c0_211] : memref<1x128xf32, #tpu.memory_space<vmem>>, vector<1x128xf32>
    %494 = vector.broadcast %493 : vector<1x128xf32> to vector<8x128xf32>
    %495 = arith.addf %492, %494 : vector<8x128xf32>
    %cst_212 = arith.constant 0.899999976 : f32
    %496 = vector.broadcast %cst_212 : f32 to vector<8x128xf32>
    %497 = arith.mulf %496, %418 : vector<8x128xf32>
    %498 = arith.addf %497, %495 : vector<8x128xf32>
    %cst_213 = arith.constant 1.000000e+00 : f32
    %499 = vector.broadcast %cst_213 : f32 to vector<8x128xf32>
    %500 = arith.mulf %422, %499 : vector<8x128xf32>
    %501 = arith.subf %498, %500 : vector<8x128xf32>
    %cst_214 = arith.constant 1.000000e+00 : f32
    %502 = vector.broadcast %cst_214 : f32 to vector<8x128xf32>
    %503 = arith.cmpf ogt, %501, %502 : vector<8x128xf32>
    %504 = arith.extui %503 : vector<8x128xi1> to vector<8x128xi32>
    %505 = arith.sitofp %504 : vector<8x128xi32> to vector<8x128xf32>
    %c5 = arith.constant 5 : index
    %c0_215 = arith.constant 0 : index
    %c0_216 = arith.constant 0 : index
    %506 = vector.load %arg8[%c5, %c0_215, %c0_216] : memref<6x8x128xf32, #tpu.memory_space<vmem>>, vector<1x8x128xf32>
    %507 = vector.shape_cast %506 : vector<1x8x128xf32> to vector<8x128xf32>
    %508 = vector.shape_cast %505 : vector<8x128xf32> to vector<1x8x128xf32>
    tpu.vector_store %arg8[%c5, %c0_215, %c0_216], %508 {strides = array<i32>} : memref<6x8x128xf32, #tpu.memory_space<vmem>>, vector<1x8x128xf32>,
    %509 = tpu.iota {dimensions = array<i32: 0>} : vector<4x128xi32>
    %cst_217 = arith.constant 0.000000e+00 : f32
    %510 = vector.broadcast %cst_217 : f32 to vector<4x128xf32>
    %511 = vector.shape_cast %438 : vector<8x896xf32> to vector<1x8x896xf32>
    %cst_218 = arith.constant dense<0.000000e+00> : vector<1xf32>
    %512 = vector.multi_reduction <add>, %511, %cst_218 [1, 2] : vector<1x8x896xf32> to vector<1xf32>
    %513 = vector.shape_cast %512 : vector<1xf32> to vector<1x1x1xf32>
    %514 = vector.extract %513[0, 0, 0] : f32 from vector<1x1x1xf32>
    %cst_219 = arith.constant 1.59438772E-4 : f32
    %515 = arith.mulf %444, %cst_219 : f32
    %516 = arith.subf %514, %515 : f32
    %cst_220 = arith.constant 1.59464194E-4 : f32
    %517 = arith.mulf %516, %cst_220 : f32
    %cst_221 = arith.constant 0.166666672 : f32
    %518 = arith.mulf %517, %cst_221 : f32
    %c0_i32 = arith.constant 0 : i32
    %519 = vector.broadcast %c0_i32 : i32 to vector<4x128xi32>
    %520 = arith.cmpi eq, %509, %519 : vector<4x128xi32>
    %521 = vector.broadcast %518 : f32 to vector<4x128xf32>
    %522 = arith.select %520, %521, %510 : vector<4x128xi1>, vector<4x128xf32>
    %523 = vector.shape_cast %461 : vector<8x128xf32> to vector<1x8x128xf32>
    %cst_222 = arith.constant dense<0.000000e+00> : vector<1xf32>
    %524 = vector.multi_reduction <add>, %523, %cst_222 [1, 2] : vector<1x8x128xf32> to vector<1xf32>
    %525 = vector.shape_cast %524 : vector<1xf32> to vector<1x1x1xf32>
    %526 = vector.extract %525[0, 0, 0] : f32 from vector<1x1x1xf32>
    %cst_223 = arith.constant 3.906250e-03 : f32
    %527 = arith.mulf %467, %cst_223 : f32
    %528 = arith.subf %526, %527 : f32
    %cst_224 = arith.constant 0.00392156886 : f32
    %529 = arith.mulf %528, %cst_224 : f32
    %cst_225 = arith.constant 0.166666672 : f32
    %530 = arith.mulf %529, %cst_225 : f32
    %c1_i32 = arith.constant 1 : i32
    %531 = vector.broadcast %c1_i32 : i32 to vector<4x128xi32>
    %532 = arith.cmpi eq, %509, %531 : vector<4x128xi32>
    %533 = vector.broadcast %530 : f32 to vector<4x128xf32>
    %534 = arith.select %532, %533, %522 : vector<4x128xi1>, vector<4x128xf32>
    %535 = vector.shape_cast %484 : vector<8x128xf32> to vector<1x8x128xf32>
    %cst_226 = arith.constant dense<0.000000e+00> : vector<1xf32>
    %536 = vector.multi_reduction <add>, %535, %cst_226 [1, 2] : vector<1x8x128xf32> to vector<1xf32>
    %537 = vector.shape_cast %536 : vector<1xf32> to vector<1x1x1xf32>
    %538 = vector.extract %537[0, 0, 0] : f32 from vector<1x1x1xf32>
    %cst_227 = arith.constant 3.906250e-03 : f32
    %539 = arith.mulf %490, %cst_227 : f32
    %540 = arith.subf %538, %539 : f32
    %cst_228 = arith.constant 0.00392156886 : f32
    %541 = arith.mulf %540, %cst_228 : f32
    %cst_229 = arith.constant 0.166666672 : f32
    %542 = arith.mulf %541, %cst_229 : f32
    %c2_i32 = arith.constant 2 : i32
    %543 = vector.broadcast %c2_i32 : i32 to vector<4x128xi32>
    %544 = arith.cmpi eq, %509, %543 : vector<4x128xi32>
    %545 = vector.broadcast %542 : f32 to vector<4x128xf32>
    %546 = arith.select %544, %545, %534 : vector<4x128xi1>, vector<4x128xf32>
    %c0_230 = arith.constant 0 : index
    %c0_231 = arith.constant 0 : index
    %547 = vector.load %arg9[%c0_230, %c0_231] : memref<4x128xf32, #tpu.memory_space<vmem>>, vector<4x128xf32>
    tpu.vector_store %arg9[%c0_230, %c0_231], %546 {strides = array<i32>} : memref<4x128xf32, #tpu.memory_space<vmem>>, vector<4x128xf32>,
    return
  }
  func.func @transform_0(%arg0: i32) -> (i32, i32) {
    %c0_i32 = arith.constant 0 : i32
    %c0_i32_0 = arith.constant 0 : i32
    %c0_i32_1 = arith.constant 0 : i32
    return %c0_i32, %c0_i32_0 : i32, i32
  }
  func.func @transform_1(%arg0: i32) -> (i32, i32) {
    %c0_i32 = arith.constant 0 : i32
    %c0_i32_0 = arith.constant 0 : i32
    %c0_i32_1 = arith.constant 0 : i32
    return %c0_i32, %c0_i32_0 : i32, i32
  }
  func.func @transform_2(%arg0: i32) -> (i32, i32) {
    %c0_i32 = arith.constant 0 : i32
    %c0_i32_0 = arith.constant 0 : i32
    %c0_i32_1 = arith.constant 0 : i32
    return %c0_i32, %c0_i32_0 : i32, i32
  }
  func.func @transform_3(%arg0: i32) -> (i32, i32) {
    %c0_i32 = arith.constant 0 : i32
    %c0_i32_0 = arith.constant 0 : i32
    %c0_i32_1 = arith.constant 0 : i32
    return %c0_i32, %c0_i32_0 : i32, i32
  }
  func.func @transform_4(%arg0: i32) -> (i32, i32) {
    %c0_i32 = arith.constant 0 : i32
    %c0_i32_0 = arith.constant 0 : i32
    %c0_i32_1 = arith.constant 0 : i32
    return %c0_i32, %c0_i32_0 : i32, i32
  }
  func.func @transform_5(%arg0: i32) -> (i32, i32) {
    %c0_i32 = arith.constant 0 : i32
    %c0_i32_0 = arith.constant 0 : i32
    %c0_i32_1 = arith.constant 0 : i32
    return %c0_i32, %c0_i32_0 : i32, i32
  }
  func.func @transform_6(%arg0: i32) -> (i32, i32) {
    %c0_i32 = arith.constant 0 : i32
    %c0_i32_0 = arith.constant 0 : i32
    %c0_i32_1 = arith.constant 0 : i32
    return %c0_i32, %c0_i32_0 : i32, i32
  }
  func.func @transform_7(%arg0: i32) -> (i32, i32, i32) {
    %c0_i32 = arith.constant 0 : i32
    %c0_i32_0 = arith.constant 0 : i32
    %c0_i32_1 = arith.constant 0 : i32
    %c0_i32_2 = arith.constant 0 : i32
    return %c0_i32, %c0_i32_0, %c0_i32_1 : i32, i32, i32
  }
  func.func @transform_8(%arg0: i32) -> (i32, i32) {
    %c0_i32 = arith.constant 0 : i32
    %c0_i32_0 = arith.constant 0 : i32
    %c0_i32_1 = arith.constant 0 : i32
    return %c0_i32, %c0_i32_0 : i32, i32
  }
}

</mosaic_0001>

<bundles_post_ra>
// kernel: tpu_custom_call.1
= control target key start
LH: loop header
LB: loop body
LE: loop exit
PB: predicated region body
PF: predicated region fallthrough
CT: control target
= control target key end

     0   :  { %14 = vsyncpa [#allocation3], 0  ;;  %s9079_s0 = inlined_call_operand.hbm [shape: f32[8,896], index: 0, kind: input, shape index: {}]   ;;  %s9080_s1 = inlined_call_operand.hbm [shape: f32[896,128], index: 1, kind: input, shape index: {}]   ;;  %s9081_s2 = inlined_call_operand.vmem [shape: f32[1,128], index: 2, kind: input, shape index: {}]   ;;  %s9082_s3 = inlined_call_operand.hbm [shape: f32[128,128], index: 3, kind: input, shape index: {}]   ;;  %s9083_s4 = inlined_call_operand.vmem [shape: f32[1,128], index: 4, kind: input, shape index: {}]   ;;  %s9084_s5 = inlined_call_operand.hbm [shape: f32[128,128], index: 5, kind: input, shape index: {}]   ;;  %s9085_s6 = inlined_call_operand.vmem [shape: f32[1,128], index: 6, kind: input, shape index: {}]   ;;  %s9086_s7 = inlined_call_operand.hbm [shape: f32[6,8,128], index: 7, kind: output, shape index: {0}]   ;;  %s9087_s8 = inlined_call_operand.hbm [shape: f32[4,128], index: 8, kind: output, shape index: {1}]  }
   0x1   :  { %15 = vsyncpa [#allocation6], 0 }
   0x2   :  { %16 = vsyncpa [#allocation9], 0 }
   0x3   :  { %17 = vsyncpa [#allocation4], 0 }
   0x4   :  { %18 = vsyncpa [#allocation12], 0  ;;  %s7327_s27 = smov [#allocation5]   ;;  %s7185_s9 = scalar_lea.hbm %s9080_s1, 14336 }
   0x5   :  { %s34_s28 = sshll.u32 %s7327_s27, 4  ;;  %p7186_p0 = scmp.ne.s32.totalorder %s9080_s1, %s7185_s9  ;;  %s35_s28 = int_to_ptr.vmem [resolvable:$true] %s34_s28 }
   0x6   :  { %p7189_p1 = scmp.lt.u32.totalorder %s7185_s9, %s9080_s1 }
   0x8   :  { %p7191_p2 = pnand %p7189_p1, %p7186_p0 }
   0xa   :  { %7194 = shalt.err (!%p7191_p2)
}
   0xb   :  { %s7195_s14 = scalar_lea.vmem %s35_s28, 14336  ;;  %p7200_p4 = scmp.lt.s32.totalorder %s35_s28, %s35_s28 }
   0xc   :  { %p7196_p3 = scmp.ne.s32.totalorder %s35_s28, %s7195_s14  ;;  %p7201_p5 = scmp.lt.s32.totalorder %s7195_s14, %s7195_s14 }
   0xe   :  { %p7202_p6 = por %p7201_p5, %p7200_p4 }
  0x10   :  { %p7203_p7 = pnand %p7202_p6, %p7196_p3 }
  0x12   :  { %7206 = shalt.err (!%p7203_p7)
}
  0x13   :  { %s9224_s15 = smov 128   ;;  %s9225_s16 = smov 8  }
  0x14   :  { %40 = dma.hbm_to_vmem [thread:$0]  %s9080_s1, 14336, %s35_s28, [#allocation6], %s9224_s15, %s9224_s15, %s9225_s16  }
  0x15   :  { %s7330_s19 = smov [#allocation2]   ;;  %s7331_s21 = smov [#allocation7]  }
  0x16   :  { %s25_s20 = sshll.u32 %s7330_s19, 4  ;;  %s48_s22 = sshll.u32 %s7331_s21, 4  ;;  %s26_s20 = int_to_ptr.vmem [resolvable:$true] %s25_s20  ;;  %s49_s22 = int_to_ptr.vmem [resolvable:$true] %s48_s22 }
  0x17   :  { %s7207_s25 = scalar_lea.hbm %s9079_s0, 896 }
  0x18   :  { %p7208_p8 = scmp.ne.s32.totalorder %s9079_s0, %s7207_s25  ;;  %p7211_p9 = scmp.lt.u32.totalorder %s7207_s25, %s9079_s0 }
  0x1a   :  { %p7213_p10 = pnand %p7211_p9, %p7208_p8 }
  0x1c   :  { %7216 = shalt.err (!%p7213_p10)
}
  0x1d   :  { %s7217_s1 = scalar_lea.vmem %s26_s20, 896  ;;  %p7222_p12 = scmp.lt.s32.totalorder %s26_s20, %s26_s20 }
  0x1e   :  { %p7218_p11 = scmp.ne.s32.totalorder %s26_s20, %s7217_s1  ;;  %p7223_p13 = scmp.lt.s32.totalorder %s7217_s1, %s7217_s1 }
  0x20   :  { %p7224_p0 = por %p7223_p13, %p7222_p12 }
  0x22   :  { %p7225_p1 = pnand %p7224_p0, %p7218_p11 }
  0x24   :  { %7228 = shalt.err (!%p7225_p1)
}
  0x25   :  { %28 = dma.hbm_to_vmem [thread:$0]  %s9079_s0, 896, %s26_s20, [#allocation3]  }
  0x26   :  { %s7229_s12 = scalar_lea.hbm %s9082_s3, 2048 }
  0x27   :  { %p7230_p2 = scmp.ne.s32.totalorder %s9082_s3, %s7229_s12  ;;  %p7233_p3 = scmp.lt.u32.totalorder %s7229_s12, %s9082_s3 }
  0x29   :  { %p7235_p4 = pnand %p7233_p3, %p7230_p2 }
  0x2b   :  { %7238 = shalt.err (!%p7235_p4)
}
  0x2c   :  { %s7239_s19 = scalar_lea.vmem %s49_s22, 2048  ;;  %p7244_p6 = scmp.lt.s32.totalorder %s49_s22, %s49_s22 }
  0x2d   :  { %p7240_p5 = scmp.ne.s32.totalorder %s49_s22, %s7239_s19  ;;  %p7245_p7 = scmp.lt.s32.totalorder %s7239_s19, %s7239_s19 }
  0x2f   :  { %p7246_p8 = por %p7245_p7, %p7244_p6 }
  0x31   :  { %p7247_p9 = pnand %p7246_p8, %p7240_p5 }
  0x33   :  { %7250 = shalt.err (!%p7247_p9)
}
  0x34   :  { %54 = dma.hbm_to_vmem [thread:$0]  %s9082_s3, 2048, %s49_s22, [#allocation6], %s9224_s15, %s9224_s15, %s9225_s16  }
  0x35   :  { %s7332_s21 = smov [#allocation8]   ;;  %s7251_s26 = scalar_lea.hbm %s9084_s5, 2048 }
  0x36   :  { %s62_s23 = sshll.u32 %s7332_s21, 4  ;;  %p7252_p10 = scmp.ne.s32.totalorder %s9084_s5, %s7251_s26  ;;  %s63_s23 = int_to_ptr.vmem [resolvable:$true] %s62_s23 }
  0x37   :  { %p7255_p11 = scmp.lt.u32.totalorder %s7251_s26, %s9084_s5 }
  0x39   :  { %p7257_p12 = pnand %p7255_p11, %p7252_p10 }
  0x3b   :  { %7260 = shalt.err (!%p7257_p12)
}
  0x3c   :  { %s7261_s28 = scalar_lea.vmem %s63_s23, 2048  ;;  %p7266_p0 = scmp.lt.s32.totalorder %s63_s23, %s63_s23 }
  0x3d   :  { %p7262_p13 = scmp.ne.s32.totalorder %s63_s23, %s7261_s28  ;;  %p7267_p1 = scmp.lt.s32.totalorder %s7261_s28, %s7261_s28 }
  0x3f   :  { %p7268_p2 = por %p7267_p1, %p7266_p0 }
  0x41   :  { %p7269_p3 = pnand %p7268_p2, %p7262_p13 }
  0x43   :  { %7272 = shalt.err (!%p7269_p3)
}
  0x44   :  { %68 = dma.hbm_to_vmem [thread:$0]  %s9084_s5, 2048, %s63_s23, [#allocation9], %s9224_s15, %s9224_s15, %s9225_s16  }
  0x45   :  { %7317 = dma.done.wait [#allocation3], 896  }
  0x46   :  { %7318 = vsyncadd [#allocation3], 4294966400 }
  0x47   :  { %7319 = dma.done.wait [#allocation6], 16384  }
  0x48   :  { %7320 = vsyncadd [#allocation6], 4294950912 }
  0x49   :  { %7321 = dma.done.wait [#allocation9], 2048  }
  0x4a   :  { %7322 = vsyncadd [#allocation9], 4294965248  ;;  %v165_v0 = vld [vmem:[#allocation5 + $0x80] sm:$0xff]  ;;  %v166_v1 = vld [vmem:[#allocation5 + $0x88] sm:$0xff]  ;;  %vm7335_vm4 = vmmov 0  }
  0x4b   :  { %v149_v2 = vld [vmem:[#allocation5] sm:$0xff]  ;;  %v6116_v3 = vpack.c.bf16 %v166_v1, %v165_v0  ;;  %v150_v4 = vld [vmem:[#allocation5 + $0x8] sm:$0xff]  ;;  %v167_v11 = vld [vmem:[#allocation5 + $0x90] sm:$0xff] }
  0x4c   :  { %v197_v5 = vld [vmem:[#allocation5 + $0x180] sm:$0xff]  ;;  %v198_v6 = vld [vmem:[#allocation5 + $0x188] sm:$0xff]  ;;  %v6118_v7 = vpack.c.bf16 %v150_v4, %v149_v2  ;;  %v168_v13 = vld [vmem:[#allocation5 + $0x98] sm:$0xff] }
  0x4d   :  { %v6148_v8 = vpack.c.bf16 %v198_v6, %v197_v5  ;;  %v181_v9 = vld [vmem:[#allocation5 + $0x100] sm:$0xff]  ;;  %v182_v10 = vld [vmem:[#allocation5 + $0x108] sm:$0xff]  ;;  %6117 = vmatprep.subr.bf16.mxu0 %v6116_v3  ;;  %v151_v14 = vld [vmem:[#allocation5 + $0x10] sm:$0xff]  ;;  %v6120_v16 = vpack.c.bf16 %v168_v13, %v167_v11 }
  0x4e   :  { %v6150_v12 = vpack.c.bf16 %v182_v10, %v181_v9  ;;  %v152_v15 = vld [vmem:[#allocation5 + $0x18] sm:$0xff]  ;;  %6119 = vmatpush3.bf16.msra.mxu0 %v6118_v7  ;;  %v199_v18 = vld [vmem:[#allocation5 + $0x190] sm:$0xff]  ;;  %v169_v23 = vld [vmem:[#allocation5 + $0xa0] sm:$0xff] }
  0x4f   :  { %6149 = vmatprep.subr.bf16.mxu1 %v6148_v8  ;;  %v6122_v17 = vpack.c.bf16 %v152_v15, %v151_v14  ;;  %v200_v19 = vld [vmem:[#allocation5 + $0x198] sm:$0xff]  ;;  %v183_v20 = vld [vmem:[#allocation5 + $0x110] sm:$0xff]  ;;  %v170_v24 = vld [vmem:[#allocation5 + $0xa8] sm:$0xff]  ;;  %6121 = vmatprep.subr.bf16.mxu0 %v6120_v16 }
  0x50   :  { %6151 = vmatpush3.bf16.msra.mxu1 %v6150_v12  ;;  %v6152_v21 = vpack.c.bf16 %v200_v19, %v199_v18  ;;  %v184_v22 = vld [vmem:[#allocation5 + $0x118] sm:$0xff]  ;;  %v6124_v26 = vpack.c.bf16 %v170_v24, %v169_v23  ;;  %v153_v27 = vld [vmem:[#allocation5 + $0x20] sm:$0xff]  ;;  %v154_v28 = vld [vmem:[#allocation5 + $0x28] sm:$0xff] }
  0x51   :  { %v6154_v25 = vpack.c.bf16 %v184_v22, %v183_v20  ;;  %v201_v29 = vld [vmem:[#allocation5 + $0x1a0] sm:$0xff]  ;;  %v202_v30 = vld [vmem:[#allocation5 + $0x1a8] sm:$0xff]  ;;  %v6126_v33 = vpack.c.bf16 %v154_v28, %v153_v27  ;;  %v171_v35 = vld [vmem:[#allocation5 + $0xb0] sm:$0xff] }
  0x52   :  { %6153 = vmatprep.subr.bf16.mxu1 %v6152_v21  ;;  %v185_v31 = vld [vmem:[#allocation5 + $0x120] sm:$0xff]  ;;  %v186_v32 = vld [vmem:[#allocation5 + $0x128] sm:$0xff]  ;;  %6123 = vmatpush3.bf16.msra.mxu0 %v6122_v17  ;;  %v6156_v34 = vpack.c.bf16 %v202_v30, %v201_v29  ;;  %v172_v36 = vld [vmem:[#allocation5 + $0xb8] sm:$0xff]  ;;  %v9097_v21 = vmov 1.0  }
  0x53   :  { %v155_v37 = vld [vmem:[#allocation5 + $0x30] sm:$0xff]  ;;  %6125 = vmatprep.subr.bf16.mxu0 %v6124_v26  ;;  %v6158_v38 = vpack.c.bf16 %v186_v32, %v185_v31  ;;  %v6128_v39 = vpack.c.bf16 %v172_v36, %v171_v35  ;;  %v156_v40 = vld [vmem:[#allocation5 + $0x38] sm:$0xff]  ;;  %v173_v46 = vld [vmem:[#allocation5 + $0xc0] sm:$0xff] }
  0x54   :  { %6155 = vmatpush3.bf16.msra.mxu1 %v6154_v25  ;;  %v203_v41 = vld [vmem:[#allocation5 + $0x1b0] sm:$0xff]  ;;  %v204_v42 = vld [vmem:[#allocation5 + $0x1b8] sm:$0xff]  ;;  %v174_v47 = vld [vmem:[#allocation5 + $0xc8] sm:$0xff]  ;;  %v6130_v48 = vpack.c.bf16 %v156_v40, %v155_v37 }
  0x55   :  { %6157 = vmatprep.subr.bf16.mxu1 %v6156_v34  ;;  %v6160_v43 = vpack.c.bf16 %v204_v42, %v203_v41  ;;  %v187_v44 = vld [vmem:[#allocation5 + $0x130] sm:$0xff]  ;;  %v188_v45 = vld [vmem:[#allocation5 + $0x138] sm:$0xff]  ;;  %v205_v49 = vld [vmem:[#allocation5 + $0x1c0] sm:$0xff]  ;;  %v6132_v52 = vpack.c.bf16 %v174_v47, %v173_v46 }
  0x56   :  { %6127 = vmatpush3.bf16.msra.mxu0 %v6126_v33  ;;  %v206_v50 = vld [vmem:[#allocation5 + $0x1c8] sm:$0xff]  ;;  %v6162_v51 = vpack.c.bf16 %v188_v45, %v187_v44  ;;  %v157_v53 = vld [vmem:[#allocation5 + $0x40] sm:$0xff]  ;;  %v175_v58 = vld [vmem:[#allocation5 + $0xd0] sm:$0xff] }
  0x57   :  { %6129 = vmatprep.subr.bf16.mxu0 %v6128_v39  ;;  %v158_v54 = vld [vmem:[#allocation5 + $0x48] sm:$0xff]  ;;  %v189_v55 = vld [vmem:[#allocation5 + $0x140] sm:$0xff]  ;;  %v6164_v56 = vpack.c.bf16 %v206_v50, %v205_v49  ;;  %v176_v59 = vld [vmem:[#allocation5 + $0xd8] sm:$0xff] }
  0x58   :  { %6159 = vmatpush3.bf16.msra.mxu1 %v6158_v38  ;;  %v190_v57 = vld [vmem:[#allocation5 + $0x148] sm:$0xff]  ;;  %v207_v60 = vld [vmem:[#allocation5 + $0x1d0] sm:$0xff]  ;;  %v208_v61 = vld [vmem:[#allocation5 + $0x1d8] sm:$0xff]  ;;  %v6134_v62 = vpack.c.bf16 %v158_v54, %v157_v53  ;;  %v6136_v0 = vpack.c.bf16 %v176_v59, %v175_v58 }
  0x59   :  { %6161 = vmatprep.subr.bf16.mxu1 %v6160_v43  ;;  %v6166_v63 = vpack.c.bf16 %v190_v57, %v189_v55  ;;  %v159_v1 = vld [vmem:[#allocation5 + $0x50] sm:$0xff]  ;;  %v160_v2 = vld [vmem:[#allocation5 + $0x58] sm:$0xff]  ;;  %v6168_v4 = vpack.c.bf16 %v208_v61, %v207_v60  ;;  %v177_v6 = vld [vmem:[#allocation5 + $0xe0] sm:$0xff]  ;;  %v9126_v57 = vmov 0.0  }
  0x5a   :  { %6131 = vmatpush3.bf16.msra.mxu0 %v6130_v48  ;;  %v191_v3 = vld [vmem:[#allocation5 + $0x150] sm:$0xff]  ;;  %v192_v5 = vld [vmem:[#allocation5 + $0x158] sm:$0xff]  ;;  %v178_v7 = vld [vmem:[#allocation5 + $0xe8] sm:$0xff]  ;;  %v6138_v10 = vpack.c.bf16 %v160_v2, %v159_v1  ;;  %v9099_v48 = vmov 0.0|0.0  }
  0x5b   :  { %6133 = vmatprep.subr.bf16.mxu0 %v6132_v52  ;;  %v209_v8 = vld [vmem:[#allocation5 + $0x1e0] sm:$0xff]  ;;  %v210_v9 = vld [vmem:[#allocation5 + $0x1e8] sm:$0xff]  ;;  %v7441_v12 = vld [vmem:[#allocation2 + $0x8] sm:$0xff]  ;;  %v6170_v13 = vpack.c.bf16 %v192_v5, %v191_v3  ;;  %v6140_v14 = vpack.c.bf16 %v178_v7, %v177_v6 }
  0x5c   :  { %6163 = vmatpush3.bf16.msra.mxu1 %v6162_v51  ;;  %v161_v11 = vld [vmem:[#allocation5 + $0x60] sm:$0xff]  ;;  %v162_v15 = vld [vmem:[#allocation5 + $0x68] sm:$0xff]  ;;  %vm98_vm0 = vcmp.gt.f32.partialorder %v7441_v12, 1.0  ;;  %v6172_v18 = vpack.c.bf16 %v210_v9, %v209_v8  ;;  %v179_v19 = vld [vmem:[#allocation5 + $0xf0] sm:$0xff] }
  0x5d   :  { %6165 = vmatprep.subr.bf16.mxu1 %v6164_v56  ;;  %v193_v16 = vld [vmem:[#allocation5 + $0x160] sm:$0xff]  ;;  %v194_v17 = vld [vmem:[#allocation5 + $0x168] sm:$0xff]  ;;  %v180_v20 = vld [vmem:[#allocation5 + $0xf8] sm:$0xff]  ;;  %4426 = vmatprep.mubr.msk.f32.mxu0 %vm98_vm0, %v9097_v21  ;;  %v6142_v25 = vpack.c.bf16 %v162_v15, %v161_v11 }
  0x5e   :  { %6135 = vmatpush3.bf16.msra.mxu0 %v6134_v62  ;;  %v7447_v22 = vld [vmem:[#allocation2 + $0x18] sm:$0xff]  ;;  %v211_v23 = vld [vmem:[#allocation5 + $0x1f0] sm:$0xff]  ;;  %v212_v24 = vld [vmem:[#allocation5 + $0x1f8] sm:$0xff]  ;;  %v6174_v26 = vpack.c.bf16 %v194_v17, %v193_v16  ;;  %v6144_v27 = vpack.c.bf16 %v180_v20, %v179_v19 }
  0x5f   :  { %6137 = vmatprep.subr.bf16.mxu0 %v6136_v0  ;;  %vm100_vm1 = vcmp.gt.f32.partialorder %v7447_v22, 1.0  ;;  %v163_v28 = vld [vmem:[#allocation5 + $0x70] sm:$0xff]  ;;  %v164_v29 = vld [vmem:[#allocation5 + $0x78] sm:$0xff]  ;;  %v6176_v31 = vpack.c.bf16 %v212_v24, %v211_v23  ;;  %v229_v33 = vld [vmem:[#allocation5 + $0x280] sm:$0xff] }
  0x60   :  { %6167 = vmatpush3.bf16.msra.mxu1 %v6166_v63  ;;  %v195_v30 = vld [vmem:[#allocation5 + $0x170] sm:$0xff]  ;;  %v196_v32 = vld [vmem:[#allocation5 + $0x178] sm:$0xff]  ;;  %v230_v34 = vld [vmem:[#allocation5 + $0x288] sm:$0xff]  ;;  %4428 = vmatprep.mubr.msk.f32.mxu1 %vm100_vm1, %v9097_v21  ;;  %v6146_v35 = vpack.c.bf16 %v164_v29, %v163_v28 }
  0x61   :  { %6169 = vmatprep.subr.bf16.mxu1 %v6168_v4  ;;  %v6178_v36 = vpack.c.bf16 %v196_v32, %v195_v30  ;;  %v7453_v37 = vld [vmem:[#allocation2] sm:$0xff]  ;;  %v6180_v38 = vpack.c.bf16 %v230_v34, %v229_v33  ;;  %v213_v39 = vld [vmem:[#allocation5 + $0x200] sm:$0xff]  ;;  %v7455_v41 = vld [vmem:[#allocation2 + $0x10] sm:$0xff] }
  0x62   :  { %6139 = vmatpush3.bf16.msra.mxu0 %v6138_v10  ;;  %v214_v40 = vld [vmem:[#allocation5 + $0x208] sm:$0xff]  ;;  %v231_v42 = vld [vmem:[#allocation5 + $0x290] sm:$0xff]  ;;  %v232_v43 = vld [vmem:[#allocation5 + $0x298] sm:$0xff]  ;;  %vm97_vm2 = vcmp.gt.f32.partialorder %v7453_v37, 1.0  ;;  %vm99_vm3 = vcmp.gt.f32.partialorder %v7455_v41, 1.0 }
  0x63   :  { %6141 = vmatprep.subr.bf16.mxu0 %v6140_v14  ;;  %v6182_v44 = vpack.c.bf16 %v214_v40, %v213_v39  ;;  %v6184_v45 = vpack.c.bf16 %v232_v43, %v231_v42  ;;  %v215_v46 = vld [vmem:[#allocation5 + $0x210] sm:$0xff]  ;;  %v216_v47 = vld [vmem:[#allocation5 + $0x218] sm:$0xff]  ;;  %v245_v49 = vld [vmem:[#allocation5 + $0x300] sm:$0xff] }
  0x64   :  { %6171 = vmatpush3.bf16.msra.mxu1 %v6170_v13  ;;  %v6186_v50 = vpack.c.bf16 %v216_v47, %v215_v46  ;;  %v246_v51 = vld [vmem:[#allocation5 + $0x308] sm:$0xff]  ;;  %v233_v52 = vld [vmem:[#allocation5 + $0x2a0] sm:$0xff]  ;;  %v247_v56 = vld [vmem:[#allocation5 + $0x310] sm:$0xff] }
  0x65   :  { %6173 = vmatprep.subr.bf16.mxu1 %v6172_v18  ;;  %v234_v53 = vld [vmem:[#allocation5 + $0x2a8] sm:$0xff]  ;;  %v217_v54 = vld [vmem:[#allocation5 + $0x220] sm:$0xff]  ;;  %v248_v58 = vld [vmem:[#allocation5 + $0x318] sm:$0xff]  ;;  %v6213_v61 = vpack.c.bf16 %v246_v51, %v245_v49 }
  0x66   :  { %6143 = vmatpush3.bf16.msra.mxu0 %v6142_v25  ;;  %v218_v55 = vld [vmem:[#allocation5 + $0x228] sm:$0xff]  ;;  %v235_v59 = vld [vmem:[#allocation5 + $0x2b0] sm:$0xff]  ;;  %v236_v60 = vld [vmem:[#allocation5 + $0x2b8] sm:$0xff]  ;;  %v6188_v63 = vpack.c.bf16 %v234_v53, %v233_v52  ;;  %v6216_v1 = vpack.c.bf16 %v248_v58, %v247_v56  ;;  %v781_v56 = vmul.f32 0.9, %v7441_v12 }
  0x67   :  { %6145 = vmatprep.subr.bf16.mxu0 %v6144_v27  ;;  %v7468_v62 = vld [vmem:[#allocation2 + $0x28] sm:$0xff]  ;;  %v6190_v0 = vpack.c.bf16 %v218_v55, %v217_v54  ;;  %v6192_v2 = vpack.c.bf16 %v236_v60, %v235_v59  ;;  %v220_v4 = vld [vmem:[#allocation5 + $0x238] sm:$0xff]  ;;  %v249_v5 = vld [vmem:[#allocation5 + $0x320] sm:$0xff]  ;;  %v780_v58 = vmul.f32 0.9, %v7453_v37  ;;  %v4419_v60 = vsel %vm98_vm0, 1.0, %v9126_v57 }
  0x68   :  { %6175 = vmatpush3.bf16.msra.mxu1 %v6174_v26  ;;  %v219_v3 = vld [vmem:[#allocation5 + $0x230] sm:$0xff]  ;;  %v250_v6 = vld [vmem:[#allocation5 + $0x328] sm:$0xff]  ;;  %v237_v7 = vld [vmem:[#allocation5 + $0x2c0] sm:$0xff]  ;;  %vm102_vm5 = vcmp.gt.f32.partialorder %v7468_v62, 1.0  ;;  %v788_v59 = vadd.f32 %v781_v56, %v7441_v12 }
  0x69   :  { %6177 = vmatprep.subr.bf16.mxu1 %v6176_v31  ;;  %v238_v8 = vld [vmem:[#allocation5 + $0x2c8] sm:$0xff]  ;;  %v6194_v9 = vpack.c.bf16 %v220_v4, %v219_v3  ;;  %v6219_v10 = vpack.c.bf16 %v250_v6, %v249_v5  ;;  %v221_v13 = vld [vmem:[#allocation5 + $0x240] sm:$0xff]  ;;  %v251_v15 = vld [vmem:[#allocation5 + $0x330] sm:$0xff]  ;;  %v4421_v5 = vsel %vm100_vm1, 1.0, %v9126_v57 }
  0x6a   :  { %6147 = vmatpush3.bf16.msra.mxu0 %v6146_v35  ;;  %v6196_v11 = vpack.c.bf16 %v238_v8, %v237_v7  ;;  %v222_v14 = vld [vmem:[#allocation5 + $0x248] sm:$0xff]  ;;  %v252_v16 = vld [vmem:[#allocation5 + $0x338] sm:$0xff]  ;;  %v239_v17 = vld [vmem:[#allocation5 + $0x2d0] sm:$0xff] }
  0x6b   :  { %6181 = vmatprep.subr.bf16.mxu0 %v6180_v38  ;;  %v240_v18 = vld [vmem:[#allocation5 + $0x2d8] sm:$0xff]  ;;  %v6198_v19 = vpack.c.bf16 %v222_v14, %v221_v13  ;;  %v6222_v20 = vpack.c.bf16 %v252_v16, %v251_v15  ;;  %v223_v24 = vld [vmem:[#allocation5 + $0x250] sm:$0xff]  ;;  %v253_v26 = vld [vmem:[#allocation5 + $0x340] sm:$0xff] }
  0x6c   :  { %6179 = vmatpush3.bf16.msra.mxu1 %v6178_v36  ;;  %v6200_v23 = vpack.c.bf16 %v240_v18, %v239_v17  ;;  %v224_v25 = vld [vmem:[#allocation5 + $0x258] sm:$0xff]  ;;  %v254_v27 = vld [vmem:[#allocation5 + $0x348] sm:$0xff]  ;;  %v241_v28 = vld [vmem:[#allocation5 + $0x2e0] sm:$0xff]  ;;  %v785_v17 = vmul.f32 0.9, %v7468_v62 }
  0x6d   :  { %6212 = vmatprep.subr.bf16.mxu1 %v9099_v48  ;;  %4427 = vmatmul.mubr.msk.f32.vlgmr.msra.gmra.mrb[0].mxu0 %vm97_vm2, %v9097_v21  ;;  %v242_v29 = vld [vmem:[#allocation5 + $0x2e8] sm:$0xff]  ;;  %v6202_v30 = vpack.c.bf16 %v224_v25, %v223_v24  ;;  %v6225_v31 = vpack.c.bf16 %v254_v27, %v253_v26  ;;  %v225_v33 = vld [vmem:[#allocation5 + $0x260] sm:$0xff]  ;;  %v255_v35 = vld [vmem:[#allocation5 + $0x350] sm:$0xff] }
  0x6e   :  { %6183 = vmatpush3.bf16.msra.mxu0 %v6182_v44  ;;  %4430 = vmatprep.mubr.msk.f32.mxu0 %vm102_vm5, %v9097_v21  ;;  %v6204_v32 = vpack.c.bf16 %v242_v29, %v241_v28  ;;  %v226_v34 = vld [vmem:[#allocation5 + $0x268] sm:$0xff]  ;;  %v256_v36 = vld [vmem:[#allocation5 + $0x358] sm:$0xff]  ;;  %v243_v38 = vld [vmem:[#allocation5 + $0x2f0] sm:$0xff]  ;;  %v792_v27 = vadd.f32 %v785_v17, %v7468_v62 }
  0x6f   :  { %4429 = vmatmul.mubr.msk.f32.vlgmr.msra.gmra.mrb[0].mxu1 %vm99_vm3, %v9097_v21  ;;  %6185 = vmatprep.subr.bf16.mxu0 %v6184_v45  ;;  %v244_v39 = vld [vmem:[#allocation5 + $0x2f8] sm:$0xff]  ;;  %v6206_v40 = vpack.c.bf16 %v226_v34, %v225_v33  ;;  %v6228_v42 = vpack.c.bf16 %v256_v36, %v255_v35  ;;  %v227_v44 = vld [vmem:[#allocation5 + $0x270] sm:$0xff]  ;;  %v257_v46 = vld [vmem:[#allocation5 + $0x360] sm:$0xff]  ;;  %v132_v34 = vadd.f32 %v7441_v12, %v7453_v37 }
  0x70   :  { %5518 = vmatprep.mubr.msk.f32.mxu1 %vm7335_vm4, %v9126_v57  ;;  %6214 = vmatpush3.bf16.msra.mxu1 %v6213_v61  ;;  %v6208_v43 = vpack.c.bf16 %v244_v39, %v243_v38  ;;  %v228_v45 = vld [vmem:[#allocation5 + $0x278] sm:$0xff]  ;;  %v258_v47 = vld [vmem:[#allocation5 + $0x368] sm:$0xff]  ;;  %v259_v52 = vld [vmem:[#allocation5 + $0x370] sm:$0xff]  ;;  %v783_v61 = vmul.f32 0.9, %v7447_v22 }
  0x71   :  { %6215 = vmatprep.subr.bf16.mxu1 %v9099_v48  ;;  %v6210_v49 = vpack.c.bf16 %v228_v45, %v227_v44  ;;  %v7479_v51 = vld [vmem:[#allocation2 + $0x20] sm:$0xff]  ;;  %v260_v53 = vld [vmem:[#allocation5 + $0x378] sm:$0xff]  ;;  %v567_v33 = vld [vmem:[#allocation7 + $0x10] sm:$0xff] }
  0x72   :  { %6187 = vmatpush3.bf16.msra.mxu0 %v6186_v50  ;;  %v6231_v50 = vpack.c.bf16 %v258_v47, %v257_v46  ;;  %vm101_vm6 = vcmp.gt.f32.partialorder %v7479_v51, 1.0  ;;  %v6234_v54 = vpack.c.bf16 %v260_v53, %v259_v52  ;;  %v7485_v55 = vld [vmem:[#allocation2 + $0x30] sm:$0xff]  ;;  %v790_v3 = vadd.f32 %v783_v61, %v7447_v22  ;;  %v569_v53 = vld [vmem:[#allocation7 + $0x20] sm:$0xff] }
  0x73   :  { %6189 = vmatprep.subr.bf16.mxu0 %v6188_v63  ;;  %vm103_vm7 = vcmp.gt.f32.partialorder %v7485_v55, 1.0  ;;  %v787_v63 = vadd.f32 %v780_v58, %v7453_v37  ;;  %v4422_v25 = vsel %vm101_vm6, 1.0, %v9126_v57  ;;  %v786_v28 = vmul.f32 0.9, %v7485_v55  ;;  %v568_v39 = vld [vmem:[#allocation7 + $0x18] sm:$0xff] }
  0x74   :  { %6217 = vmatpush3.bf16.msra.mxu1 %v6216_v1  ;;  %v7510_v1 = vsub.f32 %v788_v59, %v4419_v60  ;;  %v7521_v8 = vsub.f32 %v790_v3, %v4421_v5  ;;  %v6240_v47 = vpack.c.bf16 %v568_v39, %v567_v33  ;;  %v4424_v52 = vsel %vm103_vm7, 1.0, %v9126_v57  ;;  %v571_v5 = vld [vmem:[#allocation7 + $0x30] sm:$0xff] }
  0x75   :  { %6218 = vmatprep.subr.bf16.mxu1 %v9099_v48  ;;  %v793_v46 = vadd.f32 %v786_v28, %v7485_v55 }
  0x76   :  { %6191 = vmatpush3.bf16.msra.mxu0 %v6190_v0  ;;  %v4418_v0 = vsel %vm97_vm2, 1.0, %v9126_v57  ;;  %9226 = vst [vmem:[#allocation18_spill] sm:$0xff] %v7510_v1  ;;  %v1492_v6 = vmul.f32 0.9, %v7510_v1  ;;  %9228 = vst [vmem:[#allocation20_spill] sm:$0xff] %v7521_v8  ;;  %vm802_vm8 = vcmp.gt.f32.partialorder %v7510_v1, 1.0 }
  0x77   :  { %6193 = vmatprep.subr.bf16.mxu0 %v6192_v2  ;;  %v782_v2 = vmul.f32 0.9, %v7455_v41  ;;  %v7514_v4 = vsub.f32 %v787_v63, %v4418_v0  ;;  %v4441_v15 = vsel %vm802_vm8, 1.0, %v9126_v57  ;;  %v1494_v16 = vmul.f32 0.9, %v7521_v8 }
  0x78   :  { %6220 = vmatpush3.bf16.msra.mxu1 %v6219_v10  ;;  %v1499_v13 = vadd.f32 %v1492_v6, %v7441_v12  ;;  %vm804_vm10 = vcmp.gt.f32.partialorder %v7521_v8, 1.0  ;;  %v572_v6 = vld [vmem:[#allocation7 + $0x38] sm:$0xff] }
  0x79   :  { %6221 = vmatprep.subr.bf16.mxu1 %v9099_v48  ;;  %9227 = vst [vmem:[#allocation19_spill] sm:$0xff] %v7514_v4  ;;  %v789_v7 = vadd.f32 %v782_v2, %v7455_v41  ;;  %v1491_v10 = vmul.f32 0.9, %v7514_v4  ;;  %vm801_vm9 = vcmp.gt.f32.partialorder %v7514_v4, 1.0  ;;  %v1501_v26 = vadd.f32 %v1494_v16, %v7447_v22 }
  0x7a   :  { %6195 = vmatpush3.bf16.msra.mxu0 %v6194_v9  ;;  %v4420_v9 = vsel %vm99_vm3, 1.0, %v9126_v57  ;;  %v4443_v35 = vsel %vm804_vm10, 1.0, %v9126_v57  ;;  %v7594_v2 = vsub.f32 %v793_v46, %v4424_v52  ;;  %v6246_v16 = vpack.c.bf16 %v572_v6, %v571_v5 }
  0x7b   :  { %6197 = vmatprep.subr.bf16.mxu0 %v6196_v11  ;;  %v784_v11 = vmul.f32 0.9, %v7479_v51  ;;  %v7531_v14 = vsub.f32 %v789_v7, %v4420_v9  ;;  %v1498_v18 = vadd.f32 %v1491_v10, %v7453_v37 }
  0x7c   :  { %6223 = vmatpush3.bf16.msra.mxu1 %v6222_v20  ;;  %9236 = vst [vmem:[#allocation28_spill] sm:$0xff] %v7594_v2  ;;  %vm807_vm2 = vcmp.gt.f32.partialorder %v7594_v2, 1.0 }
  0x7d   :  { %6224 = vmatprep.subr.bf16.mxu1 %v9099_v48  ;;  %9229 = vst [vmem:[#allocation21_spill] sm:$0xff] %v7531_v14  ;;  %v791_v20 = vadd.f32 %v784_v11, %v7479_v51  ;;  %v1493_v24 = vmul.f32 0.9, %v7531_v14  ;;  %vm803_vm11 = vcmp.gt.f32.partialorder %v7531_v14, 1.0 }
  0x7e   :  { %6199 = vmatpush3.bf16.msra.mxu0 %v6198_v19  ;;  %v4440_v19 = vsel %vm801_vm9, 1.0, %v9126_v57  ;;  %v4442_v44 = vsel %vm803_vm11, 1.0, %v9126_v57 }
  0x7f   :  { %6201 = vmatprep.subr.bf16.mxu0 %v6200_v23  ;;  %v7543_v23 = vsub.f32 %v1499_v13, %v4441_v15  ;;  %v7553_v29 = vsub.f32 %v1498_v18, %v4440_v19  ;;  %v7564_v36 = vsub.f32 %v791_v20, %v4422_v25  ;;  %v573_v19 = vld [vmem:[#allocation7 + $0x40] sm:$0xff]  ;;  %v574_v20 = vld [vmem:[#allocation7 + $0x48] sm:$0xff] }
  0x80   :  { %6226 = vmatpush3.bf16.msra.mxu1 %v6225_v31  ;;  %v565_v31 = vld [vmem:[#allocation7] sm:$0xff]  ;;  %v6249_v39 = vpack.c.bf16 %v574_v20, %v573_v19 }
  0x81   :  { %6227 = vmatprep.subr.bf16.mxu1 %v9099_v48  ;;  %9230 = vst [vmem:[#allocation22_spill] sm:$0xff] %v7543_v23  ;;  %9231 = vst [vmem:[#allocation23_spill] sm:$0xff] %v7553_v29  ;;  %vm1513_vm12 = vcmp.gt.f32.partialorder %v7543_v23, 1.0  ;;  %vm1512_vm13 = vcmp.gt.f32.partialorder %v7553_v29, 1.0  ;;  %v1495_v58 = vmul.f32 0.9, %v7564_v36  ;;  %v1547_v46 = vadd.f32 %v7543_v23, %v7553_v29 }
  0x82   :  { %6203 = vmatpush3.bf16.msra.mxu0 %v6202_v30  ;;  %v4423_v30 = vsel %vm102_vm5, 1.0, %v9126_v57  ;;  %9232 = vst [vmem:[#allocation24_spill] sm:$0xff] %v7564_v36  ;;  %v4463_v59 = vsel %vm1513_vm12, 1.0, %v9126_v57  ;;  %v4462_v7 = vsel %vm1512_vm13, 1.0, %v9126_v57  ;;  %vm805_vm0 = vcmp.gt.f32.partialorder %v7564_v36, 1.0 }
  0x83   :  { %6205 = vmatprep.subr.bf16.mxu0 %v6204_v32  ;;  %v566_v32 = vld [vmem:[#allocation7 + $0x8] sm:$0xff]  ;;  %v7573_v45 = vsub.f32 %v792_v27, %v4423_v30  ;;  %v1502_v13 = vadd.f32 %v1495_v58, %v7479_v51  ;;  %v4444_v18 = vsel %vm805_vm0, 1.0, %v9126_v57 }
  0x84   :  { %6229 = vmatpush3.bf16.msra.mxu1 %v6228_v42  ;;  %v6237_v38 = vpack.c.bf16 %v566_v32, %v565_v31  ;;  %v1500_v42 = vadd.f32 %v1493_v24, %v7455_v41  ;;  %v1497_v24 = vmul.f32 0.9, %v7594_v2 }
  0x85   :  { %6230 = vmatprep.subr.bf16.mxu1 %v9099_v48  ;;  %9233 = vst [vmem:[#allocation25_spill] sm:$0xff] %v7573_v45  ;;  %v1496_v0 = vmul.f32 0.9, %v7573_v45  ;;  %vm806_vm1 = vcmp.gt.f32.partialorder %v7573_v45, 1.0 }
  0x86   :  { %6207 = vmatpush3.bf16.msra.mxu0 %v6206_v40  ;;  %v2203_v40 = vmul.f32 0.9, %v7543_v23  ;;  %v7589_v60 = vsub.f32 %v1500_v42, %v4442_v44  ;;  %v4445_v31 = vsel %vm806_vm1, 1.0, %v9126_v57  ;;  %v1504_v32 = vadd.f32 %v1497_v24, %v7485_v55  ;;  %v575_v42 = vld [vmem:[#allocation7 + $0x50] sm:$0xff]  ;;  %v2307_v23 = vld [vmem:[#allocation5 + $0x100] sm:$0xff] }
  0x87   :  { %6209 = vmatprep.subr.bf16.mxu0 %v6208_v43  ;;  %v133_v43 = vadd.f32 %v132_v34, %v7455_v41  ;;  %v1503_v25 = vadd.f32 %v1496_v0, %v7468_v62 }
  0x88   :  { %6232 = vmatpush3.bf16.msra.mxu1 %v6231_v50  ;;  %v7577_v50 = vsub.f32 %v1501_v26, %v4443_v35  ;;  %9235 = vst [vmem:[#allocation27_spill] sm:$0xff] %v7589_v60  ;;  %v2210_v63 = vadd.f32 %v2203_v40, %v7441_v12  ;;  %vm9088_vm15 = vcmp.gt.f32.partialorder %v7589_v60, 1.0  ;;  %v2204_v15 = vmul.f32 0.9, %v7589_v60 }
  0x89   :  { %6233 = vmatprep.subr.bf16.mxu1 %v9099_v48  ;;  %v134_v56 = vadd.f32 %v133_v43, %v7447_v22  ;;  %v7615_v26 = vsub.f32 %v1502_v13, %v4444_v18  ;;  %v7629_v33 = vsub.f32 %v1503_v25, %v4445_v31  ;;  %v4464_v35 = vsel %vm9088_vm15, 1.0, %v9126_v57  ;;  %v576_v43 = vld [vmem:[#allocation7 + $0x58] sm:$0xff] }
  0x8a   :  { %6211 = vmatpush3.bf16.msra.mxu0 %v6210_v49  ;;  %v2202_v49 = vmul.f32 0.9, %v7553_v29  ;;  %9234 = vst [vmem:[#allocation26_spill] sm:$0xff] %v7577_v50  ;;  %v2205_v10 = vmul.f32 0.9, %v7577_v50  ;;  %vm9089_vm14 = vcmp.gt.f32.partialorder %v7577_v50, 1.0 }
  0x8b   :  { %6236 = vmatprep.subr.bf16.mxu0 %v9099_v48  ;;  %v135_v61 = vadd.f32 %v134_v56, %v7479_v51  ;;  %9237 = vst [vmem:[#allocation29_spill] sm:$0xff] %v7615_v26  ;;  %v4465_v28 = vsel %vm9089_vm14, 1.0, %v9126_v57  ;;  %9239 = vst [vmem:[#allocation31_spill] sm:$0xff] %v7629_v33  ;;  %v2206_v34 = vmul.f32 0.9, %v7615_v26  ;;  %v4446_v40 = vsel %vm807_vm2, 1.0, %v9126_v57 }
  0x8c   :  { %6235 = vmatpush3.bf16.msra.mxu1 %v6234_v54  ;;  %v570_v54 = vld [vmem:[#allocation7 + $0x28] sm:$0xff]  ;;  %v2209_v9 = vadd.f32 %v2202_v49, %v7453_v37  ;;  %v2212_v30 = vadd.f32 %v2205_v10, %v7447_v22  ;;  %v7639_v44 = vsub.f32 %v1504_v32, %v4446_v40  ;;  %vm1516_vm3 = vcmp.gt.f32.partialorder %v7615_v26, 1.0 }
  0x8d   :  { %4431 = vmatmul.mubr.msk.f32.vlgmr.msra.gmra.mrb[2].mxu0 %vm101_vm6, %v9097_v21  ;;  %6260 = vmatprep.subr.bf16.mxu1 %v9099_v48  ;;  %v6243_v3 = vpack.c.bf16 %v570_v54, %v569_v53  ;;  %v136_v11 = vadd.f32 %v135_v61, %v7468_v62  ;;  %v7645_v49 = vsub.f32 %v2210_v63, %v4463_v59  ;;  %v4466_v53 = vsel %vm1516_vm3, 1.0, %v9126_v57 }
  0x8e   :  { %5553 = vmatprep.mubr.msk.f32.mxu0 %vm7335_vm4, %v9126_v57  ;;  %6238 = vmatpush3.bf16.msra.mxu0 %v6237_v38  ;;  %v7617_v27 = vsub.f32 %v2209_v9, %v4462_v7  ;;  %v2211_v38 = vadd.f32 %v2204_v15, %v7455_v41  ;;  %9240 = vst [vmem:[#allocation32_spill] sm:$0xff] %v7639_v44  ;;  %vm1517_vm5 = vcmp.gt.f32.partialorder %v7629_v33, 1.0  ;;  %v2208_v58 = vmul.f32 0.9, %v7639_v44 }
  0x8f   :  { %5519 = vmatmul.mubr.msk.f32.vlgmr.msra.gmra.mrb[2].mxu1 %vm103_vm7, %v9097_v21  ;;  %6239 = vmatprep.subr.bf16.mxu0 %v9099_v48  ;;  %v137_v17 = vadd.f32 %v136_v11, %v7485_v55  ;;  %9241 = vst [vmem:[#allocation33_spill] sm:$0xff] %v7645_v49  ;;  %v7647_v52 = vsub.f32 %v2212_v30, %v4465_v28  ;;  %v4467_v0 = vsel %vm1517_vm5, 1.0, %v9126_v57  ;;  %vm9090_vm6 = vcmp.gt.f32.partialorder %v7639_v44, 1.0 }
  0x90   :  { %5588 = vmatprep.mubr.msk.f32.mxu1 %vm7335_vm4, %v9126_v57  ;;  %9238 = vst [vmem:[#allocation30_spill] sm:$0xff] %v7617_v27  ;;  %v2213_v54 = vadd.f32 %v2206_v34, %v7479_v51  ;;  %v1548_v56 = vadd.f32 %v1547_v46, %v7589_v60  ;;  %v7658_v59 = vsub.f32 %v2211_v38, %v4464_v35  ;;  %v4468_v9 = vsel %vm9090_vm6, 1.0, %v9126_v57  ;;  %v577_v35 = vld [vmem:[#allocation7 + $0x60] sm:$0xff]  ;;  %v578_v38 = vld [vmem:[#allocation7 + $0x68] sm:$0xff] }
  0x91   :  { %138 = vadd.xlane.f32.xlu0 %v137_v17  ;;  %9242 = vst [vmem:[#allocation34_spill] sm:$0xff] %v7647_v52  ;;  %v6252_v63 = vpack.c.bf16 %v576_v43, %v575_v42  ;;  %v2215_v6 = vadd.f32 %v2208_v58, %v7485_v55  ;;  %vm9091_vm7 = vcmp.gt.f32.partialorder %v7617_v27, 1.0  ;;  %v2914_v10 = vmul.f32 0.9, %v7645_v49 }
  0x92   :  { %6241 = vmatpush3.bf16.msra.mxu0 %v6240_v47  ;;  %v2207_v47 = vmul.f32 0.9, %v7629_v33  ;;  %9243 = vst [vmem:[#allocation35_spill] sm:$0xff] %v7658_v59  ;;  %v1549_v5 = vadd.f32 %v1548_v56, %v7577_v50  ;;  %v7667_v7 = vsub.f32 %v2213_v54, %v4466_v53  ;;  %vm9092_vm15 = vcmp.gt.f32.partialorder %v7645_v49, 1.0  ;;  %v885_v50 = vld [vmem:[#allocation5 + $0x100] sm:$0xff] }
  0x93   :  { %6242 = vmatprep.subr.bf16.mxu0 %v9099_v48  ;;  %vm9093_vm14 = vcmp.gt.f32.partialorder %v7658_v59, 1.0  ;;  %v7680_v15 = vsub.f32 %v2215_v6, %v4468_v9  ;;  %v2916_v17 = vmul.f32 0.9, %v7647_v52  ;;  %vm9095_vm6 = vcmp.gt.f32.partialorder %v7647_v52, 1.0 }
  0x94   :  { %v2214_v61 = vadd.f32 %v2207_v47, %v7468_v62  ;;  %9244 = vst [vmem:[#allocation36_spill] sm:$0xff] %v7667_v7  ;;  %v1550_v11 = vadd.f32 %v1549_v5, %v7615_v26  ;;  %v4484_v20 = vsel %vm9091_vm7, 1.0, %v9126_v57  ;;  %v2917_v24 = vmul.f32 0.9, %v7667_v7  ;;  %v886_v26 = vld [vmem:[#allocation5 + $0x108] sm:$0xff] }
  0x95   :  { %9246 = vst [vmem:[#allocation38_spill] sm:$0xff] %v7680_v15  ;;  %v4485_v25 = vsel %vm9092_vm15, 1.0, %v9126_v57  ;;  %v2921_v28 = vadd.f32 %v2914_v10, %v7441_v12  ;;  %vm9096_vm7 = vcmp.gt.f32.partialorder %v7667_v7, 1.0  ;;  %v2923_v34 = vadd.f32 %v2916_v17, %v7447_v22 }
  0x96   :  { %6244 = vmatpush3.bf16.msra.mxu0 %v6243_v3  ;;  %v2913_v3 = vmul.f32 0.9, %v7617_v27  ;;  %v7676_v13 = vsub.f32 %v2214_v61, %v4467_v0  ;;  %v1551_v19 = vadd.f32 %v1550_v11, %v7629_v33  ;;  %v2919_v12 = vmul.f32 0.9, %v7680_v15  ;;  %v580_v0 = vld [vmem:[#allocation7 + $0x78] sm:$0xff] }
  0x97   :  { %6245 = vmatprep.subr.bf16.mxu0 %v9099_v48  ;;  %v6255_v42 = vpack.c.bf16 %v578_v38, %v577_v35  ;;  %v2924_v43 = vadd.f32 %v2917_v24, %v7479_v51  ;;  %v7712_v46 = vsub.f32 %v2921_v28, %v4485_v25  ;;  %v4488_v53 = vsel %vm9096_vm7, 1.0, %v9126_v57  ;;  %v4425_v25 = vld [vmem:[%s9081_s2] ss:$0 sm:$0xff] }
  0x98   :  { %9245 = vst [vmem:[#allocation37_spill] sm:$0xff] %v7676_v13  ;;  %v2920_v18 = vadd.f32 %v2913_v3, %v7453_v37  ;;  %v4486_v37 = vsel %vm9093_vm14, 1.0, %v9126_v57  ;;  %v1552_v31 = vadd.f32 %v1551_v19, %v7639_v44  ;;  %v2918_v32 = vmul.f32 0.9, %v7676_v13 }
  0x99   :  { %vm2228_vm15 = vcmp.gt.f32.partialorder %v7676_v13, 1.0  ;;  %9248 = vst [vmem:[#allocation40_spill] sm:$0xff] %v7712_v46  ;;  %vm9094_vm14 = vcmp.gt.f32.partialorder %v7680_v15, 1.0  ;;  %v2926_v3 = vadd.f32 %v2919_v12, %v7485_v55  ;;  %v7730_v5 = vsub.f32 %v2924_v43, %v4488_v53 }
  0x9a   :  { %6247 = vmatpush3.bf16.msra.mxu0 %v6246_v16  ;;  %v2915_v16 = vmul.f32 0.9, %v7658_v59  ;;  %v7709_v40 = vsub.f32 %v2920_v18, %v4484_v20  ;;  %1553 = vadd.xlane.f32.xlu0 %v1552_v31  ;;  %v2925_v54 = vadd.f32 %v2918_v32, %v7468_v62  ;;  %v4489_v61 = vsel %vm2228_vm15, 1.0, %v9126_v57 }
  0x9b   :  { %6248 = vmatprep.subr.bf16.mxu0 %v9099_v48  ;;  %9251 = vst [vmem:[#allocation43_spill] sm:$0xff] %v7730_v5  ;;  %v4490_v10 = vsel %vm9094_vm14, 1.0, %v9126_v57 }
  0x9c   :  { %v2922_v30 = vadd.f32 %v2915_v16, %v7455_v41  ;;  %9247 = vst [vmem:[#allocation39_spill] sm:$0xff] %v7709_v40  ;;  %v2969_v58 = vadd.f32 %v7712_v46, %v7709_v40  ;;  %v7738_v11 = vsub.f32 %v2925_v54, %v4489_v61  ;;  %v7742_v17 = vsub.f32 %v2926_v3, %v4490_v10 }
  0x9e   :  { %6250 = vmatpush3.bf16.msra.mxu0 %v6249_v39  ;;  %v4487_v39 = vsel %vm9095_vm6, 1.0, %v9126_v57  ;;  %v7714_v47 = vsub.f32 %v2922_v30, %v4486_v37  ;;  %9252 = vst [vmem:[#allocation44_spill] sm:$0xff] %v7738_v11  ;;  %9253 = vst [vmem:[#allocation45_spill] sm:$0xff] %v7742_v17  ;;  %vm9119_vm6 = vcmp.gt.f32.partialorder %v7712_v46, 1.0 }
  0x9f   :  { %6251 = vmatprep.subr.bf16.mxu0 %v9099_v48  ;;  %v7721_v56 = vsub.f32 %v2923_v34, %v4487_v39 }
  0xa0   :  { %9249 = vst [vmem:[#allocation41_spill] sm:$0xff] %v7714_v47  ;;  %v2970_v6 = vadd.f32 %v2969_v58, %v7714_v47  ;;  %vm9109_vm7 = vcmp.gt.f32.partialorder %v7714_v47, 1.0 }
  0xa1   :  { %9250 = vst [vmem:[#allocation42_spill] sm:$0xff] %v7721_v56 }
  0xa2   :  { %6253 = vmatpush3.bf16.msra.mxu0 %v6252_v63  ;;  %v579_v63 = vld [vmem:[#allocation7 + $0x70] sm:$0xff]  ;;  %v2971_v16 = vadd.f32 %v2970_v6, %v7721_v56 }
  0xa3   :  { %6254 = vmatprep.subr.bf16.mxu0 %v9099_v48  ;;  %v7733_v9 = vpack.c.bf16 %v580_v0, %v579_v63 }
  0xa4   :  { %v2972_v18 = vadd.f32 %v2971_v16, %v7730_v5  ;;  %v675_v16 = vld [vmem:[#allocation8] sm:$0xff] }
  0xa6   :  { %6256 = vmatpush3.bf16.msra.mxu0 %v6255_v42  ;;  %v2973_v19 = vadd.f32 %v2972_v18, %v7738_v11  ;;  %v676_v18 = vld [vmem:[#allocation8 + $0x8] sm:$0xff] }
  0xa7   :  { %6257 = vmatprep.subr.bf16.mxu0 %v9099_v48 }
  0xa8   :  { %v2974_v20 = vadd.f32 %v2973_v19, %v7742_v17  ;;  %v869_v19 = vld [vmem:[#allocation5 + $0x80] sm:$0xff] }
  0xaa   :  { %6259 = vmatpush3.bf16.msra.mxu0 %v7733_v9  ;;  %2975 = vadd.xlane.f32.xlu0 %v2974_v20  ;;  %v836_v20 = vadd.f32 %v7510_v1, %v7514_v4  ;;  %v4508_v1 = vsel %vm9109_vm7, 1.0, %v9126_v57  ;;  %vm2938_vm7 = vcmp.gt.f32.partialorder %v7730_v5, 1.0  ;;  %v921_v4 = vld [vmem:[#allocation5 + $0x220] sm:$0xff] }
 0x11e   :  { %v139_v58 = vpop.xlane.xlu0 %138 }
 0x11f   :  { %v140_v61 = vrot.slane %v139_v58, 4 }
 0x121   :  { %v141_v63 = vadd.f32 %v140_v61, %v139_v58  ;;  %v679_v58 = vld [vmem:[#allocation8 + $0x20] sm:$0xff]  ;;  %v680_v61 = vld [vmem:[#allocation8 + $0x28] sm:$0xff] }
 0x123   :  { %v142_v0 = vrot.slane %v141_v63, 2 }
 0x125   :  { %v143_v3 = vadd.f32 %v142_v0, %v141_v63  ;;  %v873_v63 = vld [vmem:[#allocation5 + $0xa0] sm:$0xff] }
 0x127   :  { %v144_v6 = vrot.slane %v143_v3, 1 }
 0x129   :  { %v145_v10 = vadd.f32 %v144_v6, %v143_v3  ;;  %v874_v6 = vld [vmem:[#allocation5 + $0xa8] sm:$0xff] }
 0x12b   :  { %7124 = vpush %v145_v10  ;;  %v7781_v10 = vpack.c.bf16 %v874_v6, %v873_v63  ;;  %v878_v63 = vld [vmem:[#allocation5 + $0xc8] sm:$0xff] }
 0x12c   :  { %v684_v6 = vld [vmem:[#allocation8 + $0x48] sm:$0xff] }
 0x140   :  { %v4582_v24 = vpop.f32.mrb[0].mxu0 }
 0x141   :  { %v4583_v37 = vpop.f32.mrb[1].mxu0 }
 0x142   :  { %v4617_v28 = vpop.f32.mrb[0].mxu1  ;;  %v4584_v30 = vadd.f32 %v4583_v37, %v4582_v24  ;;  %v7762_v24 = vpack.c.bf16 %v676_v18, %v675_v16  ;;  %v853_v37 = vld [vmem:[#allocation5] sm:$0xff]  ;;  %v858_v18 = vld [vmem:[#allocation5 + $0x28] sm:$0xff] }
 0x143   :  { %v4618_v31 = vpop.f32.mrb[1].mxu1  ;;  %v857_v16 = vld [vmem:[#allocation5 + $0x20] sm:$0xff] }
 0x144   :  { %v4619_v32 = vadd.f32 %v4618_v31, %v4617_v28  ;;  %v335_v34 = vadd.f32 %v4584_v30, %v4425_v25  ;;  %v870_v25 = vld [vmem:[#allocation5 + $0x88] sm:$0xff]  ;;  %6262 = vmatpush3.bf16.msra.mxu1 %v7762_v24 }
 0x145   :  { %v854_v28 = vld [vmem:[#allocation5 + $0x8] sm:$0xff]  ;;  %v7764_v30 = vpack.c.bf16 %v870_v25, %v869_v19  ;;  %6263 = vmatprep.subr.bf16.mxu1 %v9099_v48  ;;  %v875_v25 = vld [vmem:[#allocation5 + $0xb0] sm:$0xff] }
 0x146   :  { %v405_v35 = vadd.f32 %v4619_v32, %v335_v34  ;;  %v7766_v31 = vpack.c.bf16 %v854_v28, %v853_v37  ;;  %v677_v32 = vld [vmem:[#allocation8 + $0x10] sm:$0xff]  ;;  %v678_v34 = vld [vmem:[#allocation8 + $0x18] sm:$0xff] }
 0x147   :  { %6285 = vmatprep.subr.bf16.mxu0 %v7764_v30  ;;  %v876_v37 = vld [vmem:[#allocation5 + $0xb8] sm:$0xff]  ;;  %v681_v28 = vld [vmem:[#allocation8 + $0x30] sm:$0xff] }
 0x160   :  { %v4652_v38 = vpop.f32.mrb[2].mxu0 }
 0x161   :  { %v4653_v39 = vpop.f32.mrb[3].mxu0 }
 0x162   :  { %v4654_v12 = vadd.f32 %v4653_v39, %v4652_v38  ;;  %v544_v43 = vpop.f32.mrb[2].mxu1  ;;  %v837_v38 = vadd.f32 %v836_v20, %v7531_v14  ;;  %v7770_v39 = vpack.c.bf16 %v678_v34, %v677_v32  ;;  %v7785_v20 = vpack.c.bf16 %v680_v61, %v679_v58  ;;  %v682_v32 = vld [vmem:[#allocation8 + $0x38] sm:$0xff]  ;;  %v877_v61 = vld [vmem:[#allocation5 + $0xc0] sm:$0xff] }
 0x163   :  { %v5520_v54 = vpop.f32.mrb[3].mxu1  ;;  %v7797_v58 = vpack.c.bf16 %v682_v32, %v681_v28  ;;  %v3624_v32 = vmul.f32 0.9, %v7709_v40 }
 0x164   :  { %v475_v42 = vadd.f32 %v4654_v12, %v405_v35  ;;  %v871_v35 = vld [vmem:[#allocation5 + $0x90] sm:$0xff]  ;;  %v872_v12 = vld [vmem:[#allocation5 + $0x98] sm:$0xff]  ;;  %v838_v0 = vadd.f32 %v837_v38, %v7521_v8  ;;  %6265 = vmatpush3.bf16.msra.mxu1 %v7770_v39  ;;  %v7793_v38 = vpack.c.bf16 %v876_v37, %v875_v25  ;;  %v862_v25 = vld [vmem:[#allocation5 + $0x48] sm:$0xff] }
 0x165   :  { %v7774_v54 = vpack.c.bf16 %v872_v12, %v871_v35  ;;  %6266 = vmatprep.subr.bf16.mxu1 %v9099_v48  ;;  %v7790_v35 = vpack.c.bf16 %v858_v18, %v857_v16  ;;  %v859_v12 = vld [vmem:[#allocation5 + $0x30] sm:$0xff]  ;;  %v7804_v18 = vpack.c.bf16 %v878_v63, %v877_v61  ;;  %v3626_v61 = vmul.f32 0.9, %v7714_v47  ;;  %v909_v8 = vld [vmem:[#allocation5 + $0x1c0] sm:$0xff] }
 0x166   :  { %v7750_v53 = vadd.f32 %v544_v43, %v475_v42  ;;  %v855_v42 = vld [vmem:[#allocation5 + $0x10] sm:$0xff]  ;;  %v856_v43 = vld [vmem:[#allocation5 + $0x18] sm:$0xff]  ;;  %v839_v19 = vadd.f32 %v838_v0, %v7564_v36  ;;  %v683_v0 = vld [vmem:[#allocation8 + $0x40] sm:$0xff] }
 0x167   :  { %v7778_v3 = vpack.c.bf16 %v856_v43, %v855_v42  ;;  %v860_v42 = vld [vmem:[#allocation5 + $0x38] sm:$0xff]  ;;  %v7807_v37 = vpack.c.bf16 %v684_v6, %v683_v0  ;;  %v4507_v0 = vsel %vm9119_vm6, 1.0, %v9126_v57  ;;  %vm2940_vm6 = vcmp.gt.f32.partialorder %v7742_v17, 1.0  ;;  %v7984_v36 = vld [vmem:[%s9083_s4] ss:$0 sm:$0xff] }
 0x168   :  { %554 = vadd.xlane.f32.xlu0 %v7750_v53  ;;  %vm549_vm14 = vcmp.gt.f32.partialorder %v7750_v53, 1.0  ;;  %v840_v34 = vadd.f32 %v839_v19, %v7573_v45  ;;  %6268 = vmatpush3.bf16.msra.mxu1 %v7785_v20  ;;  %v7801_v16 = vpack.c.bf16 %v860_v42, %v859_v12  ;;  %v861_v19 = vld [vmem:[#allocation5 + $0x40] sm:$0xff]  ;;  %v3617_v12 = vld [vmem:[#allocation2] sm:$0xff]  ;;  %v3618_v42 = vld [vmem:[#allocation2 + $0x8] sm:$0xff] }
 0x169   :  { %5554 = vmatmul.mubr.msk.f32.vlgmr.msra.gmra.mrb[4].mxu0 %vm549_vm14, %v9097_v21  ;;  %6269 = vmatprep.subr.bf16.mxu1 %v9099_v48  ;;  %v7811_v28 = vpack.c.bf16 %v862_v25, %v861_v19  ;;  %v3631_v6 = vadd.f32 %v3624_v32, %v3617_v12  ;;  %v3628_v32 = vmul.f32 0.9, %v7730_v5  ;;  %v3630_v5 = vmul.f32 0.9, %v7742_v17  ;;  %v924_v45 = vld [vmem:[#allocation5 + $0x238] sm:$0xff] }
 0x16a   :  { %4448 = vmatprep.mubr.msk.f32.mxu0 %vm802_vm8, %v9097_v21  ;;  %6287 = vmatpush3.bf16.msra.mxu0 %v7766_v31  ;;  %v841_v43 = vadd.f32 %v840_v34, %v7594_v2  ;;  %v3625_v34 = vmul.f32 0.9, %v7712_v46  ;;  %vm9108_vm8 = vcmp.gt.f32.partialorder %v7709_v40, 1.0  ;;  %v3627_v21 = vmul.f32 0.9, %v7721_v56  ;;  %v1282_v2 = vld [vmem:[#allocation7 + $0x58] sm:$0xff] }
 0x16b   :  { %6289 = vmatprep.subr.bf16.mxu0 %v7774_v54  ;;  %v4506_v63 = vsel %vm9108_vm8, 1.0, %v9126_v57  ;;  %vm9118_vm8 = vcmp.gt.f32.partialorder %v7721_v56, 1.0  ;;  %v687_v56 = vld [vmem:[#allocation8 + $0x60] sm:$0xff] }
 0x16c   :  { %842 = vadd.xlane.f32.xlu1 %v841_v43  ;;  %6271 = vmatpush3.bf16.msra.mxu1 %v7797_v58  ;;  %v2258_v43 = vadd.f32 %v7645_v49, %v7617_v27  ;;  %v3632_v19 = vadd.f32 %v3625_v34, %v3618_v42  ;;  %v7837_v40 = vsub.f32 %v3631_v6, %v4506_v63 }
 0x16d   :  { %6272 = vmatprep.subr.bf16.mxu1 %v9099_v48  ;;  %v3634_v34 = vadd.f32 %v3627_v21, %v7447_v22  ;;  %v3635_v6 = vadd.f32 %v3628_v32, %v7479_v51  ;;  %v879_v22 = vld [vmem:[#allocation5 + $0xd0] sm:$0xff]  ;;  %v688_v32 = vld [vmem:[#allocation8 + $0x68] sm:$0xff] }
 0x16e   :  { %6291 = vmatpush3.bf16.msra.mxu0 %v7778_v3  ;;  %v2259_v25 = vadd.f32 %v2258_v43, %v7658_v59  ;;  %9254 = vst [vmem:[#allocation46_spill] sm:$0xff] %v7837_v40  ;;  %v7839_v27 = vsub.f32 %v3632_v19, %v4507_v0  ;;  %v685_v43 = vld [vmem:[#allocation8 + $0x50] sm:$0xff]  ;;  %v3629_v0 = vmul.f32 0.9, %v7738_v11  ;;  %v880_v19 = vld [vmem:[#allocation5 + $0xd8] sm:$0xff] }
 0x16f   :  { %6293 = vmatprep.subr.bf16.mxu0 %v7781_v10 }
 0x170   :  { %6274 = vmatpush3.bf16.msra.mxu1 %v7807_v37  ;;  %9255 = vst [vmem:[#allocation47_spill] sm:$0xff] %v7839_v27  ;;  %v2260_v46 = vadd.f32 %v2259_v25, %v7647_v52  ;;  %v3680_v42 = vadd.f32 %v7839_v27, %v7837_v40  ;;  %v7864_v40 = vpack.c.bf16 %v880_v19, %v879_v22  ;;  %v864_v27 = vld [vmem:[#allocation5 + $0x58] sm:$0xff]  ;;  %v930_v52 = vld [vmem:[#allocation5 + $0x268] sm:$0xff] }
 0x171   :  { %6275 = vmatprep.subr.bf16.mxu1 %v9099_v48  ;;  %v3633_v48 = vadd.f32 %v3626_v61, %v7455_v41  ;;  %v4509_v41 = vsel %vm9118_vm8, 1.0, %v9126_v57  ;;  %v686_v61 = vld [vmem:[#allocation8 + $0x58] sm:$0xff]  ;;  %vm2939_vm8 = vcmp.gt.f32.partialorder %v7738_v11, 1.0  ;;  %v7882_v22 = vpack.c.bf16 %v688_v32, %v687_v56 }
 0x172   :  { %6295 = vmatpush3.bf16.msra.mxu0 %v7790_v35  ;;  %v2261_v63 = vadd.f32 %v2260_v46, %v7667_v7  ;;  %v7856_v21 = vpack.c.bf16 %v686_v61, %v685_v43  ;;  %v863_v46 = vld [vmem:[#allocation5 + $0x50] sm:$0xff]  ;;  %v4512_v43 = vsel %vm2940_vm6, 1.0, %v9126_v57  ;;  %v3636_v61 = vadd.f32 %v3629_v0, %v7468_v62 }
 0x173   :  { %6297 = vmatprep.subr.bf16.mxu0 %v7793_v38  ;;  %v7848_v12 = vsub.f32 %v3633_v48, %v4508_v1  ;;  %v4510_v48 = vsel %vm2938_vm7, 1.0, %v9126_v57  ;;  %v7861_v1 = vsub.f32 %v3634_v34, %v4509_v41  ;;  %v7870_v51 = vpack.c.bf16 %v864_v27, %v863_v46  ;;  %v881_v34 = vld [vmem:[#allocation5 + $0xe0] sm:$0xff]  ;;  %v882_v41 = vld [vmem:[#allocation5 + $0xe8] sm:$0xff] }
 0x174   :  { %v2262_v47 = vadd.f32 %v2261_v63, %v7676_v13  ;;  %6277 = vmatpush3.bf16.msra.mxu1 %v7856_v21  ;;  %v9258_v63 = vmov 0.0|0.0   ;;  %v7884_v19 = vpack.c.bf16 %v882_v41, %v881_v34  ;;  %v865_v46 = vld [vmem:[#allocation5 + $0x60] sm:$0xff]  ;;  %v883_v34 = vld [vmem:[#allocation5 + $0xf0] sm:$0xff]  ;;  %v884_v41 = vld [vmem:[#allocation5 + $0xf8] sm:$0xff] }
 0x175   :  { %9256 = vst [vmem:[#allocation48_spill] sm:$0xff] %v7848_v12  ;;  %9257 = vst [vmem:[#allocation49_spill] sm:$0xff] %v7861_v1  ;;  %v3681_v25 = vadd.f32 %v3680_v42, %v7848_v12  ;;  %v4511_v42 = vsel %vm2939_vm8, 1.0, %v9126_v57  ;;  %6278 = vmatprep.subr.bf16.mxu1 %v9258_v63  ;;  %v866_v12 = vld [vmem:[#allocation5 + $0x68] sm:$0xff]  ;;  %v7890_v57 = vsub.f32 %v3635_v6, %v4510_v48  ;;  %v690_v6 = vld [vmem:[#allocation8 + $0x78] sm:$0xff] }
 0x176   :  { %6299 = vmatpush3.bf16.msra.mxu0 %v7801_v16  ;;  %v2263_v27 = vadd.f32 %v2262_v47, %v7680_v15  ;;  %v7888_v11 = vpack.c.bf16 %v866_v12, %v865_v46  ;;  %v7892_v62 = vsub.f32 %v3636_v61, %v4511_v42  ;;  %v3637_v47 = vadd.f32 %v3630_v5, %v7485_v55  ;;  %v689_v12 = vld [vmem:[#allocation8 + $0x70] sm:$0xff]  ;;  %v868_v5 = vld [vmem:[#allocation5 + $0x78] sm:$0xff]  ;;  %v902_v46 = vld [vmem:[#allocation5 + $0x188] sm:$0xff] }
 0x177   :  { %6301 = vmatprep.subr.bf16.mxu0 %v7804_v18  ;;  %9259 = vst [vmem:[#allocation50_spill] sm:$0xff] %v7890_v57  ;;  %v3682_v0 = vadd.f32 %v3681_v25, %v7861_v1  ;;  %v7904_v25 = vpack.c.bf16 %v690_v6, %v689_v12  ;;  %v7906_v42 = vpack.c.bf16 %v884_v41, %v883_v34  ;;  %v867_v55 = vld [vmem:[#allocation5 + $0x70] sm:$0xff]  ;;  %v917_v6 = vld [vmem:[#allocation5 + $0x200] sm:$0xff]  ;;  %v9262_v41 = vmov 1.0   ;;  %v928_v15 = vld [vmem:[#allocation5 + $0x258] sm:$0xff] }
 0x178   :  { %9260 = vst [vmem:[#allocation51_spill] sm:$0xff] %v7892_v62  ;;  %2264 = vadd.xlane.f32.xlu1 %v2263_v27  ;;  %6280 = vmatpush3.bf16.msra.mxu1 %v7882_v22  ;;  %v7900_v32 = vsub.f32 %v3637_v47, %v4512_v43  ;;  %v7910_v43 = vpack.c.bf16 %v868_v5, %v867_v55  ;;  %v901_v27 = vld [vmem:[#allocation5 + $0x180] sm:$0xff]  ;;  %v935_v55 = vld [vmem:[#allocation5 + $0x290] sm:$0xff]  ;;  %v936_v5 = vld [vmem:[#allocation5 + $0x298] sm:$0xff] }
 0x179   :  { %v3683_v56 = vadd.f32 %v3682_v0, %v7890_v57  ;;  %6281 = vmatprep.subr.bf16.mxu1 %v9258_v63  ;;  %v7913_v0 = vpack.c.bf16 %v902_v46, %v901_v27  ;;  %v933_v47 = vld [vmem:[#allocation5 + $0x280] sm:$0xff]  ;;  %v919_v27 = vld [vmem:[#allocation5 + $0x210] sm:$0xff]  ;;  %v920_v46 = vld [vmem:[#allocation5 + $0x218] sm:$0xff] }
 0x17a   :  { %6303 = vmatpush3.bf16.msra.mxu0 %v7811_v28  ;;  %9261 = vst [vmem:[#allocation52_spill] sm:$0xff] %v7900_v32  ;;  %v932_v13 = vld [vmem:[#allocation5 + $0x278] sm:$0xff] }
 0x17b   :  { %6305 = vmatprep.subr.bf16.mxu0 %v7864_v40  ;;  %v3684_v48 = vadd.f32 %v3683_v56, %v7892_v62  ;;  %v934_v56 = vld [vmem:[#allocation5 + $0x288] sm:$0xff] }
 0x17c   :  { %6283 = vmatpush3.bf16.msra.mxu1 %v7904_v25  ;;  %v7917_v12 = vpack.c.bf16 %v934_v56, %v933_v47  ;;  %v7931_v47 = vpack.c.bf16 %v920_v46, %v919_v27  ;;  %v937_v56 = vld [vmem:[#allocation5 + $0x2a0] sm:$0xff]  ;;  %v923_v46 = vld [vmem:[#allocation5 + $0x230] sm:$0xff]  ;;  %v926_v62 = vld [vmem:[#allocation5 + $0x248] sm:$0xff] }
 0x17d   :  { %v3685_v61 = vadd.f32 %v3684_v48, %v7900_v32  ;;  %6317 = vmatprep.subr.bf16.mxu1 %v7913_v0  ;;  %v918_v48 = vld [vmem:[#allocation5 + $0x208] sm:$0xff]  ;;  %v7943_v57 = vpack.c.bf16 %v924_v45, %v923_v46  ;;  %v927_v46 = vld [vmem:[#allocation5 + $0x250] sm:$0xff] }
 0x17e   :  { %6307 = vmatpush3.bf16.msra.mxu0 %v7870_v51  ;;  %v7919_v34 = vpack.c.bf16 %v918_v48, %v917_v6  ;;  %v938_v6 = vld [vmem:[#allocation5 + $0x2a8] sm:$0xff]  ;;  %v7955_v59 = vpack.c.bf16 %v928_v15, %v927_v46  ;;  %v931_v46 = vld [vmem:[#allocation5 + $0x270] sm:$0xff] }
 0x17f   :  { %6309 = vmatprep.subr.bf16.mxu0 %v7884_v19  ;;  %3686 = vadd.xlane.f32.xlu1 %v3685_v61  ;;  %v7929_v61 = vpack.c.bf16 %v936_v5, %v935_v55  ;;  %v7935_v48 = vpack.c.bf16 %v938_v6, %v937_v56  ;;  %v922_v32 = vld [vmem:[#allocation5 + $0x228] sm:$0xff]  ;;  %v939_v55 = vld [vmem:[#allocation5 + $0x2b0] sm:$0xff]  ;;  %v940_v5 = vld [vmem:[#allocation5 + $0x2b8] sm:$0xff]  ;;  %v7967_v49 = vpack.c.bf16 %v932_v13, %v931_v46 }
 0x180   :  { %v7937_v1 = vpack.c.bf16 %v922_v32, %v921_v4  ;;  %v7941_v27 = vpack.c.bf16 %v940_v5, %v939_v55  ;;  %v941_v56 = vld [vmem:[#allocation5 + $0x2c0] sm:$0xff]  ;;  %v942_v6 = vld [vmem:[#allocation5 + $0x2c8] sm:$0xff]  ;;  %v943_v55 = vld [vmem:[#allocation5 + $0x2d0] sm:$0xff] }
 0x181   :  { %v7947_v4 = vpack.c.bf16 %v942_v6, %v941_v56  ;;  %v925_v32 = vld [vmem:[#allocation5 + $0x240] sm:$0xff]  ;;  %v944_v5 = vld [vmem:[#allocation5 + $0x2d8] sm:$0xff]  ;;  %v946_v6 = vld [vmem:[#allocation5 + $0x2e8] sm:$0xff]  ;;  %9265 = vst [vmem:[#allocation55_spill] sm:$0xff] %v7967_v49 }
 0x182   :  { %6311 = vmatpush3.bf16.msra.mxu0 %v7888_v11  ;;  %v7949_v17 = vpack.c.bf16 %v926_v62, %v925_v32  ;;  %v7953_v45 = vpack.c.bf16 %v944_v5, %v943_v55  ;;  %v945_v56 = vld [vmem:[#allocation5 + $0x2e0] sm:$0xff]  ;;  %v947_v55 = vld [vmem:[#allocation5 + $0x2f0] sm:$0xff]  ;;  %v948_v5 = vld [vmem:[#allocation5 + $0x2f8] sm:$0xff] }
 0x183   :  { %6313 = vmatprep.subr.bf16.mxu0 %v7906_v42  ;;  %v7959_v62 = vpack.c.bf16 %v946_v6, %v945_v56  ;;  %v929_v32 = vld [vmem:[#allocation5 + $0x260] sm:$0xff]  ;;  %v7965_v15 = vpack.c.bf16 %v948_v5, %v947_v55  ;;  %v7977_v56 = vpop.xlane.xlu0 %1553 }
 0x184   :  { %v7961_v7 = vpack.c.bf16 %v930_v52, %v929_v32  ;;  %v9266_v52 = vmov 0.0   ;;  %9267 = vst [vmem:[#allocation56_spill] sm:$0xff] %v7977_v56 }
 0x185   :  { %9264 = vst [vmem:[#allocation54_spill] sm:$0xff] %v7965_v15 }
 0x186   :  { %6315 = vmatpush3.bf16.msra.mxu0 %v7910_v43  ;;  %9263 = vst [vmem:[#allocation53_spill] sm:$0xff] %v7961_v7 }
 0x187   :  { %6349 = vmatprep.subr.bf16.mxu0 %v7917_v12  ;;  %v7979_v6 = vpop.xlane.xlu0 %2975 }
 0x188   :  { %9268 = vst [vmem:[#allocation57_spill] sm:$0xff] %v7979_v6 }
 0x189   :  { %4449 = vmatmul.mubr.msk.f32.vlgmr.msra.gmra.mrb[6].mxu0 %vm801_vm9, %v9262_v41 }
 0x18a   :  { %6351 = vmatpush3.bf16.msra.mxu0 %v7919_v34  ;;  %4452 = vmatprep.mubr.msk.f32.mxu0 %vm806_vm1, %v9262_v41 }
 0x18b   :  { %6353 = vmatprep.subr.bf16.mxu0 %v7929_v61 }
 0x18e   :  { %6355 = vmatpush3.bf16.msra.mxu0 %v7931_v47 }
 0x18f   :  { %6357 = vmatprep.subr.bf16.mxu0 %v7935_v48 }
 0x192   :  { %6359 = vmatpush3.bf16.msra.mxu0 %v7937_v1 }
 0x193   :  { %6361 = vmatprep.subr.bf16.mxu0 %v7941_v27 }
 0x196   :  { %6363 = vmatpush3.bf16.msra.mxu0 %v7943_v57 }
 0x197   :  { %6365 = vmatprep.subr.bf16.mxu0 %v7947_v4 }
 0x19a   :  { %6367 = vmatpush3.bf16.msra.mxu0 %v7949_v17 }
 0x19b   :  { %6369 = vmatprep.subr.bf16.mxu0 %v7953_v45 }
 0x19e   :  { %6371 = vmatpush3.bf16.msra.mxu0 %v7955_v59 }
 0x19f   :  { %6373 = vmatprep.subr.bf16.mxu0 %v7959_v62 }
 0x1a2   :  { %6375 = vmatpush3.bf16.msra.mxu0 %v7961_v7 }
 0x1a3   :  { %6377 = vmatprep.subr.bf16.mxu0 %v7965_v15  ;;  %v904_v15 = vld [vmem:[#allocation5 + $0x198] sm:$0xff] }
 0x1a6   :  { %6379 = vmatpush3.bf16.msra.mxu0 %v7967_v49  ;;  %v903_v49 = vld [vmem:[#allocation5 + $0x190] sm:$0xff] }
 0x1a7   :  { %6404 = vmatprep.subr.bf16.mxu0 %v9258_v63 }
 0x1a9   :  { %4453 = vmatmul.mubr.msk.f32.vlgmr.msra.gmra.mrb[8].mxu0 %vm805_vm0, %v9262_v41 }
 0x1aa   :  { %5658 = vmatprep.mubr.msk.f32.mxu0 %vm7335_vm4, %v9266_v52 }
 0x1f5   :  { %v555_v32 = vpop.xlane.xlu0 %554 }
 0x1f6   :  { %v556_v13 = vrot.slane %v555_v32, 4 }
 0x1f8   :  { %v557_v55 = vadd.f32 %v556_v13, %v555_v32  ;;  %v7989_v32 = vpack.c.bf16 %v886_v26, %v885_v50  ;;  %v7991_v13 = vpack.c.bf16 %v904_v15, %v903_v49  ;;  %v889_v26 = vld [vmem:[#allocation5 + $0x120] sm:$0xff]  ;;  %v890_v49 = vld [vmem:[#allocation5 + $0x128] sm:$0xff]  ;;  %v908_v15 = vld [vmem:[#allocation5 + $0x1b8] sm:$0xff] }
 0x1fa   :  { %v558_v5 = vrot.slane %v557_v55, 2  ;;  %9270 = vst [vmem:[#allocation59_spill] sm:$0xff] %v7989_v32  ;;  %9271 = vst [vmem:[#allocation60_spill] sm:$0xff] %v7991_v13 }
 0x1fc   :  { %v559_v46 = vadd.f32 %v558_v5, %v557_v55  ;;  %v905_v55 = vld [vmem:[#allocation5 + $0x1a0] sm:$0xff]  ;;  %v906_v5 = vld [vmem:[#allocation5 + $0x1a8] sm:$0xff] }
 0x1fd   :  { %v8005_v50 = vpack.c.bf16 %v906_v5, %v905_v55 }
 0x1fe   :  { %v560_v44 = vrot.slane %v559_v46, 1 }
 0x1ff   :  { %9273 = vst [vmem:[#allocation62_spill] sm:$0xff] %v8005_v50 }
 0x200   :  { %v561_v60 = vadd.f32 %v560_v44, %v559_v46  ;;  %v887_v44 = vld [vmem:[#allocation5 + $0x110] sm:$0xff]  ;;  %v8008_v46 = vpack.c.bf16 %v890_v49, %v889_v26  ;;  %v912_v49 = vld [vmem:[#allocation5 + $0x1d8] sm:$0xff] }
 0x201   :  { %v911_v26 = vld [vmem:[#allocation5 + $0x1d0] sm:$0xff] }
 0x202   :  { %7126 = vpush %v561_v60  ;;  %v888_v60 = vld [vmem:[#allocation5 + $0x118] sm:$0xff]  ;;  %9274 = vst [vmem:[#allocation63_spill] sm:$0xff] %v8008_v46 }
 0x23c   :  { %v654_v56 = vpop.f32.mrb[4].mxu0 }
 0x23d   :  { %v7987_v6 = vadd.f32 %v7984_v36, %v654_v56  ;;  %v5555_v7 = vpop.f32.mrb[5].mxu0  ;;  %v7999_v56 = vpack.c.bf16 %v888_v60, %v887_v44  ;;  %v891_v60 = vld [vmem:[#allocation5 + $0x130] sm:$0xff] }
 0x23e   :  { %v907_v7 = vld [vmem:[#allocation5 + $0x1b0] sm:$0xff] }
 0x23f   :  { %9269 = vst [vmem:[#allocation58_spill] sm:$0xff] %v7987_v6  ;;  %664 = vadd.xlane.f32.xlu1 %v7987_v6  ;;  %vm659_vm9 = vcmp.gt.f32.partialorder %v7987_v6, 1.0  ;;  %9272 = vst [vmem:[#allocation61_spill] sm:$0xff] %v7999_v56  ;;  %v8011_v44 = vpack.c.bf16 %v908_v15, %v907_v7  ;;  %v910_v6 = vld [vmem:[#allocation5 + $0x1c8] sm:$0xff]  ;;  %v8023_v15 = vpack.c.bf16 %v912_v49, %v911_v26 }
 0x240   :  { %5589 = vmatmul.mubr.msk.f32.vlgmr.msra.gmra.mrb[4].mxu1 %vm659_vm9, %v9262_v41  ;;  %v8017_v5 = vpack.c.bf16 %v910_v6, %v909_v8 }
 0x241   :  { %6319 = vmatpush3.bf16.msra.mxu1 %v7989_v32  ;;  %4450 = vmatprep.mubr.msk.f32.mxu1 %vm804_vm10, %v9262_v41  ;;  %9275 = vst [vmem:[#allocation64_spill] sm:$0xff] %v8011_v44  ;;  %v892_v32 = vld [vmem:[#allocation5 + $0x138] sm:$0xff] }
 0x242   :  { %6321 = vmatprep.subr.bf16.mxu1 %v7991_v13  ;;  %v8014_v55 = vpack.c.bf16 %v892_v32, %v891_v60  ;;  %9277 = vst [vmem:[#allocation66_spill] sm:$0xff] %v8017_v5  ;;  %v893_v13 = vld [vmem:[#allocation5 + $0x140] sm:$0xff]  ;;  %v914_v60 = vld [vmem:[#allocation5 + $0x1e8] sm:$0xff] }
 0x243   :  { %v913_v32 = vld [vmem:[#allocation5 + $0x1e0] sm:$0xff] }
 0x244   :  { %9276 = vst [vmem:[#allocation65_spill] sm:$0xff] %v8014_v55  ;;  %v8029_v6 = vpack.c.bf16 %v914_v60, %v913_v32  ;;  %v950_v32 = vld [vmem:[#allocation5 + $0x308] sm:$0xff] }
 0x245   :  { %6323 = vmatpush3.bf16.msra.mxu1 %v7999_v56  ;;  %v894_v56 = vld [vmem:[#allocation5 + $0x148] sm:$0xff] }
 0x246   :  { %6325 = vmatprep.subr.bf16.mxu1 %v8005_v50  ;;  %v8020_v7 = vpack.c.bf16 %v894_v56, %v893_v13  ;;  %v895_v50 = vld [vmem:[#allocation5 + $0x150] sm:$0xff]  ;;  %v916_v56 = vld [vmem:[#allocation5 + $0x1f8] sm:$0xff] }
 0x247   :  { %v915_v13 = vld [vmem:[#allocation5 + $0x1f0] sm:$0xff] }
 0x248   :  { %9278 = vst [vmem:[#allocation67_spill] sm:$0xff] %v8020_v7  ;;  %v8035_v49 = vpack.c.bf16 %v916_v56, %v915_v13  ;;  %v954_v13 = vld [vmem:[#allocation5 + $0x328] sm:$0xff] }
 0x249   :  { %6327 = vmatpush3.bf16.msra.mxu1 %v8008_v46  ;;  %v896_v46 = vld [vmem:[#allocation5 + $0x158] sm:$0xff] }
 0x24a   :  { %6329 = vmatprep.subr.bf16.mxu1 %v8011_v44  ;;  %v8026_v8 = vpack.c.bf16 %v896_v46, %v895_v50  ;;  %v897_v44 = vld [vmem:[#allocation5 + $0x160] sm:$0xff]  ;;  %9280 = vst [vmem:[#allocation69_spill] sm:$0xff] %v8035_v49 }
 0x24b   :  { %v949_v46 = vld [vmem:[#allocation5 + $0x300] sm:$0xff] }
 0x24c   :  { %v8042_v60 = vpack.c.bf16 %v950_v32, %v949_v46  ;;  %v955_v46 = vld [vmem:[#allocation5 + $0x330] sm:$0xff]  ;;  %v956_v32 = vld [vmem:[#allocation5 + $0x338] sm:$0xff] }
 0x24d   :  { %6331 = vmatpush3.bf16.msra.mxu1 %v8014_v55  ;;  %v898_v55 = vld [vmem:[#allocation5 + $0x168] sm:$0xff]  ;;  %v8059_v14 = vpack.c.bf16 %v956_v32, %v955_v46  ;;  %v961_v46 = vld [vmem:[#allocation5 + $0x360] sm:$0xff] }
 0x24e   :  { %6333 = vmatprep.subr.bf16.mxu1 %v8017_v5  ;;  %v8032_v26 = vpack.c.bf16 %v898_v55, %v897_v44  ;;  %v899_v5 = vld [vmem:[#allocation5 + $0x170] sm:$0xff]  ;;  %9282 = vst [vmem:[#allocation71_spill] sm:$0xff] %v8042_v60  ;;  %v952_v55 = vld [vmem:[#allocation5 + $0x318] sm:$0xff]  ;;  %v962_v32 = vld [vmem:[#allocation5 + $0x368] sm:$0xff] }
 0x24f   :  { %v951_v44 = vld [vmem:[#allocation5 + $0x310] sm:$0xff]  ;;  %9285 = vst [vmem:[#allocation74_spill] sm:$0xff] %v8059_v14 }
 0x250   :  { %9279 = vst [vmem:[#allocation68_spill] sm:$0xff] %v8032_v26 }
 0x251   :  { %6335 = vmatpush3.bf16.msra.mxu1 %v8020_v7  ;;  %v900_v7 = vld [vmem:[#allocation5 + $0x178] sm:$0xff] }
 0x252   :  { %6337 = vmatprep.subr.bf16.mxu1 %v8023_v15  ;;  %v8038_v50 = vpack.c.bf16 %v900_v7, %v899_v5  ;;  %v8049_v5 = vpack.c.bf16 %v952_v55, %v951_v44  ;;  %v953_v7 = vld [vmem:[#allocation5 + $0x320] sm:$0xff]  ;;  %v958_v55 = vld [vmem:[#allocation5 + $0x348] sm:$0xff] }
 0x253   :  { %v8055_v56 = vpack.c.bf16 %v954_v13, %v953_v7  ;;  %v957_v44 = vld [vmem:[#allocation5 + $0x340] sm:$0xff]  ;;  %v959_v7 = vld [vmem:[#allocation5 + $0x350] sm:$0xff]  ;;  %v960_v13 = vld [vmem:[#allocation5 + $0x358] sm:$0xff] }
 0x254   :  { %9281 = vst [vmem:[#allocation70_spill] sm:$0xff] %v8038_v50  ;;  %9283 = vst [vmem:[#allocation72_spill] sm:$0xff] %v8049_v5 }
 0x255   :  { %6339 = vmatpush3.bf16.msra.mxu1 %v8026_v8  ;;  %9284 = vst [vmem:[#allocation73_spill] sm:$0xff] %v8055_v56 }
 0x256   :  { %6341 = vmatprep.subr.bf16.mxu1 %v8029_v6 }
 0x259   :  { %6343 = vmatpush3.bf16.msra.mxu1 %v8032_v26  ;;  %v552_v26 = vmul.f32 %v7750_v53, %v7750_v53 }
 0x25a   :  { %6345 = vmatprep.subr.bf16.mxu1 %v8035_v49 }
 0x25d   :  { %6347 = vmatpush3.bf16.msra.mxu1 %v8038_v50 }
 0x25e   :  { %6380 = vmatprep.subr.bf16.mxu1 %v9258_v63 }
 0x260   :  { %4451 = vmatmul.mubr.msk.f32.vlgmr.msra.gmra.mrb[6].mxu1 %vm803_vm11, %v9262_v41 }
 0x261   :  { %6382 = vmatpush3.bf16.msra.mxu1 %v8042_v60  ;;  %5623 = vmatprep.mubr.msk.f32.mxu1 %vm7335_vm4, %v9266_v52  ;;  %v8063_v60 = vpack.c.bf16 %v958_v55, %v957_v44  ;;  %v963_v44 = vld [vmem:[#allocation5 + $0x370] sm:$0xff]  ;;  %v964_v55 = vld [vmem:[#allocation5 + $0x378] sm:$0xff] }
 0x262   :  { %6383 = vmatprep.subr.bf16.mxu1 %v9258_v63 }
 0x263   :  { %9286 = vst [vmem:[#allocation75_spill] sm:$0xff] %v8063_v60 }
 0x265   :  { %6385 = vmatpush3.bf16.msra.mxu1 %v8049_v5  ;;  %v8067_v5 = vpack.c.bf16 %v960_v13, %v959_v7  ;;  %v1271_v13 = vld [vmem:[#allocation7] sm:$0xff] }
 0x266   :  { %6386 = vmatprep.subr.bf16.mxu1 %v9258_v63 }
 0x267   :  { %9287 = vst [vmem:[#allocation76_spill] sm:$0xff] %v8067_v5 }
 0x269   :  { %6388 = vmatpush3.bf16.msra.mxu1 %v8055_v56  ;;  %v8071_v56 = vpack.c.bf16 %v962_v32, %v961_v46  ;;  %v1272_v46 = vld [vmem:[#allocation7 + $0x8] sm:$0xff] }
 0x26a   :  { %6389 = vmatprep.subr.bf16.mxu1 %v9258_v63  ;;  %v8103_v32 = vpack.c.bf16 %v1272_v46, %v1271_v13  ;;  %v1279_v46 = vld [vmem:[#allocation7 + $0x40] sm:$0xff] }
 0x26b   :  { %9288 = vst [vmem:[#allocation77_spill] sm:$0xff] %v8071_v56 }
 0x26c   :  { %6406 = vmatpush3.bf16.msra.mxu0 %v8103_v32 }
 0x26d   :  { %6391 = vmatpush3.bf16.msra.mxu1 %v8059_v14  ;;  %v8075_v14 = vpack.c.bf16 %v964_v55, %v963_v44  ;;  %v1274_v44 = vld [vmem:[#allocation7 + $0x18] sm:$0xff]  ;;  %v8105_v55 = vpop.xlane.xlu1 %842  ;;  %6407 = vmatprep.subr.bf16.mxu0 %v9258_v63 }
 0x26e   :  { %6392 = vmatprep.subr.bf16.mxu1 %v9258_v63 }
 0x26f   :  { %9289 = vst [vmem:[#allocation78_spill] sm:$0xff] %v8075_v14 }
 0x271   :  { %6394 = vmatpush3.bf16.msra.mxu1 %v8063_v60 }
 0x272   :  { %6395 = vmatprep.subr.bf16.mxu1 %v9258_v63 }
 0x275   :  { %6397 = vmatpush3.bf16.msra.mxu1 %v8067_v5 }
 0x276   :  { %6398 = vmatprep.subr.bf16.mxu1 %v9258_v63 }
 0x279   :  { %6400 = vmatpush3.bf16.msra.mxu1 %v8071_v56 }
 0x27a   :  { %6401 = vmatprep.subr.bf16.mxu1 %v9258_v63 }
 0x27d   :  { %6403 = vmatpush3.bf16.msra.mxu1 %v8075_v14 }
 0x27e   :  { %6428 = vmatprep.subr.bf16.mxu1 %v9258_v63 }
 0x280   :  { %5624 = vmatmul.mubr.msk.f32.vlgmr.msra.gmra.mrb[8].mxu1 %vm807_vm2, %v9262_v41 }
 0x281   :  { %6430 = vmatpush3.bf16.msra.mxu1 %v7762_v24  ;;  %5693 = vmatprep.mubr.msk.f32.mxu1 %vm7335_vm4, %v9266_v52  ;;  %v4738_v24 = vpop.f32.mrb[6].mxu0 }
 0x282   :  { %6431 = vmatprep.subr.bf16.mxu1 %v9258_v63 }
 0x285   :  { %6433 = vmatpush3.bf16.msra.mxu1 %v7770_v39  ;;  %v4739_v39 = vpop.f32.mrb[7].mxu0 }
 0x286   :  { %6434 = vmatprep.subr.bf16.mxu1 %v9258_v63  ;;  %v8098_v7 = vadd.f32 %v4739_v39, %v4738_v24  ;;  %v1276_v24 = vld [vmem:[#allocation7 + $0x28] sm:$0xff]  ;;  %v1277_v39 = vld [vmem:[#allocation7 + $0x30] sm:$0xff] }
 0x289   :  { %6436 = vmatpush3.bf16.msra.mxu1 %v7785_v20  ;;  %v4808_v20 = vpop.f32.mrb[8].mxu0 }
 0x28a   :  { %6437 = vmatprep.subr.bf16.mxu1 %v9258_v63 }
 0x28d   :  { %6439 = vmatpush3.bf16.msra.mxu1 %v7797_v58  ;;  %v4809_v58 = vpop.f32.mrb[9].mxu0 }
 0x28e   :  { %6440 = vmatprep.subr.bf16.mxu1 %v9258_v63 }
 0x291   :  { %6442 = vmatpush3.bf16.msra.mxu1 %v7807_v37  ;;  %v4810_v37 = vadd.f32 %v4809_v58, %v4808_v20  ;;  %v1278_v20 = vld [vmem:[#allocation7 + $0x38] sm:$0xff]  ;;  %v8115_v58 = vpop.xlane.xlu1 %2264 }
 0x292   :  { %6443 = vmatprep.subr.bf16.mxu1 %v9258_v63  ;;  %9290 = vst [vmem:[#allocation79_spill] sm:$0xff] %v8115_v58  ;;  %v8118_v13 = vpack.c.bf16 %v1278_v20, %v1277_v39 }
 0x295   :  { %6445 = vmatpush3.bf16.msra.mxu1 %v7856_v21  ;;  %v1273_v21 = vld [vmem:[#allocation7 + $0x10] sm:$0xff] }
 0x296   :  { %6446 = vmatprep.subr.bf16.mxu1 %v9258_v63 }
 0x299   :  { %6448 = vmatpush3.bf16.msra.mxu1 %v7882_v22  ;;  %v8108_v22 = vpack.c.bf16 %v1274_v44, %v1273_v21  ;;  %v1280_v21 = vld [vmem:[#allocation7 + $0x48] sm:$0xff]  ;;  %v8121_v44 = vpop.xlane.xlu1 %3686 }
 0x29a   :  { %6449 = vmatprep.subr.bf16.mxu1 %v9258_v63  ;;  %9291 = vst [vmem:[#allocation80_spill] sm:$0xff] %v8121_v44 }
 0x29b   :  { %6409 = vmatpush3.bf16.msra.mxu0 %v8108_v22 }
 0x29c   :  { %6410 = vmatprep.subr.bf16.mxu0 %v9258_v63 }
 0x29d   :  { %6451 = vmatpush3.bf16.msra.mxu1 %v7904_v25  ;;  %v1275_v25 = vld [vmem:[#allocation7 + $0x20] sm:$0xff] }
 0x29e   :  { %6485 = vmatprep.subr.bf16.mxu1 %v7913_v0  ;;  %v8112_v0 = vpack.c.bf16 %v1276_v24, %v1275_v25  ;;  %v8124_v25 = vpack.c.bf16 %v1280_v21, %v1279_v46  ;;  %v1281_v24 = vld [vmem:[#allocation7 + $0x50] sm:$0xff]  ;;  %v1283_v46 = vld [vmem:[#allocation7 + $0x60] sm:$0xff]  ;;  %v1284_v21 = vld [vmem:[#allocation7 + $0x68] sm:$0xff] }
 0x29f   :  { %v8128_v58 = vpack.c.bf16 %v1282_v2, %v1281_v24  ;;  %v8133_v56 = vpack.c.bf16 %v1284_v21, %v1283_v46  ;;  %v8142_v24 = vld [vmem:[%s9085_s6] ss:$0 sm:$0xff] }
 0x2a0   :  { %6412 = vmatpush3.bf16.msra.mxu0 %v8112_v0  ;;  %9292 = vst [vmem:[#allocation81_spill] sm:$0xff] %v8142_v24 }
 0x2a1   :  { %6413 = vmatprep.subr.bf16.mxu0 %v9258_v63 }
 0x2a4   :  { %6415 = vmatpush3.bf16.msra.mxu0 %v8118_v13 }
 0x2a5   :  { %6416 = vmatprep.subr.bf16.mxu0 %v9258_v63 }
 0x2a8   :  { %6418 = vmatpush3.bf16.msra.mxu0 %v8124_v25 }
 0x2a9   :  { %6419 = vmatprep.subr.bf16.mxu0 %v9258_v63 }
 0x2ac   :  { %6421 = vmatpush3.bf16.msra.mxu0 %v8128_v58 }
 0x2ad   :  { %6422 = vmatprep.subr.bf16.mxu0 %v9258_v63 }
 0x2b0   :  { %6424 = vmatpush3.bf16.msra.mxu0 %v8133_v56 }
 0x2b1   :  { %6425 = vmatprep.subr.bf16.mxu0 %v9258_v63 }
 0x2b4   :  { %6427 = vmatpush3.bf16.msra.mxu0 %v7733_v9  ;;  %v8155_v9 = vld [vmem:[%s9081_s2] ss:$0 sm:$0xff] }
 0x2b5   :  { %6453 = vmatprep.subr.bf16.mxu0 %v7764_v30 }
 0x2cc   :  { %v665_v39 = vpop.xlane.xlu1 %664 }
 0x2cd   :  { %v666_v20 = vrot.slane %v665_v39, 4 }
 0x2cf   :  { %v667_v14 = vadd.f32 %v666_v20, %v665_v39 }
 0x2d1   :  { %v668_v44 = vrot.slane %v667_v14, 2 }
 0x2d3   :  { %v669_v5 = vadd.f32 %v668_v44, %v667_v14 }
 0x2d5   :  { %v670_v60 = vrot.slane %v669_v5, 1 }
 0x2d7   :  { %v671_v2 = vadd.f32 %v670_v60, %v669_v5  ;;  %v1039_v5 = vadd.f32 %v8098_v7, %v8155_v9 }
 0x2d9   :  { %7128 = vpush %v671_v2 }
 0x313   :  { %v764_v39 = vpop.f32.mrb[4].mxu1 }
 0x314   :  { %v8145_v20 = vadd.f32 %v8142_v24, %v764_v39  ;;  %v5590_v14 = vpop.f32.mrb[5].mxu1  ;;  %v1252_v24 = vmul.f32 0.9, %v7750_v53  ;;  %v844_v53 = vrot.slane %v8105_v55, 4 }
 0x316   :  { %9293 = vst [vmem:[#allocation82_spill] sm:$0xff] %v8145_v20  ;;  %vm769_vm10 = vcmp.gt.f32.partialorder %v8145_v20, 1.0 }
 0x317   :  { %v8149_v44 = vsel %vm769_vm10, 1.0, %v9266_v52 }
 0x318   :  { %9294 = vst [vmem:[#allocation83_spill] sm:$0xff] %v8149_v44  ;;  %772 = vst [vmem:[#allocation10] sm:$0xff] %v8149_v44  ;;  %v4433_v44 = vsel %vm549_vm14, 1.0, %v9266_v52 }
 0x333   :  { %v4773_v30 = vpop.f32.mrb[6].mxu1 }
 0x334   :  { %v4774_v60 = vpop.f32.mrb[7].mxu1 }
 0x335   :  { %v4775_v46 = vadd.f32 %v4774_v60, %v4773_v30  ;;  %v9320_v30 = vld [vmem:[#allocation75_spill] sm:$0xff]  ;;  %v9321_v60 = vld [vmem:[#allocation76_spill] sm:$0xff] }
 0x337   :  { %v1109_v21 = vadd.f32 %v4775_v46, %v1039_v5  ;;  %v9322_v5 = vld [vmem:[#allocation77_spill] sm:$0xff]  ;;  %v9323_v46 = vld [vmem:[#allocation78_spill] sm:$0xff] }
 0x339   :  { %v1179_v2 = vadd.f32 %v4810_v37, %v1109_v21  ;;  %v845_v37 = vadd.f32 %v844_v53, %v8105_v55  ;;  %v9307_v55 = vld [vmem:[#allocation64_spill] sm:$0xff] }
 0x33a   :  { %v9324_v21 = vld [vmem:[#allocation32_spill] sm:$0xff] }
 0x33b   :  { %vm9325_vm0 = vcmp.gt.f32.partialorder %v9324_v21, 1.0  ;;  %v2352_v21 = vld [vmem:[#allocation5 + $0x268] sm:$0xff] }
 0x353   :  { %v1248_v39 = vpop.f32.mrb[8].mxu1 }
 0x354   :  { %v1249_v14 = vadd.f32 %v1248_v39, %v1179_v2  ;;  %v5625_v20 = vpop.f32.mrb[9].mxu1 }
 0x355   :  { %v9314_v20 = vld [vmem:[#allocation27_spill] sm:$0xff] }
 0x356   :  { %v1253_v50 = vadd.f32 %v1252_v24, %v1249_v14  ;;  %v9313_v24 = vld [vmem:[#allocation70_spill] sm:$0xff]  ;;  %vm9315_vm14 = vcmp.gt.f32.partialorder %v9314_v20, 1.0 }
 0x358   :  { %v8163_v49 = vsub.f32 %v1253_v50, %v4433_v44  ;;  %v9316_v44 = vld [vmem:[#allocation71_spill] sm:$0xff] }
 0x35a   :  { %1260 = vadd.xlane.f32.xlu0 %v8163_v49  ;;  %vm1255_vm11 = vcmp.gt.f32.partialorder %v8163_v49, 1.0  ;;  %v1258_v7 = vmul.f32 %v8163_v49, %v8163_v49 }
 0x35b   :  { %5659 = vmatmul.mubr.msk.f32.vlgmr.msra.gmra.mrb[10].mxu0 %vm1255_vm11, %v9262_v41 }
 0x35c   :  { %6455 = vmatpush3.bf16.msra.mxu0 %v7766_v31  ;;  %4470 = vmatprep.mubr.msk.f32.mxu0 %vm1513_vm12, %v9262_v41  ;;  %v8178_v50 = vadd.f32 %v1258_v7, %v552_v26  ;;  %v846_v31 = vrot.slane %v845_v37, 2 }
 0x35d   :  { %6457 = vmatprep.subr.bf16.mxu0 %v7774_v54 }
 0x35e   :  { %v847_v26 = vadd.f32 %v846_v31, %v845_v37 }
 0x360   :  { %6459 = vmatpush3.bf16.msra.mxu0 %v7778_v3  ;;  %v848_v54 = vrot.slane %v847_v26, 1 }
 0x361   :  { %6461 = vmatprep.subr.bf16.mxu0 %v7781_v10  ;;  %v9297_v10 = vld [vmem:[#allocation55_spill] sm:$0xff] }
 0x362   :  { %v849_v3 = vadd.f32 %v848_v54, %v847_v26 }
 0x364   :  { %6463 = vmatpush3.bf16.msra.mxu0 %v7790_v35  ;;  %7130 = vpush %v849_v3 }
 0x365   :  { %6465 = vmatprep.subr.bf16.mxu0 %v7793_v38 }
 0x368   :  { %6467 = vmatpush3.bf16.msra.mxu0 %v7801_v16 }
 0x369   :  { %6469 = vmatprep.subr.bf16.mxu0 %v7804_v18 }
 0x36c   :  { %6471 = vmatpush3.bf16.msra.mxu0 %v7811_v28 }
 0x36d   :  { %6473 = vmatprep.subr.bf16.mxu0 %v7864_v40  ;;  %v9295_v40 = vld [vmem:[#allocation53_spill] sm:$0xff] }
 0x370   :  { %6475 = vmatpush3.bf16.msra.mxu0 %v7870_v51 }
 0x371   :  { %6477 = vmatprep.subr.bf16.mxu0 %v7884_v19  ;;  %v9299_v19 = vld [vmem:[#allocation58_spill] sm:$0xff] }
 0x374   :  { %6479 = vmatpush3.bf16.msra.mxu0 %v7888_v11  ;;  %v9296_v11 = vld [vmem:[#allocation54_spill] sm:$0xff] }
 0x375   :  { %6481 = vmatprep.subr.bf16.mxu0 %v7906_v42  ;;  %v1364_v42 = vmul.f32 0.9, %v9299_v19 }
 0x378   :  { %6483 = vmatpush3.bf16.msra.mxu0 %v7910_v43 }
 0x379   :  { %6517 = vmatprep.subr.bf16.mxu0 %v7917_v12 }
 0x37b   :  { %4471 = vmatmul.mubr.msk.f32.vlgmr.msra.gmra.mrb[12].mxu0 %vm1512_vm13, %v9262_v41 }
 0x37c   :  { %6519 = vmatpush3.bf16.msra.mxu0 %v7919_v34  ;;  %4474 = vmatprep.mubr.msk.f32.mxu0 %vm1517_vm5, %v9262_v41  ;;  %v4436_v34 = vsel %vm659_vm9, 1.0, %v9266_v52 }
 0x37d   :  { %6521 = vmatprep.subr.bf16.mxu0 %v7929_v61 }
 0x380   :  { %6523 = vmatpush3.bf16.msra.mxu0 %v7931_v47  ;;  %v662_v47 = vmul.f32 %v9299_v19, %v9299_v19 }
 0x381   :  { %6525 = vmatprep.subr.bf16.mxu0 %v7935_v48  ;;  %v9300_v48 = vld [vmem:[#allocation59_spill] sm:$0xff] }
 0x384   :  { %6527 = vmatpush3.bf16.msra.mxu0 %v7937_v1 }
 0x385   :  { %6529 = vmatprep.subr.bf16.mxu0 %v7941_v27  ;;  %v9301_v27 = vld [vmem:[#allocation26_spill] sm:$0xff] }
 0x386   :  { %vm9302_vm13 = vcmp.gt.f32.partialorder %v9301_v27, 1.0  ;;  %v8481_v27 = vld [vmem:[%s9083_s4] ss:$0 sm:$0xff] }
 0x388   :  { %6531 = vmatpush3.bf16.msra.mxu0 %v7943_v57  ;;  %v2354_v57 = vld [vmem:[#allocation5 + $0x278] sm:$0xff] }
 0x389   :  { %6533 = vmatprep.subr.bf16.mxu0 %v7947_v4 }
 0x38c   :  { %6535 = vmatpush3.bf16.msra.mxu0 %v7949_v17 }
 0x38d   :  { %6537 = vmatprep.subr.bf16.mxu0 %v7953_v45  ;;  %v9303_v45 = vld [vmem:[#allocation60_spill] sm:$0xff] }
 0x390   :  { %6539 = vmatpush3.bf16.msra.mxu0 %v7955_v59 }
 0x391   :  { %6541 = vmatprep.subr.bf16.mxu0 %v7959_v62  ;;  %v9304_v62 = vld [vmem:[#allocation61_spill] sm:$0xff] }
 0x394   :  { %6543 = vmatpush3.bf16.msra.mxu0 %v9295_v40 }
 0x395   :  { %6545 = vmatprep.subr.bf16.mxu0 %v9296_v11 }
 0x398   :  { %6547 = vmatpush3.bf16.msra.mxu0 %v9297_v10  ;;  %v1996_v10 = vld [vmem:[#allocation7 + $0x70] sm:$0xff] }
 0x399   :  { %6572 = vmatprep.subr.bf16.mxu0 %v9258_v63 }
 0x39b   :  { %4475 = vmatmul.mubr.msk.f32.vlgmr.msra.gmra.mrb[14].mxu0 %vm1516_vm3, %v9262_v41 }
 0x39c   :  { %6574 = vmatpush3.bf16.msra.mxu0 %v8103_v32  ;;  %5763 = vmatprep.mubr.msk.f32.mxu0 %vm7335_vm4, %v9266_v52  ;;  %v9306_v32 = vld [vmem:[#allocation63_spill] sm:$0xff] }
 0x39d   :  { %6575 = vmatprep.subr.bf16.mxu0 %v9258_v63 }
 0x3a0   :  { %6577 = vmatpush3.bf16.msra.mxu0 %v8108_v22  ;;  %v9308_v22 = vld [vmem:[#allocation65_spill] sm:$0xff] }
 0x3a1   :  { %6578 = vmatprep.subr.bf16.mxu0 %v9258_v63 }
 0x3a4   :  { %6580 = vmatpush3.bf16.msra.mxu0 %v8112_v0  ;;  %v9309_v0 = vld [vmem:[#allocation66_spill] sm:$0xff] }
 0x3a5   :  { %6581 = vmatprep.subr.bf16.mxu0 %v9258_v63 }
 0x3a8   :  { %6583 = vmatpush3.bf16.msra.mxu0 %v8118_v13  ;;  %v9311_v13 = vld [vmem:[#allocation68_spill] sm:$0xff] }
 0x3a9   :  { %6584 = vmatprep.subr.bf16.mxu0 %v9258_v63 }
 0x3ac   :  { %6586 = vmatpush3.bf16.msra.mxu0 %v8124_v25  ;;  %v9312_v25 = vld [vmem:[#allocation69_spill] sm:$0xff] }
 0x3ad   :  { %6587 = vmatprep.subr.bf16.mxu0 %v9258_v63 }
 0x3b0   :  { %6589 = vmatpush3.bf16.msra.mxu0 %v8128_v58  ;;  %v9310_v58 = vld [vmem:[#allocation67_spill] sm:$0xff] }
 0x3b1   :  { %6590 = vmatprep.subr.bf16.mxu0 %v9258_v63 }
 0x3b4   :  { %6592 = vmatpush3.bf16.msra.mxu0 %v8133_v56  ;;  %v9305_v56 = vld [vmem:[#allocation62_spill] sm:$0xff] }
 0x3b5   :  { %6593 = vmatprep.subr.bf16.mxu0 %v9258_v63 }
 0x3e7   :  { %v1261_v59 = vpop.xlane.xlu0 %1260 }
 0x3e8   :  { %v1262_v17 = vrot.slane %v1261_v59, 4 }
 0x3ea   :  { %v1263_v35 = vadd.f32 %v1262_v17, %v1261_v59  ;;  %v1997_v59 = vld [vmem:[#allocation7 + $0x78] sm:$0xff] }
 0x3eb   :  { %v8301_v17 = vpack.c.bf16 %v1997_v59, %v1996_v10  ;;  %v2278_v10 = vld [vmem:[#allocation5 + $0x18] sm:$0xff] }
 0x3ec   :  { %v1264_v38 = vrot.slane %v1263_v35, 2 }
 0x3ed   :  { %6595 = vmatpush3.bf16.msra.mxu0 %v8301_v17 }
 0x3ee   :  { %v1265_v16 = vadd.f32 %v1264_v38, %v1263_v35 }
 0x3f0   :  { %v1266_v18 = vrot.slane %v1265_v16, 1 }
 0x3f2   :  { %v1267_v28 = vadd.f32 %v1266_v18, %v1265_v16  ;;  %v9326_v16 = vld [vmem:[#allocation82_spill] sm:$0xff] }
 0x3f3   :  { %v1476_v18 = vmul.f32 0.9, %v9326_v16  ;;  %v2295_v16 = vld [vmem:[#allocation5 + $0xa0] sm:$0xff] }
 0x3f4   :  { %7132 = vpush %v1267_v28  ;;  %v9327_v28 = vld [vmem:[#allocation81_spill] sm:$0xff] }
 0x42e   :  { %v1360_v1 = vpop.f32.mrb[10].mxu0 }
 0x42f   :  { %v1361_v51 = vadd.f32 %v7984_v36, %v1360_v1  ;;  %v5660_v43 = vpop.f32.mrb[11].mxu0 }
 0x431   :  { %v1365_v12 = vadd.f32 %v1364_v42, %v1361_v51  ;;  %v9328_v42 = vld [vmem:[#allocation83_spill] sm:$0xff] }
 0x433   :  { %v8243_v61 = vsub.f32 %v1365_v12, %v4436_v34 }
 0x435   :  { %1372 = vadd.xlane.f32.xlu1 %v8243_v61  ;;  %vm1367_vm12 = vcmp.gt.f32.partialorder %v8243_v61, 1.0  ;;  %v1370_v36 = vmul.f32 %v8243_v61, %v8243_v61 }
 0x436   :  { %5694 = vmatmul.mubr.msk.f32.vlgmr.msra.gmra.mrb[10].mxu1 %vm1367_vm12, %v9262_v41 }
 0x437   :  { %6487 = vmatpush3.bf16.msra.mxu1 %v9300_v48  ;;  %4472 = vmatprep.mubr.msk.f32.mxu1 %vm9302_vm13, %v9262_v41  ;;  %v8258_v4 = vadd.f32 %v1370_v36, %v662_v47 }
 0x438   :  { %6489 = vmatprep.subr.bf16.mxu1 %v9303_v45 }
 0x43b   :  { %6491 = vmatpush3.bf16.msra.mxu1 %v9304_v62 }
 0x43c   :  { %6493 = vmatprep.subr.bf16.mxu1 %v9305_v56 }
 0x43f   :  { %6495 = vmatpush3.bf16.msra.mxu1 %v9306_v32 }
 0x440   :  { %6497 = vmatprep.subr.bf16.mxu1 %v9307_v55  ;;  %v1963_v55 = vmul.f32 0.9, %v8163_v49 }
 0x443   :  { %6499 = vmatpush3.bf16.msra.mxu1 %v9308_v22 }
 0x444   :  { %6501 = vmatprep.subr.bf16.mxu1 %v9309_v0 }
 0x447   :  { %6503 = vmatpush3.bf16.msra.mxu1 %v9310_v58  ;;  %v4455_v58 = vsel %vm1255_vm11, 1.0, %v9266_v52 }
 0x448   :  { %6505 = vmatprep.subr.bf16.mxu1 %v8023_v15  ;;  %v9317_v15 = vld [vmem:[#allocation72_spill] sm:$0xff] }
 0x44b   :  { %6507 = vmatpush3.bf16.msra.mxu1 %v8026_v8  ;;  %v9318_v8 = vld [vmem:[#allocation73_spill] sm:$0xff] }
 0x44c   :  { %6509 = vmatprep.subr.bf16.mxu1 %v8029_v6  ;;  %v9319_v6 = vld [vmem:[#allocation74_spill] sm:$0xff] }
 0x44e   :  { %v4894_v2 = vpop.f32.mrb[12].mxu0 }
 0x44f   :  { %6511 = vmatpush3.bf16.msra.mxu1 %v9311_v13  ;;  %v4895_v39 = vpop.f32.mrb[13].mxu0 }
 0x450   :  { %6513 = vmatprep.subr.bf16.mxu1 %v9312_v25  ;;  %v4896_v14 = vadd.f32 %v4895_v39, %v4894_v2  ;;  %v9329_v25 = vld [vmem:[#allocation33_spill] sm:$0xff]  ;;  %v2291_v2 = vld [vmem:[#allocation5 + $0x80] sm:$0xff] }
 0x451   :  { %vm9330_vm3 = vcmp.gt.f32.partialorder %v9329_v25, 1.0  ;;  %v2075_v25 = vmul.f32 0.9, %v8243_v61  ;;  %v9343_v61 = vld [vmem:[#allocation34_spill] sm:$0xff] }
 0x452   :  { %v1750_v36 = vadd.f32 %v4896_v14, %v8155_v9  ;;  %v2292_v14 = vld [vmem:[#allocation5 + $0x88] sm:$0xff]  ;;  %vm9344_vm10 = vcmp.gt.f32.partialorder %v9343_v61, 1.0  ;;  %v2314_v61 = vld [vmem:[#allocation5 + $0x138] sm:$0xff] }
 0x453   :  { %6515 = vmatpush3.bf16.msra.mxu1 %v9313_v24  ;;  %v9331_v24 = vld [vmem:[#allocation56_spill] sm:$0xff] }
 0x454   :  { %6548 = vmatprep.subr.bf16.mxu1 %v9258_v63 }
 0x456   :  { %4473 = vmatmul.mubr.msk.f32.vlgmr.msra.gmra.mrb[12].mxu1 %vm9315_vm14, %v9262_v41 }
 0x457   :  { %6550 = vmatpush3.bf16.msra.mxu1 %v9316_v44  ;;  %5728 = vmatprep.mubr.msk.f32.mxu1 %vm7335_vm4, %v9266_v52  ;;  %v1555_v44 = vrot.slane %v9331_v24, 4 }
 0x458   :  { %6551 = vmatprep.subr.bf16.mxu1 %v9258_v63 }
 0x45b   :  { %6553 = vmatpush3.bf16.msra.mxu1 %v9317_v15  ;;  %v1556_v15 = vadd.f32 %v1555_v44, %v9331_v24  ;;  %v2299_v24 = vld [vmem:[#allocation5 + $0xc0] sm:$0xff]  ;;  %v2300_v44 = vld [vmem:[#allocation5 + $0xc8] sm:$0xff] }
 0x45c   :  { %6554 = vmatprep.subr.bf16.mxu1 %v9258_v63 }
 0x45f   :  { %6556 = vmatpush3.bf16.msra.mxu1 %v9318_v8  ;;  %v1557_v8 = vrot.slane %v1556_v15, 2 }
 0x460   :  { %6557 = vmatprep.subr.bf16.mxu1 %v9258_v63 }
 0x463   :  { %6559 = vmatpush3.bf16.msra.mxu1 %v9319_v6  ;;  %v1558_v6 = vadd.f32 %v1557_v8, %v1556_v15  ;;  %v8378_v15 = vpack.c.bf16 %v2300_v44, %v2299_v24  ;;  %v2283_v8 = vld [vmem:[#allocation5 + $0x40] sm:$0xff]  ;;  %v2324_v44 = vld [vmem:[#allocation5 + $0x188] sm:$0xff] }
 0x464   :  { %6560 = vmatprep.subr.bf16.mxu1 %v9258_v63  ;;  %v2323_v24 = vld [vmem:[#allocation5 + $0x180] sm:$0xff] }
 0x467   :  { %6562 = vmatpush3.bf16.msra.mxu1 %v9320_v30  ;;  %v1559_v30 = vrot.slane %v1558_v6, 1 }
 0x468   :  { %6563 = vmatprep.subr.bf16.mxu1 %v9258_v63 }
 0x46b   :  { %6565 = vmatpush3.bf16.msra.mxu1 %v9321_v60  ;;  %v1560_v60 = vadd.f32 %v1559_v30, %v1558_v6  ;;  %v2284_v6 = vld [vmem:[#allocation5 + $0x48] sm:$0xff] }
 0x46c   :  { %6566 = vmatprep.subr.bf16.mxu1 %v9258_v63  ;;  %v8381_v30 = vpack.c.bf16 %v2284_v6, %v2283_v8  ;;  %v8414_v8 = vpack.c.bf16 %v2324_v44, %v2323_v24  ;;  %v2355_v6 = vld [vmem:[#allocation5 + $0x280] sm:$0xff]  ;;  %v2361_v44 = vld [vmem:[#allocation5 + $0x2b0] sm:$0xff] }
 0x46e   :  { %v4964_v7 = vpop.f32.mrb[14].mxu0 }
 0x46f   :  { %6568 = vmatpush3.bf16.msra.mxu1 %v9322_v5  ;;  %v4965_v53 = vpop.f32.mrb[15].mxu0  ;;  %v2094_v5 = vld [vmem:[#allocation8] sm:$0xff] }
 0x470   :  { %6569 = vmatprep.subr.bf16.mxu1 %v9258_v63  ;;  %v4966_v37 = vadd.f32 %v4965_v53, %v4964_v7  ;;  %v2275_v7 = vld [vmem:[#allocation5] sm:$0xff]  ;;  %v2276_v53 = vld [vmem:[#allocation5 + $0x8] sm:$0xff] }
 0x473   :  { %6571 = vmatpush3.bf16.msra.mxu1 %v9323_v46  ;;  %v2095_v46 = vld [vmem:[#allocation8 + $0x8] sm:$0xff] }
 0x474   :  { %6596 = vmatprep.subr.bf16.mxu1 %v9258_v63  ;;  %v8336_v39 = vpack.c.bf16 %v2095_v46, %v2094_v5  ;;  %v2105_v5 = vld [vmem:[#allocation8 + $0x58] sm:$0xff] }
 0x476   :  { %5729 = vmatmul.mubr.msk.f32.vlgmr.msra.gmra.mrb[14].mxu1 %vm9325_vm0, %v9262_v41 }
 0x477   :  { %5798 = vmatprep.mubr.msk.f32.mxu1 %vm7335_vm4, %v9266_v52  ;;  %6598 = vmatpush3.bf16.msra.mxu1 %v8336_v39 }
 0x478   :  { %6599 = vmatprep.subr.bf16.mxu1 %v9258_v63 }
 0x4c2   :  { %v1373_v31 = vpop.xlane.xlu1 %1372 }
 0x4c3   :  { %v1374_v26 = vrot.slane %v1373_v31, 4 }
 0x4c5   :  { %v1375_v54 = vadd.f32 %v1374_v26, %v1373_v31  ;;  %v2096_v31 = vld [vmem:[#allocation8 + $0x10] sm:$0xff]  ;;  %v2097_v26 = vld [vmem:[#allocation8 + $0x18] sm:$0xff] }
 0x4c7   :  { %v1376_v3 = vrot.slane %v1375_v54, 2 }
 0x4c9   :  { %v1377_v40 = vadd.f32 %v1376_v3, %v1375_v54  ;;  %v2293_v54 = vld [vmem:[#allocation5 + $0x90] sm:$0xff]  ;;  %v8343_v3 = vpack.c.bf16 %v2097_v26, %v2096_v31  ;;  %v2286_v31 = vld [vmem:[#allocation5 + $0x58] sm:$0xff] }
 0x4cb   :  { %v1378_v11 = vrot.slane %v1377_v40, 1  ;;  %6601 = vmatpush3.bf16.msra.mxu1 %v8343_v3 }
 0x4cc   :  { %6602 = vmatprep.subr.bf16.mxu1 %v9258_v63 }
 0x4cd   :  { %v1379_v35 = vadd.f32 %v1378_v11, %v1377_v40  ;;  %v2294_v40 = vld [vmem:[#allocation5 + $0x98] sm:$0xff]  ;;  %v2277_v11 = vld [vmem:[#allocation5 + $0x10] sm:$0xff] }
 0x4ce   :  { %v8347_v59 = vpack.c.bf16 %v2294_v40, %v2293_v54  ;;  %v2106_v54 = vld [vmem:[#allocation8 + $0x60] sm:$0xff]  ;;  %v2107_v40 = vld [vmem:[#allocation8 + $0x68] sm:$0xff] }
 0x4cf   :  { %7134 = vpush %v1379_v35  ;;  %v2098_v35 = vld [vmem:[#allocation8 + $0x20] sm:$0xff] }
 0x4d0   :  { %7136 = vpush %v1560_v60  ;;  %v2104_v60 = vld [vmem:[#allocation8 + $0x50] sm:$0xff] }
 0x4d1   :  { %v8386_v46 = vpack.c.bf16 %v2105_v5, %v2104_v60  ;;  %v2356_v60 = vld [vmem:[#allocation5 + $0x288] sm:$0xff] }
 0x4d2   :  { %v8418_v5 = vpack.c.bf16 %v2356_v60, %v2355_v6  ;;  %v2362_v6 = vld [vmem:[#allocation5 + $0x2b8] sm:$0xff] }
 0x4d3   :  { %v8442_v60 = vpack.c.bf16 %v2362_v6, %v2361_v44  ;;  %v2366_v44 = vld [vmem:[#allocation5 + $0x2d8] sm:$0xff] }
 0x509   :  { %v1472_v38 = vpop.f32.mrb[10].mxu1 }
 0x50a   :  { %v1473_v1 = vadd.f32 %v9327_v28, %v1472_v38  ;;  %v5695_v51 = vpop.f32.mrb[11].mxu1  ;;  %v2099_v38 = vld [vmem:[#allocation8 + $0x28] sm:$0xff] }
 0x50b   :  { %v2296_v28 = vld [vmem:[#allocation5 + $0xa8] sm:$0xff]  ;;  %v2279_v51 = vld [vmem:[#allocation5 + $0x20] sm:$0xff] }
 0x50c   :  { %v1477_v19 = vadd.f32 %v1476_v18, %v1473_v1  ;;  %v8350_v18 = vpack.c.bf16 %v2278_v10, %v2277_v11  ;;  %v8353_v1 = vpack.c.bf16 %v2296_v28, %v2295_v16  ;;  %v8396_v11 = vpack.c.bf16 %v2107_v40, %v2106_v54  ;;  %v2303_v10 = vld [vmem:[#allocation5 + $0xe0] sm:$0xff]  ;;  %v2288_v28 = vld [vmem:[#allocation5 + $0x68] sm:$0xff]  ;;  %v2357_v40 = vld [vmem:[#allocation5 + $0x290] sm:$0xff] }
 0x50d   :  { %v2287_v16 = vld [vmem:[#allocation5 + $0x60] sm:$0xff] }
 0x50e   :  { %v8307_v43 = vsub.f32 %v1477_v19, %v9328_v42  ;;  %v2280_v19 = vld [vmem:[#allocation5 + $0x28] sm:$0xff]  ;;  %v8356_v42 = vpack.c.bf16 %v2099_v38, %v2098_v35 }
 0x50f   :  { %v2304_v35 = vld [vmem:[#allocation5 + $0xe8] sm:$0xff] }
 0x510   :  { %vm1479_vm1 = vcmp.gt.f32.partialorder %v8307_v43, 1.0  ;;  %6604 = vmatpush3.bf16.msra.mxu1 %v8356_v42  ;;  %v8398_v38 = vpack.c.bf16 %v2304_v35, %v2303_v10  ;;  %v2358_v10 = vld [vmem:[#allocation5 + $0x298] sm:$0xff] }
 0x511   :  { %v8311_v12 = vsel %vm1479_vm1, 1.0, %v9266_v52  ;;  %6605 = vmatprep.subr.bf16.mxu1 %v9258_v63  ;;  %v8430_v35 = vpack.c.bf16 %v2358_v10, %v2357_v40  ;;  %v2363_v10 = vld [vmem:[#allocation5 + $0x2c0] sm:$0xff] }
 0x512   :  { %1483 = vst [vmem:[#allocation10 + $0x8] sm:$0xff] %v8311_v12 }
 0x529   :  { %v4929_v34 = vpop.f32.mrb[12].mxu1 }
 0x52a   :  { %v4930_v47 = vpop.f32.mrb[13].mxu1 }
 0x52b   :  { %v4931_v48 = vadd.f32 %v4930_v47, %v4929_v34  ;;  %v2297_v34 = vld [vmem:[#allocation5 + $0xb0] sm:$0xff]  ;;  %v2298_v47 = vld [vmem:[#allocation5 + $0xb8] sm:$0xff] }
 0x52d   :  { %v1820_v45 = vadd.f32 %v4931_v48, %v1750_v36  ;;  %v2100_v36 = vld [vmem:[#allocation8 + $0x30] sm:$0xff]  ;;  %v2101_v48 = vld [vmem:[#allocation8 + $0x38] sm:$0xff] }
 0x52f   :  { %v1890_v62 = vadd.f32 %v4966_v37, %v1820_v45  ;;  %v8338_v37 = vpack.c.bf16 %v2292_v14, %v2291_v2  ;;  %v8360_v45 = vpack.c.bf16 %v2280_v19, %v2279_v51  ;;  %v2301_v2 = vld [vmem:[#allocation5 + $0xd0] sm:$0xff]  ;;  %v2302_v14 = vld [vmem:[#allocation5 + $0xd8] sm:$0xff]  ;;  %v8401_v51 = vpack.c.bf16 %v2288_v28, %v2287_v16 }
 0x530   :  { %v2108_v19 = vld [vmem:[#allocation8 + $0x70] sm:$0xff]  ;;  %v2342_v28 = vld [vmem:[#allocation5 + $0x218] sm:$0xff] }
 0x531   :  { %6621 = vmatprep.subr.bf16.mxu0 %v8338_v37  ;;  %v2341_v16 = vld [vmem:[#allocation5 + $0x210] sm:$0xff] }
 0x549   :  { %v1959_v56 = vpop.f32.mrb[14].mxu1 }
 0x54a   :  { %v1960_v32 = vadd.f32 %v1959_v56, %v1890_v62  ;;  %v5730_v22 = vpop.f32.mrb[15].mxu1  ;;  %v8363_v62 = vpack.c.bf16 %v2298_v47, %v2297_v34  ;;  %v2281_v56 = vld [vmem:[#allocation5 + $0x30] sm:$0xff]  ;;  %v2109_v34 = vld [vmem:[#allocation8 + $0x78] sm:$0xff] }
 0x54b   :  { %v8406_v47 = vpack.c.bf16 %v2109_v34, %v2108_v19  ;;  %v8432_v19 = vpack.c.bf16 %v2342_v28, %v2341_v16  ;;  %v2359_v34 = vld [vmem:[#allocation5 + $0x2a0] sm:$0xff]  ;;  %v2364_v16 = vld [vmem:[#allocation5 + $0x2c8] sm:$0xff] }
 0x54c   :  { %v1964_v0 = vadd.f32 %v1963_v55, %v1960_v32  ;;  %v2282_v32 = vld [vmem:[#allocation5 + $0x38] sm:$0xff]  ;;  %v8366_v55 = vpack.c.bf16 %v2101_v48, %v2100_v36  ;;  %v2305_v36 = vld [vmem:[#allocation5 + $0xf0] sm:$0xff]  ;;  %v8448_v28 = vpack.c.bf16 %v2364_v16, %v2363_v10  ;;  %v2367_v10 = vld [vmem:[#allocation5 + $0x2e0] sm:$0xff] }
 0x54d   :  { %v8370_v22 = vpack.c.bf16 %v2282_v32, %v2281_v56  ;;  %v2306_v48 = vld [vmem:[#allocation5 + $0xf8] sm:$0xff]  ;;  %v2289_v32 = vld [vmem:[#allocation5 + $0x70] sm:$0xff]  ;;  %v2368_v16 = vld [vmem:[#allocation5 + $0x2e8] sm:$0xff] }
 0x54e   :  { %v8319_v13 = vsub.f32 %v1964_v0, %v4455_v58  ;;  %6607 = vmatpush3.bf16.msra.mxu1 %v8366_v55  ;;  %v2102_v0 = vld [vmem:[#allocation8 + $0x40] sm:$0xff]  ;;  %v2103_v58 = vld [vmem:[#allocation8 + $0x48] sm:$0xff]  ;;  %v8408_v56 = vpack.c.bf16 %v2306_v48, %v2305_v36 }
 0x54f   :  { %6608 = vmatprep.subr.bf16.mxu1 %v9258_v63  ;;  %v2360_v36 = vld [vmem:[#allocation5 + $0x2a8] sm:$0xff] }
 0x550   :  { %1971 = vadd.xlane.f32.xlu1 %v8319_v13  ;;  %vm1966_vm2 = vcmp.gt.f32.partialorder %v8319_v13, 1.0  ;;  %v1969_v9 = vmul.f32 %v8319_v13, %v8319_v13  ;;  %v8436_v48 = vpack.c.bf16 %v2360_v36, %v2359_v34  ;;  %v2347_v34 = vld [vmem:[#allocation5 + $0x240] sm:$0xff]  ;;  %v2348_v36 = vld [vmem:[#allocation5 + $0x248] sm:$0xff] }
 0x551   :  { %5764 = vmatmul.mubr.msk.f32.vlgmr.msra.gmra.mrb[16].mxu0 %vm1966_vm2, %v9262_v41 }
 0x552   :  { %4492 = vmatprep.mubr.msk.f32.mxu0 %vm9330_vm3, %v9262_v41  ;;  %v8332_v49 = vadd.f32 %v1969_v9, %v8178_v50  ;;  %v8340_v50 = vpack.c.bf16 %v2276_v53, %v2275_v7  ;;  %v8376_v9 = vpack.c.bf16 %v2103_v58, %v2102_v0  ;;  %v2285_v7 = vld [vmem:[#allocation5 + $0x50] sm:$0xff]  ;;  %v8388_v53 = vpack.c.bf16 %v2302_v14, %v2301_v2  ;;  %v2290_v0 = vld [vmem:[#allocation5 + $0x78] sm:$0xff]  ;;  %v2339_v2 = vld [vmem:[#allocation5 + $0x200] sm:$0xff] }
 0x553   :  { %v8391_v26 = vpack.c.bf16 %v2286_v31, %v2285_v7  ;;  %v8411_v58 = vpack.c.bf16 %v2290_v0, %v2289_v32  ;;  %v2340_v14 = vld [vmem:[#allocation5 + $0x208] sm:$0xff]  ;;  %v9332_v7 = vld [vmem:[#allocation30_spill] sm:$0xff]  ;;  %v2343_v32 = vld [vmem:[#allocation5 + $0x220] sm:$0xff] }
 0x554   :  { %6623 = vmatpush3.bf16.msra.mxu0 %v8340_v50  ;;  %6610 = vmatpush3.bf16.msra.mxu1 %v8376_v9  ;;  %vm9333_vm5 = vcmp.gt.f32.partialorder %v9332_v7, 1.0  ;;  %v8423_v31 = vpack.c.bf16 %v2340_v14, %v2339_v2  ;;  %v2344_v0 = vld [vmem:[#allocation5 + $0x228] sm:$0xff]  ;;  %v2345_v2 = vld [vmem:[#allocation5 + $0x230] sm:$0xff]  ;;  %v2346_v14 = vld [vmem:[#allocation5 + $0x238] sm:$0xff] }
 0x555   :  { %6625 = vmatprep.subr.bf16.mxu0 %v8347_v59  ;;  %6611 = vmatprep.subr.bf16.mxu1 %v9258_v63  ;;  %v8438_v24 = vpack.c.bf16 %v2344_v0, %v2343_v32  ;;  %v8444_v40 = vpack.c.bf16 %v2346_v14, %v2345_v2  ;;  %v8450_v32 = vpack.c.bf16 %v2348_v36, %v2347_v34  ;;  %v2365_v0 = vld [vmem:[#allocation5 + $0x2d0] sm:$0xff]  ;;  %v2350_v14 = vld [vmem:[#allocation5 + $0x258] sm:$0xff]  ;;  %v2351_v36 = vld [vmem:[#allocation5 + $0x260] sm:$0xff] }
 0x556   :  { %v8454_v6 = vpack.c.bf16 %v2366_v44, %v2365_v0  ;;  %v2349_v2 = vld [vmem:[#allocation5 + $0x250] sm:$0xff]  ;;  %v8460_v34 = vpack.c.bf16 %v2368_v16, %v2367_v10  ;;  %v8462_v33 = vpack.c.bf16 %v2352_v21, %v2351_v36  ;;  %v2370_v44 = vld [vmem:[#allocation5 + $0x2f8] sm:$0xff]  ;;  %v9337_v21 = vld [vmem:[#allocation36_spill] sm:$0xff] }
 0x557   :  { %v8456_v54 = vpack.c.bf16 %v2350_v14, %v2349_v2  ;;  %v2369_v0 = vld [vmem:[#allocation5 + $0x2f0] sm:$0xff] }
 0x558   :  { %6627 = vmatpush3.bf16.msra.mxu0 %v8350_v18  ;;  %6613 = vmatpush3.bf16.msra.mxu1 %v8386_v46  ;;  %v8466_v2 = vpack.c.bf16 %v2370_v44, %v2369_v0  ;;  %v2353_v14 = vld [vmem:[#allocation5 + $0x270] sm:$0xff] }
 0x559   :  { %6629 = vmatprep.subr.bf16.mxu0 %v8353_v1  ;;  %6614 = vmatprep.subr.bf16.mxu1 %v9258_v63  ;;  %v8468_v7 = vpack.c.bf16 %v2354_v57, %v2353_v14 }
 0x55a   :  { %9335 = vst [vmem:[#allocation53_spill] sm:$0xff] %v8466_v2 }
 0x55b   :  { %9336 = vst [vmem:[#allocation54_spill] sm:$0xff] %v8468_v7 }
 0x55c   :  { %6631 = vmatpush3.bf16.msra.mxu0 %v8360_v45  ;;  %6616 = vmatpush3.bf16.msra.mxu1 %v8396_v11 }
 0x55d   :  { %6633 = vmatprep.subr.bf16.mxu0 %v8363_v62  ;;  %6617 = vmatprep.subr.bf16.mxu1 %v9258_v63 }
 0x560   :  { %6635 = vmatpush3.bf16.msra.mxu0 %v8370_v22  ;;  %6619 = vmatpush3.bf16.msra.mxu1 %v8406_v47 }
 0x561   :  { %6637 = vmatprep.subr.bf16.mxu0 %v8378_v15  ;;  %6653 = vmatprep.subr.bf16.mxu1 %v8414_v8 }
 0x564   :  { %6639 = vmatpush3.bf16.msra.mxu0 %v8381_v30 }
 0x565   :  { %6641 = vmatprep.subr.bf16.mxu0 %v8388_v53 }
 0x568   :  { %6643 = vmatpush3.bf16.msra.mxu0 %v8391_v26 }
 0x569   :  { %6645 = vmatprep.subr.bf16.mxu0 %v8398_v38 }
 0x56c   :  { %6647 = vmatpush3.bf16.msra.mxu0 %v8401_v51 }
 0x56d   :  { %6649 = vmatprep.subr.bf16.mxu0 %v8408_v56 }
 0x570   :  { %6651 = vmatpush3.bf16.msra.mxu0 %v8411_v58 }
 0x571   :  { %6685 = vmatprep.subr.bf16.mxu0 %v8418_v5 }
 0x573   :  { %4493 = vmatmul.mubr.msk.f32.vlgmr.msra.gmra.mrb[18].mxu0 %vm9333_vm5, %v9262_v41 }
 0x574   :  { %4496 = vmatprep.mubr.msk.f32.mxu0 %vm2228_vm15, %v9262_v41  ;;  %6687 = vmatpush3.bf16.msra.mxu0 %v8423_v31  ;;  %vm9338_vm15 = vcmp.gt.f32.partialorder %v9337_v21, 1.0 }
 0x575   :  { %6689 = vmatprep.subr.bf16.mxu0 %v8430_v35 }
 0x578   :  { %6691 = vmatpush3.bf16.msra.mxu0 %v8432_v19 }
 0x579   :  { %6693 = vmatprep.subr.bf16.mxu0 %v8436_v48 }
 0x57c   :  { %6695 = vmatpush3.bf16.msra.mxu0 %v8438_v24 }
 0x57d   :  { %6697 = vmatprep.subr.bf16.mxu0 %v8442_v60 }
 0x580   :  { %6699 = vmatpush3.bf16.msra.mxu0 %v8444_v40 }
 0x581   :  { %6701 = vmatprep.subr.bf16.mxu0 %v8448_v28 }
 0x584   :  { %6703 = vmatpush3.bf16.msra.mxu0 %v8450_v32 }
 0x585   :  { %6705 = vmatprep.subr.bf16.mxu0 %v8454_v6 }
 0x588   :  { %6707 = vmatpush3.bf16.msra.mxu0 %v8456_v54 }
 0x589   :  { %6709 = vmatprep.subr.bf16.mxu0 %v8460_v34 }
 0x58c   :  { %6711 = vmatpush3.bf16.msra.mxu0 %v8462_v33 }
 0x58d   :  { %6713 = vmatprep.subr.bf16.mxu0 %v8466_v2 }
 0x590   :  { %6715 = vmatpush3.bf16.msra.mxu0 %v8468_v7  ;;  %v2308_v7 = vld [vmem:[#allocation5 + $0x108] sm:$0xff] }
 0x591   :  { %6740 = vmatprep.subr.bf16.mxu0 %v9258_v63 }
 0x593   :  { %4497 = vmatmul.mubr.msk.f32.vlgmr.msra.gmra.mrb[20].mxu0 %vm9338_vm15, %v9262_v41 }
 0x594   :  { %5868 = vmatprep.mubr.msk.f32.mxu0 %vm7335_vm4, %v9266_v52 }
 0x5dd   :  { %v1972_v10 = vpop.xlane.xlu1 %1971 }
 0x5de   :  { %v1973_v16 = vrot.slane %v1972_v10, 4 }
 0x5e0   :  { %v1974_v36 = vadd.f32 %v1973_v16, %v1972_v10  ;;  %v2325_v10 = vld [vmem:[#allocation5 + $0x190] sm:$0xff]  ;;  %v2326_v16 = vld [vmem:[#allocation5 + $0x198] sm:$0xff] }
 0x5e2   :  { %v1975_v0 = vrot.slane %v1974_v36, 2 }
 0x5e4   :  { %v1976_v44 = vadd.f32 %v1975_v0, %v1974_v36  ;;  %v4458_v36 = vsel %vm1367_vm12, 1.0, %v9266_v52 }
 0x5e6   :  { %v1977_v57 = vrot.slane %v1976_v44, 1 }
 0x5e8   :  { %v1978_v14 = vadd.f32 %v1977_v57, %v1976_v44  ;;  %v8490_v44 = vpack.c.bf16 %v2308_v7, %v2307_v23  ;;  %v8492_v57 = vpack.c.bf16 %v2326_v16, %v2325_v10  ;;  %v2311_v10 = vld [vmem:[#allocation5 + $0x120] sm:$0xff]  ;;  %v2312_v16 = vld [vmem:[#allocation5 + $0x128] sm:$0xff] }
 0x5ea   :  { %7138 = vpush %v1978_v14  ;;  %9340 = vst [vmem:[#allocation58_spill] sm:$0xff] %v8490_v44  ;;  %v2309_v14 = vld [vmem:[#allocation5 + $0x110] sm:$0xff] }
 0x5eb   :  { %9341 = vst [vmem:[#allocation59_spill] sm:$0xff] %v8492_v57 }
 0x624   :  { %v2071_v20 = vpop.f32.mrb[16].mxu0 }
 0x625   :  { %v2072_v21 = vadd.f32 %v8481_v27, %v2071_v20  ;;  %v5765_v29 = vpop.f32.mrb[17].mxu0  ;;  %v2310_v20 = vld [vmem:[#allocation5 + $0x118] sm:$0xff] }
 0x626   :  { %v2327_v29 = vld [vmem:[#allocation5 + $0x1a0] sm:$0xff]  ;;  %v8502_v23 = vpack.c.bf16 %v2310_v20, %v2309_v14  ;;  %v2313_v20 = vld [vmem:[#allocation5 + $0x130] sm:$0xff] }
 0x627   :  { %v2076_v2 = vadd.f32 %v2075_v25, %v2072_v21  ;;  %v2328_v25 = vld [vmem:[#allocation5 + $0x1a8] sm:$0xff] }
 0x628   :  { %9342 = vst [vmem:[#allocation60_spill] sm:$0xff] %v8502_v23 }
 0x629   :  { %v8488_v0 = vsub.f32 %v2076_v2, %v4458_v36  ;;  %v8511_v2 = vpack.c.bf16 %v2328_v25, %v2327_v29  ;;  %v2329_v36 = vld [vmem:[#allocation5 + $0x1b0] sm:$0xff]  ;;  %v8520_v29 = vpack.c.bf16 %v2314_v61, %v2313_v20  ;;  %v2335_v61 = vld [vmem:[#allocation5 + $0x1e0] sm:$0xff]  ;;  %v2336_v20 = vld [vmem:[#allocation5 + $0x1e8] sm:$0xff] }
 0x62b   :  { %9339 = vst [vmem:[#allocation55_spill] sm:$0xff] %v8488_v0  ;;  %2083 = vadd.xlane.f32.xlu0 %v8488_v0  ;;  %vm2078_vm9 = vcmp.gt.f32.partialorder %v8488_v0, 1.0  ;;  %v2081_v21 = vmul.f32 %v8488_v0, %v8488_v0  ;;  %9345 = vst [vmem:[#allocation61_spill] sm:$0xff] %v8511_v2  ;;  %v2330_v0 = vld [vmem:[#allocation5 + $0x1b8] sm:$0xff] }
 0x62c   :  { %5799 = vmatmul.mubr.msk.f32.vlgmr.msra.gmra.mrb[16].mxu1 %vm2078_vm9, %v9262_v41  ;;  %v8517_v14 = vpack.c.bf16 %v2330_v0, %v2329_v36  ;;  %9348 = vst [vmem:[#allocation64_spill] sm:$0xff] %v8520_v29 }
 0x62d   :  { %6655 = vmatpush3.bf16.msra.mxu1 %v8490_v44  ;;  %4494 = vmatprep.mubr.msk.f32.mxu1 %vm9344_vm10, %v9262_v41  ;;  %v8508_v7 = vadd.f32 %v2081_v21, %v8258_v4  ;;  %v8514_v44 = vpack.c.bf16 %v2312_v16, %v2311_v10  ;;  %v2331_v4 = vld [vmem:[#allocation5 + $0x1c0] sm:$0xff]  ;;  %v2332_v21 = vld [vmem:[#allocation5 + $0x1c8] sm:$0xff]  ;;  %v2333_v10 = vld [vmem:[#allocation5 + $0x1d0] sm:$0xff] }
 0x62e   :  { %6657 = vmatprep.subr.bf16.mxu1 %v8492_v57  ;;  %9347 = vst [vmem:[#allocation63_spill] sm:$0xff] %v8517_v14  ;;  %v8523_v25 = vpack.c.bf16 %v2332_v21, %v2331_v4  ;;  %v2315_v57 = vld [vmem:[#allocation5 + $0x140] sm:$0xff]  ;;  %v2334_v16 = vld [vmem:[#allocation5 + $0x1d8] sm:$0xff]  ;;  %v8535_v21 = vpack.c.bf16 %v2336_v20, %v2335_v61  ;;  %v2372_v61 = vld [vmem:[#allocation5 + $0x308] sm:$0xff] }
 0x62f   :  { %9346 = vst [vmem:[#allocation62_spill] sm:$0xff] %v8514_v44  ;;  %v8529_v36 = vpack.c.bf16 %v2334_v16, %v2333_v10 }
 0x630   :  { %9349 = vst [vmem:[#allocation65_spill] sm:$0xff] %v8523_v25 }
 0x631   :  { %6659 = vmatpush3.bf16.msra.mxu1 %v8502_v23  ;;  %v2316_v23 = vld [vmem:[#allocation5 + $0x148] sm:$0xff] }
 0x632   :  { %6661 = vmatprep.subr.bf16.mxu1 %v8511_v2  ;;  %v8526_v0 = vpack.c.bf16 %v2316_v23, %v2315_v57  ;;  %v2317_v2 = vld [vmem:[#allocation5 + $0x150] sm:$0xff]  ;;  %v2338_v23 = vld [vmem:[#allocation5 + $0x1f8] sm:$0xff] }
 0x633   :  { %v2337_v57 = vld [vmem:[#allocation5 + $0x1f0] sm:$0xff] }
 0x634   :  { %9350 = vst [vmem:[#allocation66_spill] sm:$0xff] %v8526_v0  ;;  %v8541_v16 = vpack.c.bf16 %v2338_v23, %v2337_v57  ;;  %v9353_v57 = vld [vmem:[#allocation35_spill] sm:$0xff]  ;;  %v2376_v23 = vld [vmem:[#allocation5 + $0x328] sm:$0xff] }
 0x635   :  { %6663 = vmatpush3.bf16.msra.mxu1 %v8514_v44  ;;  %v2318_v44 = vld [vmem:[#allocation5 + $0x158] sm:$0xff]  ;;  %vm9354_vm11 = vcmp.gt.f32.partialorder %v9353_v57, 1.0 }
 0x636   :  { %6665 = vmatprep.subr.bf16.mxu1 %v8517_v14  ;;  %v8532_v4 = vpack.c.bf16 %v2318_v44, %v2317_v2  ;;  %v2319_v14 = vld [vmem:[#allocation5 + $0x160] sm:$0xff]  ;;  %v2378_v57 = vld [vmem:[#allocation5 + $0x338] sm:$0xff] }
 0x637   :  { %v2371_v2 = vld [vmem:[#allocation5 + $0x300] sm:$0xff] }
 0x638   :  { %v8548_v20 = vpack.c.bf16 %v2372_v61, %v2371_v2  ;;  %v2377_v61 = vld [vmem:[#allocation5 + $0x330] sm:$0xff] }
 0x639   :  { %6667 = vmatpush3.bf16.msra.mxu1 %v8520_v29  ;;  %v2320_v29 = vld [vmem:[#allocation5 + $0x168] sm:$0xff] }
 0x63a   :  { %6669 = vmatprep.subr.bf16.mxu1 %v8523_v25  ;;  %v8538_v10 = vpack.c.bf16 %v2320_v29, %v2319_v14  ;;  %v2321_v25 = vld [vmem:[#allocation5 + $0x170] sm:$0xff]  ;;  %9352 = vst [vmem:[#allocation68_spill] sm:$0xff] %v8548_v20  ;;  %v2374_v29 = vld [vmem:[#allocation5 + $0x318] sm:$0xff] }
 0x63b   :  { %v2373_v14 = vld [vmem:[#allocation5 + $0x310] sm:$0xff] }
 0x63d   :  { %6671 = vmatpush3.bf16.msra.mxu1 %v8526_v0  ;;  %v2322_v0 = vld [vmem:[#allocation5 + $0x178] sm:$0xff] }
 0x63e   :  { %6673 = vmatprep.subr.bf16.mxu1 %v8529_v36  ;;  %v8544_v44 = vpack.c.bf16 %v2322_v0, %v2321_v25  ;;  %v8555_v25 = vpack.c.bf16 %v2374_v29, %v2373_v14  ;;  %v2375_v0 = vld [vmem:[#allocation5 + $0x320] sm:$0xff]  ;;  %v2380_v29 = vld [vmem:[#allocation5 + $0x348] sm:$0xff] }
 0x63f   :  { %v8561_v2 = vpack.c.bf16 %v2376_v23, %v2375_v0  ;;  %v2379_v14 = vld [vmem:[#allocation5 + $0x340] sm:$0xff]  ;;  %v2381_v0 = vld [vmem:[#allocation5 + $0x350] sm:$0xff]  ;;  %v2382_v23 = vld [vmem:[#allocation5 + $0x358] sm:$0xff] }
 0x640   :  { %9351 = vst [vmem:[#allocation67_spill] sm:$0xff] %v8544_v44  ;;  %9355 = vst [vmem:[#allocation69_spill] sm:$0xff] %v8555_v25 }
 0x641   :  { %6675 = vmatpush3.bf16.msra.mxu1 %v8532_v4  ;;  %9356 = vst [vmem:[#allocation70_spill] sm:$0xff] %v8561_v2 }
 0x642   :  { %6677 = vmatprep.subr.bf16.mxu1 %v8535_v21 }
 0x645   :  { %6679 = vmatpush3.bf16.msra.mxu1 %v8538_v10 }
 0x646   :  { %6681 = vmatprep.subr.bf16.mxu1 %v8541_v16 }
 0x649   :  { %6683 = vmatpush3.bf16.msra.mxu1 %v8544_v44  ;;  %v8569_v44 = vpack.c.bf16 %v2380_v29, %v2379_v14  ;;  %v2385_v14 = vld [vmem:[#allocation5 + $0x370] sm:$0xff]  ;;  %v2386_v29 = vld [vmem:[#allocation5 + $0x378] sm:$0xff] }
 0x64a   :  { %6716 = vmatprep.subr.bf16.mxu1 %v9258_v63 }
 0x64b   :  { %9358 = vst [vmem:[#allocation72_spill] sm:$0xff] %v8569_v44 }
 0x64c   :  { %4495 = vmatmul.mubr.msk.f32.vlgmr.msra.gmra.mrb[18].mxu1 %vm9354_vm11, %v9262_v41 }
 0x64d   :  { %6718 = vmatpush3.bf16.msra.mxu1 %v8548_v20  ;;  %5833 = vmatprep.mubr.msk.f32.mxu1 %vm7335_vm4, %v9266_v52  ;;  %v8565_v20 = vpack.c.bf16 %v2378_v57, %v2377_v61  ;;  %v2383_v57 = vld [vmem:[#allocation5 + $0x360] sm:$0xff]  ;;  %v2384_v61 = vld [vmem:[#allocation5 + $0x368] sm:$0xff] }
 0x64e   :  { %6719 = vmatprep.subr.bf16.mxu1 %v9258_v63 }
 0x64f   :  { %9357 = vst [vmem:[#allocation71_spill] sm:$0xff] %v8565_v20 }
 0x651   :  { %6721 = vmatpush3.bf16.msra.mxu1 %v8555_v25  ;;  %v8573_v25 = vpack.c.bf16 %v2382_v23, %v2381_v0  ;;  %v9362_v0 = vld [vmem:[#allocation38_spill] sm:$0xff] }
 0x652   :  { %6722 = vmatprep.subr.bf16.mxu1 %v9258_v63  ;;  %vm9363_vm12 = vcmp.gt.f32.partialorder %v9362_v0, 1.0 }
 0x653   :  { %9359 = vst [vmem:[#allocation73_spill] sm:$0xff] %v8573_v25 }
 0x655   :  { %6724 = vmatpush3.bf16.msra.mxu1 %v8561_v2  ;;  %v8577_v2 = vpack.c.bf16 %v2384_v61, %v2383_v57  ;;  %v2693_v57 = vld [vmem:[#allocation7] sm:$0xff]  ;;  %v2694_v61 = vld [vmem:[#allocation7 + $0x8] sm:$0xff] }
 0x656   :  { %6725 = vmatprep.subr.bf16.mxu1 %v9258_v63 }
 0x657   :  { %9360 = vst [vmem:[#allocation74_spill] sm:$0xff] %v8577_v2 }
 0x659   :  { %6727 = vmatpush3.bf16.msra.mxu1 %v8565_v20  ;;  %v8581_v20 = vpack.c.bf16 %v2386_v29, %v2385_v14  ;;  %v8609_v14 = vpack.c.bf16 %v2694_v61, %v2693_v57  ;;  %v2696_v29 = vld [vmem:[#allocation7 + $0x18] sm:$0xff]  ;;  %v2701_v57 = vld [vmem:[#allocation7 + $0x40] sm:$0xff]  ;;  %v2702_v61 = vld [vmem:[#allocation7 + $0x48] sm:$0xff] }
 0x65a   :  { %6728 = vmatprep.subr.bf16.mxu1 %v9258_v63 }
 0x65b   :  { %9361 = vst [vmem:[#allocation75_spill] sm:$0xff] %v8581_v20  ;;  %6742 = vmatpush3.bf16.msra.mxu0 %v8609_v14 }
 0x65c   :  { %6743 = vmatprep.subr.bf16.mxu0 %v9258_v63 }
 0x65d   :  { %6730 = vmatpush3.bf16.msra.mxu1 %v8569_v44 }
 0x65e   :  { %6731 = vmatprep.subr.bf16.mxu1 %v9258_v63 }
 0x661   :  { %6733 = vmatpush3.bf16.msra.mxu1 %v8573_v25 }
 0x662   :  { %6734 = vmatprep.subr.bf16.mxu1 %v9258_v63 }
 0x665   :  { %6736 = vmatpush3.bf16.msra.mxu1 %v8577_v2 }
 0x666   :  { %6737 = vmatprep.subr.bf16.mxu1 %v9258_v63 }
 0x669   :  { %6739 = vmatpush3.bf16.msra.mxu1 %v8581_v20 }
 0x66a   :  { %6764 = vmatprep.subr.bf16.mxu1 %v9258_v63 }
 0x66c   :  { %5834 = vmatmul.mubr.msk.f32.vlgmr.msra.gmra.mrb[20].mxu1 %vm9363_vm12, %v9262_v41 }
 0x66d   :  { %6766 = vmatpush3.bf16.msra.mxu1 %v8336_v39  ;;  %5903 = vmatprep.mubr.msk.f32.mxu1 %vm7335_vm4, %v9266_v52  ;;  %v5050_v39 = vpop.f32.mrb[18].mxu0 }
 0x66e   :  { %6767 = vmatprep.subr.bf16.mxu1 %v9258_v63 }
 0x671   :  { %6769 = vmatpush3.bf16.msra.mxu1 %v8343_v3  ;;  %v5051_v3 = vpop.f32.mrb[19].mxu0 }
 0x672   :  { %6770 = vmatprep.subr.bf16.mxu1 %v9258_v63  ;;  %v8604_v23 = vadd.f32 %v5051_v3, %v5050_v39  ;;  %v2697_v39 = vld [vmem:[#allocation7 + $0x20] sm:$0xff]  ;;  %v2698_v3 = vld [vmem:[#allocation7 + $0x28] sm:$0xff] }
 0x675   :  { %6772 = vmatpush3.bf16.msra.mxu1 %v8356_v42  ;;  %v5120_v42 = vpop.f32.mrb[20].mxu0 }
 0x676   :  { %6773 = vmatprep.subr.bf16.mxu1 %v9258_v63 }
 0x679   :  { %6775 = vmatpush3.bf16.msra.mxu1 %v8366_v55  ;;  %v5121_v55 = vpop.f32.mrb[21].mxu0 }
 0x67a   :  { %6776 = vmatprep.subr.bf16.mxu1 %v9258_v63 }
 0x67d   :  { %6778 = vmatpush3.bf16.msra.mxu1 %v8376_v9  ;;  %v5122_v9 = vadd.f32 %v5121_v55, %v5120_v42  ;;  %v2700_v42 = vld [vmem:[#allocation7 + $0x38] sm:$0xff] }
 0x67e   :  { %6779 = vmatprep.subr.bf16.mxu1 %v9258_v63 }
 0x681   :  { %6781 = vmatpush3.bf16.msra.mxu1 %v8386_v46  ;;  %v2695_v46 = vld [vmem:[#allocation7 + $0x10] sm:$0xff] }
 0x682   :  { %6782 = vmatprep.subr.bf16.mxu1 %v9258_v63 }
 0x685   :  { %6784 = vmatpush3.bf16.msra.mxu1 %v8396_v11  ;;  %v8612_v11 = vpack.c.bf16 %v2696_v29, %v2695_v46  ;;  %v8624_v46 = vpack.c.bf16 %v2702_v61, %v2701_v57  ;;  %v2703_v29 = vld [vmem:[#allocation7 + $0x50] sm:$0xff]  ;;  %v2705_v57 = vld [vmem:[#allocation7 + $0x60] sm:$0xff]  ;;  %v2706_v61 = vld [vmem:[#allocation7 + $0x68] sm:$0xff] }
 0x686   :  { %6785 = vmatprep.subr.bf16.mxu1 %v9258_v63  ;;  %v8633_v2 = vpack.c.bf16 %v2706_v61, %v2705_v57 }
 0x687   :  { %6745 = vmatpush3.bf16.msra.mxu0 %v8612_v11 }
 0x688   :  { %6746 = vmatprep.subr.bf16.mxu0 %v9258_v63 }
 0x689   :  { %6787 = vmatpush3.bf16.msra.mxu1 %v8406_v47  ;;  %v8616_v47 = vpack.c.bf16 %v2698_v3, %v2697_v39  ;;  %v2704_v39 = vld [vmem:[#allocation7 + $0x58] sm:$0xff] }
 0x68a   :  { %6821 = vmatprep.subr.bf16.mxu1 %v8414_v8  ;;  %v2699_v8 = vld [vmem:[#allocation7 + $0x30] sm:$0xff]  ;;  %v8628_v3 = vpack.c.bf16 %v2704_v39, %v2703_v29  ;;  %v8642_v39 = vld [vmem:[%s9085_s6] ss:$0 sm:$0xff] }
 0x68b   :  { %6748 = vmatpush3.bf16.msra.mxu0 %v8616_v47  ;;  %v8620_v55 = vpack.c.bf16 %v2700_v42, %v2699_v8  ;;  %9364 = vst [vmem:[#allocation76_spill] sm:$0xff] %v8642_v39 }
 0x68c   :  { %6749 = vmatprep.subr.bf16.mxu0 %v9258_v63 }
 0x68f   :  { %6751 = vmatpush3.bf16.msra.mxu0 %v8620_v55 }
 0x690   :  { %6752 = vmatprep.subr.bf16.mxu0 %v9258_v63 }
 0x693   :  { %6754 = vmatpush3.bf16.msra.mxu0 %v8624_v46 }
 0x694   :  { %6755 = vmatprep.subr.bf16.mxu0 %v9258_v63 }
 0x697   :  { %6757 = vmatpush3.bf16.msra.mxu0 %v8628_v3 }
 0x698   :  { %6758 = vmatprep.subr.bf16.mxu0 %v9258_v63 }
 0x69b   :  { %6760 = vmatpush3.bf16.msra.mxu0 %v8633_v2 }
 0x69c   :  { %6761 = vmatprep.subr.bf16.mxu0 %v9258_v63 }
 0x69f   :  { %6763 = vmatpush3.bf16.msra.mxu0 %v8301_v17 }
 0x6a0   :  { %6789 = vmatprep.subr.bf16.mxu0 %v8338_v37  ;;  %v8657_v37 = vld [vmem:[%s9081_s2] ss:$0 sm:$0xff] }
 0x6b8   :  { %v2084_v8 = vpop.xlane.xlu0 %2083 }
 0x6b9   :  { %v2085_v42 = vrot.slane %v2084_v8, 4 }
 0x6bb   :  { %v2086_v0 = vadd.f32 %v2085_v42, %v2084_v8 }
 0x6bd   :  { %v2087_v20 = vrot.slane %v2086_v0, 2 }
 0x6bf   :  { %v2088_v25 = vadd.f32 %v2087_v20, %v2086_v0  ;;  %v2187_v20 = vmul.f32 0.9, %v8307_v43  ;;  %v2461_v43 = vadd.f32 %v8604_v23, %v8657_v37 }
 0x6c1   :  { %v2089_v44 = vrot.slane %v2088_v25, 1 }
 0x6c3   :  { %v2090_v29 = vadd.f32 %v2089_v44, %v2088_v25 }
 0x6c5   :  { %7140 = vpush %v2090_v29 }
 0x6ff   :  { %v2183_v8 = vpop.f32.mrb[16].mxu1 }
 0x700   :  { %v2184_v42 = vadd.f32 %v8642_v39, %v2183_v8  ;;  %v5800_v0 = vpop.f32.mrb[17].mxu1 }
 0x701   :  { %v2674_v0 = vmul.f32 0.9, %v8319_v13 }
 0x702   :  { %v2188_v57 = vadd.f32 %v2187_v20, %v2184_v42 }
 0x704   :  { %v8647_v61 = vsub.f32 %v2188_v57, %v8311_v12 }
 0x706   :  { %9365 = vst [vmem:[#allocation77_spill] sm:$0xff] %v8647_v61  ;;  %vm2190_vm13 = vcmp.gt.f32.partialorder %v8647_v61, 1.0 }
 0x707   :  { %v8651_v17 = vsel %vm2190_vm13, 1.0, %v9266_v52 }
 0x708   :  { %9366 = vst [vmem:[#allocation78_spill] sm:$0xff] %v8651_v17  ;;  %2194 = vst [vmem:[#allocation10 + $0x10] sm:$0xff] %v8651_v17  ;;  %v4477_v17 = vsel %vm1966_vm2, 1.0, %v9266_v52 }
 0x71f   :  { %v5085_v44 = vpop.f32.mrb[18].mxu1 }
 0x720   :  { %v5086_v25 = vpop.f32.mrb[19].mxu1 }
 0x721   :  { %v5087_v29 = vadd.f32 %v5086_v25, %v5085_v44  ;;  %v9397_v25 = vld [vmem:[#allocation74_spill] sm:$0xff] }
 0x723   :  { %v2531_v12 = vadd.f32 %v5087_v29, %v2461_v43  ;;  %v9398_v43 = vld [vmem:[#allocation75_spill] sm:$0xff]  ;;  %v9399_v29 = vld [vmem:[#allocation45_spill] sm:$0xff] }
 0x725   :  { %v2601_v8 = vadd.f32 %v5122_v9, %v2531_v12  ;;  %v9367_v9 = vld [vmem:[#allocation40_spill] sm:$0xff] }
 0x726   :  { %vm9368_vm0 = vcmp.gt.f32.partialorder %v9367_v9, 1.0 }
 0x73f   :  { %v2670_v42 = vpop.f32.mrb[20].mxu1 }
 0x740   :  { %v2671_v20 = vadd.f32 %v2670_v42, %v2601_v8  ;;  %v5835_v57 = vpop.f32.mrb[21].mxu1 }
 0x742   :  { %v2675_v61 = vadd.f32 %v2674_v0, %v2671_v20 }
 0x744   :  { %v8665_v39 = vsub.f32 %v2675_v61, %v4477_v17  ;;  %v9369_v61 = vld [vmem:[#allocation79_spill] sm:$0xff] }
 0x745   :  { %v2266_v17 = vrot.slane %v9369_v61, 4 }
 0x746   :  { %2682 = vadd.xlane.f32.xlu0 %v8665_v39  ;;  %vm2677_vm14 = vcmp.gt.f32.partialorder %v8665_v39, 1.0  ;;  %v2680_v23 = vmul.f32 %v8665_v39, %v8665_v39 }
 0x747   :  { %5869 = vmatmul.mubr.msk.f32.vlgmr.msra.gmra.mrb[22].mxu0 %vm2677_vm14, %v9262_v41  ;;  %v2267_v44 = vadd.f32 %v2266_v17, %v9369_v61 }
 0x748   :  { %6791 = vmatpush3.bf16.msra.mxu0 %v8340_v50  ;;  %4514 = vmatprep.mubr.msk.f32.mxu0 %vm9368_vm0, %v9262_v41  ;;  %v8679_v13 = vadd.f32 %v2680_v23, %v8332_v49 }
 0x749   :  { %6793 = vmatprep.subr.bf16.mxu0 %v8347_v59  ;;  %v2268_v50 = vrot.slane %v2267_v44, 2 }
 0x74b   :  { %v2269_v49 = vadd.f32 %v2268_v50, %v2267_v44 }
 0x74c   :  { %6795 = vmatpush3.bf16.msra.mxu0 %v8350_v18 }
 0x74d   :  { %6797 = vmatprep.subr.bf16.mxu0 %v8353_v1  ;;  %v2270_v59 = vrot.slane %v2269_v49, 1  ;;  %v9370_v1 = vld [vmem:[#allocation39_spill] sm:$0xff] }
 0x74e   :  { %vm9371_vm1 = vcmp.gt.f32.partialorder %v9370_v1, 1.0 }
 0x74f   :  { %v2271_v18 = vadd.f32 %v2270_v59, %v2269_v49  ;;  %v3418_v59 = vld [vmem:[#allocation7 + $0x70] sm:$0xff] }
 0x750   :  { %6799 = vmatpush3.bf16.msra.mxu0 %v8360_v45  ;;  %v9372_v45 = vld [vmem:[#allocation44_spill] sm:$0xff] }
 0x751   :  { %6801 = vmatprep.subr.bf16.mxu0 %v8363_v62  ;;  %7142 = vpush %v2271_v18  ;;  %v9373_v62 = vld [vmem:[#allocation53_spill] sm:$0xff]  ;;  %v3419_v18 = vld [vmem:[#allocation7 + $0x78] sm:$0xff] }
 0x754   :  { %6803 = vmatpush3.bf16.msra.mxu0 %v8370_v22  ;;  %v9374_v22 = vld [vmem:[#allocation54_spill] sm:$0xff] }
 0x755   :  { %6805 = vmatprep.subr.bf16.mxu0 %v8378_v15  ;;  %v9375_v15 = vld [vmem:[#allocation43_spill] sm:$0xff] }
 0x758   :  { %6807 = vmatpush3.bf16.msra.mxu0 %v8381_v30 }
 0x759   :  { %6809 = vmatprep.subr.bf16.mxu0 %v8388_v53 }
 0x75c   :  { %6811 = vmatpush3.bf16.msra.mxu0 %v8391_v26 }
 0x75d   :  { %6813 = vmatprep.subr.bf16.mxu0 %v8398_v38 }
 0x760   :  { %6815 = vmatpush3.bf16.msra.mxu0 %v8401_v51 }
 0x761   :  { %6817 = vmatprep.subr.bf16.mxu0 %v8408_v56 }
 0x764   :  { %6819 = vmatpush3.bf16.msra.mxu0 %v8411_v58 }
 0x765   :  { %6853 = vmatprep.subr.bf16.mxu0 %v8418_v5 }
 0x767   :  { %4515 = vmatmul.mubr.msk.f32.vlgmr.msra.gmra.mrb[24].mxu0 %vm9371_vm1, %v9262_v41 }
 0x768   :  { %6855 = vmatpush3.bf16.msra.mxu0 %v8423_v31  ;;  %4518 = vmatprep.mubr.msk.f32.mxu0 %vm2939_vm8, %v9262_v41  ;;  %v9376_v31 = vld [vmem:[#allocation55_spill] sm:$0xff] }
 0x769   :  { %6857 = vmatprep.subr.bf16.mxu0 %v8430_v35 }
 0x76c   :  { %6859 = vmatpush3.bf16.msra.mxu0 %v8432_v19 }
 0x76d   :  { %6861 = vmatprep.subr.bf16.mxu0 %v8436_v48  ;;  %v4480_v48 = vsel %vm2078_vm9, 1.0, %v9266_v52 }
 0x770   :  { %6863 = vmatpush3.bf16.msra.mxu0 %v8438_v24 }
 0x771   :  { %6865 = vmatprep.subr.bf16.mxu0 %v8442_v60 }
 0x774   :  { %6867 = vmatpush3.bf16.msra.mxu0 %v8444_v40  ;;  %v9378_v40 = vld [vmem:[#allocation42_spill] sm:$0xff] }
 0x775   :  { %6869 = vmatprep.subr.bf16.mxu0 %v8448_v28  ;;  %vm9379_vm8 = vcmp.gt.f32.partialorder %v9378_v40, 1.0 }
 0x778   :  { %6871 = vmatpush3.bf16.msra.mxu0 %v8450_v32  ;;  %v9380_v32 = vld [vmem:[#allocation59_spill] sm:$0xff] }
 0x779   :  { %6873 = vmatprep.subr.bf16.mxu0 %v8454_v6  ;;  %v9381_v6 = vld [vmem:[#allocation60_spill] sm:$0xff] }
 0x77c   :  { %6875 = vmatpush3.bf16.msra.mxu0 %v8456_v54  ;;  %v2786_v54 = vmul.f32 0.9, %v9376_v31 }
 0x77d   :  { %6877 = vmatprep.subr.bf16.mxu0 %v8460_v34  ;;  %v9382_v34 = vld [vmem:[#allocation61_spill] sm:$0xff] }
 0x780   :  { %6879 = vmatpush3.bf16.msra.mxu0 %v8462_v33 }
 0x781   :  { %6881 = vmatprep.subr.bf16.mxu0 %v9373_v62  ;;  %v8801_v62 = vpack.c.bf16 %v3419_v18, %v3418_v59  ;;  %v3520_v18 = vld [vmem:[#allocation8 + $0x20] sm:$0xff] }
 0x784   :  { %6883 = vmatpush3.bf16.msra.mxu0 %v9374_v22 }
 0x785   :  { %6908 = vmatprep.subr.bf16.mxu0 %v9258_v63 }
 0x787   :  { %4519 = vmatmul.mubr.msk.f32.vlgmr.msra.gmra.mrb[26].mxu0 %vm2938_vm7, %v9262_v41 }
 0x788   :  { %6910 = vmatpush3.bf16.msra.mxu0 %v8609_v14  ;;  %5973 = vmatprep.mubr.msk.f32.mxu0 %vm7335_vm4, %v9266_v52  ;;  %v9384_v14 = vld [vmem:[#allocation63_spill] sm:$0xff] }
 0x789   :  { %6911 = vmatprep.subr.bf16.mxu0 %v9258_v63 }
 0x78c   :  { %6913 = vmatpush3.bf16.msra.mxu0 %v8612_v11  ;;  %v9385_v11 = vld [vmem:[#allocation64_spill] sm:$0xff] }
 0x78d   :  { %6914 = vmatprep.subr.bf16.mxu0 %v9258_v63 }
 0x790   :  { %6916 = vmatpush3.bf16.msra.mxu0 %v8616_v47  ;;  %v9386_v47 = vld [vmem:[#allocation65_spill] sm:$0xff] }
 0x791   :  { %6917 = vmatprep.subr.bf16.mxu0 %v9258_v63 }
 0x794   :  { %6919 = vmatpush3.bf16.msra.mxu0 %v8620_v55  ;;  %v9387_v55 = vld [vmem:[#allocation66_spill] sm:$0xff] }
 0x795   :  { %6920 = vmatprep.subr.bf16.mxu0 %v9258_v63 }
 0x798   :  { %6922 = vmatpush3.bf16.msra.mxu0 %v8624_v46  ;;  %v9389_v46 = vld [vmem:[#allocation41_spill] sm:$0xff] }
 0x799   :  { %6923 = vmatprep.subr.bf16.mxu0 %v9258_v63  ;;  %vm9390_vm2 = vcmp.gt.f32.partialorder %v9389_v46, 1.0 }
 0x79c   :  { %6925 = vmatpush3.bf16.msra.mxu0 %v8628_v3  ;;  %v9391_v3 = vld [vmem:[#allocation68_spill] sm:$0xff] }
 0x79d   :  { %6926 = vmatprep.subr.bf16.mxu0 %v9258_v63 }
 0x7a0   :  { %6928 = vmatpush3.bf16.msra.mxu0 %v8633_v2  ;;  %v9383_v2 = vld [vmem:[#allocation62_spill] sm:$0xff] }
 0x7a1   :  { %6929 = vmatprep.subr.bf16.mxu0 %v9258_v63 }
 0x7a4   :  { %6931 = vmatpush3.bf16.msra.mxu0 %v8801_v62 }
 0x7d3   :  { %v2683_v33 = vpop.xlane.xlu0 %2682 }
 0x7d4   :  { %v2684_v30 = vrot.slane %v2683_v33, 4 }
 0x7d6   :  { %v2685_v53 = vadd.f32 %v2684_v30, %v2683_v33  ;;  %v9400_v30 = vld [vmem:[#allocation76_spill] sm:$0xff] }
 0x7d8   :  { %v2686_v26 = vrot.slane %v2685_v53, 2 }
 0x7da   :  { %v2687_v38 = vadd.f32 %v2686_v26, %v2685_v53  ;;  %v9401_v26 = vld [vmem:[#allocation77_spill] sm:$0xff] }
 0x7dc   :  { %v2688_v51 = vrot.slane %v2687_v38, 1 }
 0x7de   :  { %v2689_v56 = vadd.f32 %v2688_v51, %v2687_v38  ;;  %v2898_v38 = vmul.f32 0.9, %v9401_v26 }
 0x7e0   :  { %7144 = vpush %v2689_v56 }
 0x81a   :  { %v2782_v58 = vpop.f32.mrb[22].mxu0 }
 0x81b   :  { %v2783_v5 = vadd.f32 %v8481_v27, %v2782_v58  ;;  %v5870_v35 = vpop.f32.mrb[23].mxu0  ;;  %v9377_v27 = vld [vmem:[#allocation58_spill] sm:$0xff] }
 0x81c   :  { %v9402_v58 = vld [vmem:[#allocation78_spill] sm:$0xff] }
 0x81d   :  { %v2787_v19 = vadd.f32 %v2786_v54, %v2783_v5 }
 0x81f   :  { %v8744_v24 = vsub.f32 %v2787_v19, %v4480_v48 }
 0x821   :  { %2794 = vadd.xlane.f32.xlu1 %v8744_v24  ;;  %vm2789_vm7 = vcmp.gt.f32.partialorder %v8744_v24, 1.0  ;;  %v2792_v60 = vmul.f32 %v8744_v24, %v8744_v24 }
 0x822   :  { %5904 = vmatmul.mubr.msk.f32.vlgmr.msra.gmra.mrb[22].mxu1 %vm2789_vm7, %v9262_v41 }
 0x823   :  { %6823 = vmatpush3.bf16.msra.mxu1 %v9377_v27  ;;  %4516 = vmatprep.mubr.msk.f32.mxu1 %vm9379_vm8, %v9262_v41  ;;  %v8758_v28 = vadd.f32 %v2792_v60, %v8508_v7  ;;  %v9388_v7 = vld [vmem:[#allocation67_spill] sm:$0xff] }
 0x824   :  { %6825 = vmatprep.subr.bf16.mxu1 %v9380_v32 }
 0x827   :  { %6827 = vmatpush3.bf16.msra.mxu1 %v9381_v6 }
 0x828   :  { %6829 = vmatprep.subr.bf16.mxu1 %v9382_v34  ;;  %v3385_v34 = vmul.f32 0.9, %v8665_v39 }
 0x82b   :  { %6831 = vmatpush3.bf16.msra.mxu1 %v9383_v2 }
 0x82c   :  { %6833 = vmatprep.subr.bf16.mxu1 %v9384_v14 }
 0x82f   :  { %6835 = vmatpush3.bf16.msra.mxu1 %v9385_v11  ;;  %v4499_v11 = vsel %vm2677_vm14, 1.0, %v9266_v52 }
 0x830   :  { %6837 = vmatprep.subr.bf16.mxu1 %v9386_v47 }
 0x833   :  { %6839 = vmatpush3.bf16.msra.mxu1 %v9387_v55 }
 0x834   :  { %6841 = vmatprep.subr.bf16.mxu1 %v8529_v36  ;;  %v9392_v36 = vld [vmem:[#allocation69_spill] sm:$0xff] }
 0x837   :  { %6843 = vmatpush3.bf16.msra.mxu1 %v8532_v4  ;;  %v9393_v4 = vld [vmem:[#allocation70_spill] sm:$0xff] }
 0x838   :  { %6845 = vmatprep.subr.bf16.mxu1 %v8535_v21  ;;  %v9394_v21 = vld [vmem:[#allocation71_spill] sm:$0xff] }
 0x83a   :  { %v5206_v12 = vpop.f32.mrb[24].mxu0 }
 0x83b   :  { %6847 = vmatpush3.bf16.msra.mxu1 %v8538_v10  ;;  %v9395_v10 = vld [vmem:[#allocation72_spill] sm:$0xff]  ;;  %v5207_v8 = vpop.f32.mrb[25].mxu0 }
 0x83c   :  { %6849 = vmatprep.subr.bf16.mxu1 %v8541_v16  ;;  %v9396_v16 = vld [vmem:[#allocation73_spill] sm:$0xff]  ;;  %v5208_v42 = vadd.f32 %v5207_v8, %v5206_v12 }
 0x83d   :  { %v3714_v8 = vld [vmem:[#allocation5 + $0x88] sm:$0xff] }
 0x83e   :  { %v3172_v19 = vadd.f32 %v5208_v42, %v8657_v37  ;;  %v3697_v42 = vld [vmem:[#allocation5] sm:$0xff] }
 0x83f   :  { %6851 = vmatpush3.bf16.msra.mxu1 %v9388_v7  ;;  %v9403_v7 = vld [vmem:[#allocation57_spill] sm:$0xff] }
 0x840   :  { %6884 = vmatprep.subr.bf16.mxu1 %v9258_v63 }
 0x842   :  { %4517 = vmatmul.mubr.msk.f32.vlgmr.msra.gmra.mrb[24].mxu1 %vm9390_vm2, %v9262_v41 }
 0x843   :  { %6886 = vmatpush3.bf16.msra.mxu1 %v9391_v3  ;;  %5938 = vmatprep.mubr.msk.f32.mxu1 %vm7335_vm4, %v9266_v52  ;;  %v2977_v3 = vrot.slane %v9403_v7, 4 }
 0x844   :  { %6887 = vmatprep.subr.bf16.mxu1 %v9258_v63 }
 0x845   :  { %v2978_v39 = vadd.f32 %v2977_v3, %v9403_v7  ;;  %v3722_v7 = vld [vmem:[#allocation5 + $0xc8] sm:$0xff] }
 0x847   :  { %6889 = vmatpush3.bf16.msra.mxu1 %v9392_v36  ;;  %v2979_v36 = vrot.slane %v2978_v39, 2 }
 0x848   :  { %6890 = vmatprep.subr.bf16.mxu1 %v9258_v63 }
 0x84b   :  { %6892 = vmatpush3.bf16.msra.mxu1 %v9393_v4  ;;  %v2980_v4 = vadd.f32 %v2979_v36, %v2978_v39  ;;  %v3705_v39 = vld [vmem:[#allocation5 + $0x40] sm:$0xff]  ;;  %v3706_v36 = vld [vmem:[#allocation5 + $0x48] sm:$0xff] }
 0x84c   :  { %6893 = vmatprep.subr.bf16.mxu1 %v9258_v63 }
 0x84f   :  { %6895 = vmatpush3.bf16.msra.mxu1 %v9394_v21  ;;  %v2981_v21 = vrot.slane %v2980_v4, 1 }
 0x850   :  { %6896 = vmatprep.subr.bf16.mxu1 %v9258_v63 }
 0x853   :  { %6898 = vmatpush3.bf16.msra.mxu1 %v9395_v10  ;;  %v2982_v10 = vadd.f32 %v2981_v21, %v2980_v4  ;;  %v6974_v4 = vpack.c.bf16 %v3706_v36, %v3705_v39  ;;  %v3526_v21 = vld [vmem:[#allocation8 + $0x50] sm:$0xff]  ;;  %v3780_v39 = vld [vmem:[#allocation5 + $0x298] sm:$0xff] }
 0x854   :  { %6899 = vmatprep.subr.bf16.mxu1 %v9258_v63 }
 0x857   :  { %6901 = vmatpush3.bf16.msra.mxu1 %v9396_v16  ;;  %v3516_v16 = vld [vmem:[#allocation8] sm:$0xff] }
 0x858   :  { %6902 = vmatprep.subr.bf16.mxu1 %v9258_v63 }
 0x85a   :  { %v5276_v20 = vpop.f32.mrb[26].mxu0 }
 0x85b   :  { %6904 = vmatpush3.bf16.msra.mxu1 %v9397_v25  ;;  %v5277_v0 = vpop.f32.mrb[27].mxu0  ;;  %v3517_v25 = vld [vmem:[#allocation8 + $0x8] sm:$0xff] }
 0x85c   :  { %6905 = vmatprep.subr.bf16.mxu1 %v9258_v63  ;;  %v5278_v57 = vadd.f32 %v5277_v0, %v5276_v20  ;;  %v8833_v12 = vpack.c.bf16 %v3517_v25, %v3516_v16  ;;  %v3698_v20 = vld [vmem:[#allocation5 + $0x8] sm:$0xff]  ;;  %v3723_v25 = vld [vmem:[#allocation5 + $0xd0] sm:$0xff] }
 0x85f   :  { %6907 = vmatpush3.bf16.msra.mxu1 %v9398_v43  ;;  %v3713_v43 = vld [vmem:[#allocation5 + $0x80] sm:$0xff] }
 0x860   :  { %6932 = vmatprep.subr.bf16.mxu1 %v9258_v63  ;;  %v6956_v0 = vpack.c.bf16 %v3714_v8, %v3713_v43  ;;  %v3724_v43 = vld [vmem:[#allocation5 + $0xd8] sm:$0xff]  ;;  %v3707_v8 = vld [vmem:[#allocation5 + $0x50] sm:$0xff] }
 0x862   :  { %5939 = vmatmul.mubr.msk.f32.vlgmr.msra.gmra.mrb[26].mxu1 %vm2940_vm6, %v9262_v41  ;;  %6957 = vmatprep.subr.bf16.mxu0 %v6956_v0 }
 0x863   :  { %6008 = vmatprep.mubr.msk.f32.mxu1 %vm7335_vm4, %v9266_v52  ;;  %6934 = vmatpush3.bf16.msra.mxu1 %v8833_v12 }
 0x864   :  { %6935 = vmatprep.subr.bf16.mxu1 %v9258_v63 }
 0x8ae   :  { %v2795_v23 = vpop.xlane.xlu1 %2794 }
 0x8af   :  { %v2796_v61 = vrot.slane %v2795_v23, 4 }
 0x8b1   :  { %v2797_v17 = vadd.f32 %v2796_v61, %v2795_v23  ;;  %v3519_v23 = vld [vmem:[#allocation8 + $0x18] sm:$0xff]  ;;  %v3715_v61 = vld [vmem:[#allocation5 + $0x90] sm:$0xff] }
 0x8b3   :  { %v2798_v44 = vrot.slane %v2797_v17, 2 }
 0x8b5   :  { %v2799_v50 = vadd.f32 %v2798_v44, %v2797_v17  ;;  %v3716_v44 = vld [vmem:[#allocation5 + $0x98] sm:$0xff] }
 0x8b6   :  { %v6960_v59 = vpack.c.bf16 %v3716_v44, %v3715_v61  ;;  %v3725_v61 = vld [vmem:[#allocation5 + $0xe0] sm:$0xff]  ;;  %v3726_v44 = vld [vmem:[#allocation5 + $0xe8] sm:$0xff] }
 0x8b7   :  { %v2800_v49 = vrot.slane %v2799_v50, 1 }
 0x8b9   :  { %v2801_v22 = vadd.f32 %v2800_v49, %v2799_v50  ;;  %v3699_v50 = vld [vmem:[#allocation5 + $0x10] sm:$0xff]  ;;  %v3700_v49 = vld [vmem:[#allocation5 + $0x18] sm:$0xff] }
 0x8bb   :  { %7146 = vpush %v2801_v22  ;;  %v3521_v22 = vld [vmem:[#allocation8 + $0x28] sm:$0xff] }
 0x8bc   :  { %7148 = vpush %v2982_v10  ;;  %v3527_v10 = vld [vmem:[#allocation8 + $0x58] sm:$0xff] }
 0x8bd   :  { %v8853_v16 = vpack.c.bf16 %v3527_v10, %v3526_v21  ;;  %v3764_v21 = vld [vmem:[#allocation5 + $0x218] sm:$0xff] }
 0x8f5   :  { %v2894_v33 = vpop.f32.mrb[22].mxu1 }
 0x8f6   :  { %v2895_v53 = vadd.f32 %v9400_v30, %v2894_v33  ;;  %v5905_v51 = vpop.f32.mrb[23].mxu1  ;;  %v3717_v33 = vld [vmem:[#allocation5 + $0xa0] sm:$0xff]  ;;  %v6962_v30 = vpack.c.bf16 %v3700_v49, %v3699_v50  ;;  %v6980_v50 = vpack.c.bf16 %v3726_v44, %v3725_v61  ;;  %v3767_v44 = vld [vmem:[#allocation5 + $0x230] sm:$0xff] }
 0x8f7   :  { %v3702_v51 = vld [vmem:[#allocation5 + $0x28] sm:$0xff]  ;;  %v3709_v49 = vld [vmem:[#allocation5 + $0x60] sm:$0xff] }
 0x8f8   :  { %v2899_v56 = vadd.f32 %v2898_v38, %v2895_v53  ;;  %v3718_v53 = vld [vmem:[#allocation5 + $0xa8] sm:$0xff]  ;;  %v3701_v38 = vld [vmem:[#allocation5 + $0x20] sm:$0xff] }
 0x8f9   :  { %v6964_v26 = vpack.c.bf16 %v3718_v53, %v3717_v33  ;;  %v3531_v33 = vld [vmem:[#allocation8 + $0x78] sm:$0xff]  ;;  %v3727_v53 = vld [vmem:[#allocation5 + $0xf0] sm:$0xff] }
 0x8fa   :  { %v8807_v5 = vsub.f32 %v2899_v56, %v9402_v58  ;;  %v8840_v56 = vpack.c.bf16 %v3521_v22, %v3520_v18  ;;  %v3719_v58 = vld [vmem:[#allocation5 + $0xb0] sm:$0xff] }
 0x8fb   :  { %v3530_v22 = vld [vmem:[#allocation8 + $0x70] sm:$0xff] }
 0x8fc   :  { %vm2901_vm6 = vcmp.gt.f32.partialorder %v8807_v5, 1.0 }
 0x8fd   :  { %v8811_v31 = vsel %vm2901_vm6, 1.0, %v9266_v52 }
 0x8fe   :  { %2905 = vst [vmem:[#allocation10 + $0x18] sm:$0xff] %v8811_v31 }
 0x915   :  { %v5241_v54 = vpop.f32.mrb[24].mxu1 }
 0x916   :  { %v5242_v35 = vpop.f32.mrb[25].mxu1 }
 0x917   :  { %v5243_v48 = vadd.f32 %v5242_v35, %v5241_v54  ;;  %v3720_v54 = vld [vmem:[#allocation5 + $0xb8] sm:$0xff]  ;;  %v3522_v35 = vld [vmem:[#allocation8 + $0x30] sm:$0xff] }
 0x919   :  { %v3242_v60 = vadd.f32 %v5243_v48, %v3172_v19  ;;  %v3523_v19 = vld [vmem:[#allocation8 + $0x38] sm:$0xff]  ;;  %v6966_v48 = vpack.c.bf16 %v3702_v51, %v3701_v38  ;;  %v3711_v51 = vld [vmem:[#allocation5 + $0x70] sm:$0xff] }
 0x91b   :  { %v3312_v27 = vadd.f32 %v5278_v57, %v3242_v60  ;;  %v3518_v57 = vld [vmem:[#allocation8 + $0x10] sm:$0xff]  ;;  %v6968_v60 = vpack.c.bf16 %v3720_v54, %v3719_v58  ;;  %v3712_v58 = vld [vmem:[#allocation5 + $0x78] sm:$0xff] }
 0x91c   :  { %v8836_v17 = vpack.c.bf16 %v3519_v23, %v3518_v57  ;;  %v3529_v57 = vld [vmem:[#allocation8 + $0x68] sm:$0xff]  ;;  %v6986_v54 = vpack.c.bf16 %v3712_v58, %v3711_v51  ;;  %v3788_v51 = vld [vmem:[#allocation5 + $0x2d8] sm:$0xff] }
 0x91e   :  { %6937 = vmatpush3.bf16.msra.mxu1 %v8836_v17 }
 0x91f   :  { %6938 = vmatprep.subr.bf16.mxu1 %v9258_v63 }
 0x922   :  { %6940 = vmatpush3.bf16.msra.mxu1 %v8840_v56 }
 0x923   :  { %6941 = vmatprep.subr.bf16.mxu1 %v9258_v63 }
 0x935   :  { %v3381_v32 = vpop.f32.mrb[26].mxu1 }
 0x936   :  { %v3382_v6 = vadd.f32 %v3381_v32, %v3312_v27  ;;  %v5940_v2 = vpop.f32.mrb[27].mxu1  ;;  %v3703_v27 = vld [vmem:[#allocation5 + $0x30] sm:$0xff]  ;;  %v3704_v32 = vld [vmem:[#allocation5 + $0x38] sm:$0xff] }
 0x937   :  { %v3524_v2 = vld [vmem:[#allocation8 + $0x40] sm:$0xff] }
 0x938   :  { %v3386_v14 = vadd.f32 %v3385_v34, %v3382_v6  ;;  %v8844_v6 = vpack.c.bf16 %v3523_v19, %v3522_v35  ;;  %v6970_v34 = vpack.c.bf16 %v3704_v32, %v3703_v27  ;;  %v3745_v35 = vld [vmem:[#allocation5 + $0x180] sm:$0xff]  ;;  %v3746_v19 = vld [vmem:[#allocation5 + $0x188] sm:$0xff] }
 0x939   :  { %v3778_v27 = vld [vmem:[#allocation5 + $0x288] sm:$0xff] }
 0x93a   :  { %v8819_v47 = vsub.f32 %v3386_v14, %v4499_v11  ;;  %6943 = vmatpush3.bf16.msra.mxu1 %v8844_v6  ;;  %v3525_v14 = vld [vmem:[#allocation8 + $0x48] sm:$0xff] }
 0x93b   :  { %6944 = vmatprep.subr.bf16.mxu1 %v9258_v63  ;;  %v8849_v11 = vpack.c.bf16 %v3525_v14, %v3524_v2  ;;  %v3762_v2 = vld [vmem:[#allocation5 + $0x208] sm:$0xff]  ;;  %v9404_v14 = vld [vmem:[#allocation47_spill] sm:$0xff] }
 0x93c   :  { %3393 = vadd.xlane.f32.xlu1 %v8819_v47  ;;  %vm3388_vm3 = vcmp.gt.f32.partialorder %v8819_v47, 1.0  ;;  %v3391_v37 = vmul.f32 %v8819_v47, %v8819_v47  ;;  %vm3646_vm5 = vcmp.gt.f32.partialorder %v9404_v14, 1.0 }
 0x93d   :  { %5974 = vmatmul.mubr.msk.f32.vlgmr.msra.gmra.mrb[28].mxu0 %vm3388_vm3, %v9262_v41 }
 0x93e   :  { %v8829_v55 = vadd.f32 %v3391_v37, %v8679_v13  ;;  %v6958_v13 = vpack.c.bf16 %v3698_v20, %v3697_v42  ;;  %v3721_v37 = vld [vmem:[#allocation5 + $0xc0] sm:$0xff]  ;;  %6946 = vmatpush3.bf16.msra.mxu1 %v8849_v11  ;;  %v6976_v42 = vpack.c.bf16 %v3724_v43, %v3723_v25  ;;  %v3708_v20 = vld [vmem:[#allocation5 + $0x58] sm:$0xff]  ;;  %4536 = vmatprep.mubr.msk.f32.mxu0 %vm3646_vm5, %v9262_v41  ;;  %v3782_v43 = vld [vmem:[#allocation5 + $0x2a8] sm:$0xff] }
 0x93f   :  { %v6972_v3 = vpack.c.bf16 %v3722_v7, %v3721_v37  ;;  %6947 = vmatprep.subr.bf16.mxu1 %v9258_v63  ;;  %v6978_v0 = vpack.c.bf16 %v3708_v20, %v3707_v8  ;;  %v9405_v37 = vld [vmem:[#allocation46_spill] sm:$0xff]  ;;  %v3781_v25 = vld [vmem:[#allocation5 + $0x2a0] sm:$0xff]  ;;  %v3766_v20 = vld [vmem:[#allocation5 + $0x228] sm:$0xff] }
 0x940   :  { %6959 = vmatpush3.bf16.msra.mxu0 %v6958_v13  ;;  %v3528_v13 = vld [vmem:[#allocation8 + $0x60] sm:$0xff]  ;;  %vm3645_vm15 = vcmp.gt.f32.partialorder %v9405_v37, 1.0  ;;  %v7028_v8 = vpack.c.bf16 %v3782_v43, %v3781_v25  ;;  %v9407_v25 = vld [vmem:[#allocation50_spill] sm:$0xff] }
 0x941   :  { %6961 = vmatprep.subr.bf16.mxu0 %v6960_v59  ;;  %v8857_v23 = vpack.c.bf16 %v3529_v57, %v3528_v13  ;;  %v3710_v59 = vld [vmem:[#allocation5 + $0x68] sm:$0xff]  ;;  %v3783_v13 = vld [vmem:[#allocation5 + $0x2b0] sm:$0xff]  ;;  %v3784_v57 = vld [vmem:[#allocation5 + $0x2b8] sm:$0xff]  ;;  %vm3649_vm10 = vcmp.gt.f32.partialorder %v9407_v25, 1.0 }
 0x942   :  { %6949 = vmatpush3.bf16.msra.mxu1 %v8853_v16  ;;  %v6982_v18 = vpack.c.bf16 %v3710_v59, %v3709_v49  ;;  %v7032_v61 = vpack.c.bf16 %v3784_v57, %v3783_v13  ;;  %v3785_v59 = vld [vmem:[#allocation5 + $0x2c0] sm:$0xff] }
 0x943   :  { %6950 = vmatprep.subr.bf16.mxu1 %v9258_v63 }
 0x944   :  { %6963 = vmatpush3.bf16.msra.mxu0 %v6962_v30  ;;  %v8861_v30 = vpack.c.bf16 %v3531_v33, %v3530_v22  ;;  %v3769_v33 = vld [vmem:[#allocation5 + $0x240] sm:$0xff] }
 0x945   :  { %6965 = vmatprep.subr.bf16.mxu0 %v6964_v26  ;;  %v3728_v26 = vld [vmem:[#allocation5 + $0xf8] sm:$0xff] }
 0x946   :  { %6952 = vmatpush3.bf16.msra.mxu1 %v8857_v23  ;;  %v6984_v38 = vpack.c.bf16 %v3728_v26, %v3727_v53  ;;  %v3770_v53 = vld [vmem:[#allocation5 + $0x248] sm:$0xff] }
 0x947   :  { %6953 = vmatprep.subr.bf16.mxu1 %v9258_v63  ;;  %v7038_v26 = vpack.c.bf16 %v3770_v53, %v3769_v33  ;;  %v3747_v53 = vld [vmem:[#allocation5 + $0x190] sm:$0xff] }
 0x948   :  { %6967 = vmatpush3.bf16.msra.mxu0 %v6966_v48  ;;  %v6988_v48 = vpack.c.bf16 %v3746_v19, %v3745_v35  ;;  %v3772_v35 = vld [vmem:[#allocation5 + $0x258] sm:$0xff] }
 0x949   :  { %6969 = vmatprep.subr.bf16.mxu0 %v6968_v60  ;;  %v3777_v60 = vld [vmem:[#allocation5 + $0x280] sm:$0xff] }
 0x94a   :  { %6955 = vmatpush3.bf16.msra.mxu1 %v8861_v30  ;;  %v7020_v32 = vpack.c.bf16 %v3778_v27, %v3777_v60  ;;  %v3790_v60 = vld [vmem:[#allocation5 + $0x2e8] sm:$0xff] }
 0x94b   :  { %6989 = vmatprep.subr.bf16.mxu1 %v6988_v48  ;;  %v3789_v48 = vld [vmem:[#allocation5 + $0x2e0] sm:$0xff] }
 0x94c   :  { %6971 = vmatpush3.bf16.msra.mxu0 %v6970_v34  ;;  %v3761_v34 = vld [vmem:[#allocation5 + $0x200] sm:$0xff]  ;;  %v7044_v27 = vpack.c.bf16 %v3790_v60, %v3789_v48  ;;  %v9408_v48 = vld [vmem:[#allocation49_spill] sm:$0xff] }
 0x94d   :  { %6973 = vmatprep.subr.bf16.mxu0 %v6972_v3  ;;  %v7022_v7 = vpack.c.bf16 %v3762_v2, %v3761_v34  ;;  %v3779_v3 = vld [vmem:[#allocation5 + $0x290] sm:$0xff]  ;;  %v3774_v34 = vld [vmem:[#allocation5 + $0x268] sm:$0xff]  ;;  %vm3648_vm11 = vcmp.gt.f32.partialorder %v9408_v48, 1.0  ;;  %v3749_v60 = vld [vmem:[#allocation5 + $0x1a0] sm:$0xff] }
 0x94e   :  { %v7024_v36 = vpack.c.bf16 %v3780_v39, %v3779_v3  ;;  %v3792_v3 = vld [vmem:[#allocation5 + $0x2f8] sm:$0xff] }
 0x950   :  { %6975 = vmatpush3.bf16.msra.mxu0 %v6974_v4  ;;  %v3763_v4 = vld [vmem:[#allocation5 + $0x210] sm:$0xff] }
 0x951   :  { %6977 = vmatprep.subr.bf16.mxu0 %v6976_v42  ;;  %v7026_v10 = vpack.c.bf16 %v3764_v21, %v3763_v4  ;;  %v3765_v42 = vld [vmem:[#allocation5 + $0x220] sm:$0xff]  ;;  %v3776_v4 = vld [vmem:[#allocation5 + $0x278] sm:$0xff] }
 0x954   :  { %6979 = vmatpush3.bf16.msra.mxu0 %v6978_v0  ;;  %v7030_v0 = vpack.c.bf16 %v3766_v20, %v3765_v42 }
 0x955   :  { %6981 = vmatprep.subr.bf16.mxu0 %v6980_v50  ;;  %v3768_v50 = vld [vmem:[#allocation5 + $0x238] sm:$0xff] }
 0x956   :  { %v7034_v49 = vpack.c.bf16 %v3768_v50, %v3767_v44 }
 0x958   :  { %6983 = vmatpush3.bf16.msra.mxu0 %v6982_v18  ;;  %v3786_v18 = vld [vmem:[#allocation5 + $0x2c8] sm:$0xff] }
 0x959   :  { %6985 = vmatprep.subr.bf16.mxu0 %v6984_v38  ;;  %v7036_v22 = vpack.c.bf16 %v3786_v18, %v3785_v59  ;;  %v3787_v38 = vld [vmem:[#allocation5 + $0x2d0] sm:$0xff]  ;;  %v3729_v18 = vld [vmem:[#allocation5 + $0x100] sm:$0xff] }
 0x95a   :  { %v7040_v58 = vpack.c.bf16 %v3788_v51, %v3787_v38  ;;  %v4502_v38 = vsel %vm2789_vm7, 1.0, %v9266_v52 }
 0x95c   :  { %6987 = vmatpush3.bf16.msra.mxu0 %v6986_v54  ;;  %v3771_v54 = vld [vmem:[#allocation5 + $0x250] sm:$0xff] }
 0x95d   :  { %7021 = vmatprep.subr.bf16.mxu0 %v7020_v32  ;;  %v7042_v19 = vpack.c.bf16 %v3772_v35, %v3771_v54  ;;  %v3773_v32 = vld [vmem:[#allocation5 + $0x260] sm:$0xff]  ;;  %v3731_v35 = vld [vmem:[#allocation5 + $0x110] sm:$0xff] }
 0x95e   :  { %v7046_v2 = vpack.c.bf16 %v3774_v34, %v3773_v32 }
 0x95f   :  { %4537 = vmatmul.mubr.msk.f32.vlgmr.msra.gmra.mrb[30].mxu0 %vm3645_vm15, %v9262_v41 }
 0x960   :  { %7023 = vmatpush3.bf16.msra.mxu0 %v7022_v7  ;;  %v3791_v7 = vld [vmem:[#allocation5 + $0x2f0] sm:$0xff] }
 0x961   :  { %7025 = vmatprep.subr.bf16.mxu0 %v7024_v36  ;;  %v7048_v39 = vpack.c.bf16 %v3792_v3, %v3791_v7  ;;  %v3775_v36 = vld [vmem:[#allocation5 + $0x270] sm:$0xff]  ;;  %v3733_v7 = vld [vmem:[#allocation5 + $0x120] sm:$0xff]  ;;  %v3734_v3 = vld [vmem:[#allocation5 + $0x128] sm:$0xff] }
 0x962   :  { %v7050_v21 = vpack.c.bf16 %v3776_v4, %v3775_v36  ;;  %v3752_v36 = vld [vmem:[#allocation5 + $0x1b8] sm:$0xff]  ;;  %v6998_v4 = vpack.c.bf16 %v3734_v3, %v3733_v7  ;;  %v3793_v7 = vld [vmem:[#allocation5 + $0x300] sm:$0xff]  ;;  %v3794_v3 = vld [vmem:[#allocation5 + $0x308] sm:$0xff] }
 0x964   :  { %7027 = vmatpush3.bf16.msra.mxu0 %v7026_v10  ;;  %v9406_v10 = vld [vmem:[#allocation51_spill] sm:$0xff] }
 0x965   :  { %7029 = vmatprep.subr.bf16.mxu0 %v7028_v8  ;;  %vm3650_vm9 = vcmp.gt.f32.partialorder %v9406_v10, 1.0 }
 0x966   :  { %4540 = vmatprep.mubr.msk.f32.mxu0 %vm3650_vm9, %v9262_v41 }
 0x968   :  { %7031 = vmatpush3.bf16.msra.mxu0 %v7030_v0 }
 0x969   :  { %7033 = vmatprep.subr.bf16.mxu0 %v7032_v61  ;;  %v8878_v61 = vld [vmem:[%s9083_s4] ss:$0 sm:$0xff] }
 0x96c   :  { %7035 = vmatpush3.bf16.msra.mxu0 %v7034_v49  ;;  %v3497_v49 = vmul.f32 0.9, %v8744_v24 }
 0x96d   :  { %7037 = vmatprep.subr.bf16.mxu0 %v7036_v22  ;;  %v3730_v22 = vld [vmem:[#allocation5 + $0x108] sm:$0xff] }
 0x970   :  { %7039 = vmatpush3.bf16.msra.mxu0 %v7038_v26  ;;  %v3748_v26 = vld [vmem:[#allocation5 + $0x198] sm:$0xff] }
 0x971   :  { %7041 = vmatprep.subr.bf16.mxu0 %v7040_v58  ;;  %v6990_v58 = vpack.c.bf16 %v3730_v22, %v3729_v18  ;;  %v6992_v54 = vpack.c.bf16 %v3748_v26, %v3747_v53  ;;  %v3739_v18 = vld [vmem:[#allocation5 + $0x150] sm:$0xff]  ;;  %v3740_v22 = vld [vmem:[#allocation5 + $0x158] sm:$0xff]  ;;  %v3758_v53 = vld [vmem:[#allocation5 + $0x1e8] sm:$0xff] }
 0x972   :  { %v7010_v26 = vpack.c.bf16 %v3740_v22, %v3739_v18  ;;  %v3805_v22 = vld [vmem:[#allocation5 + $0x360] sm:$0xff] }
 0x974   :  { %7043 = vmatpush3.bf16.msra.mxu0 %v7042_v19  ;;  %v3732_v19 = vld [vmem:[#allocation5 + $0x118] sm:$0xff] }
 0x975   :  { %7045 = vmatprep.subr.bf16.mxu0 %v7044_v27  ;;  %v3750_v27 = vld [vmem:[#allocation5 + $0x1a8] sm:$0xff]  ;;  %v6994_v24 = vpack.c.bf16 %v3732_v19, %v3731_v35  ;;  %v3759_v35 = vld [vmem:[#allocation5 + $0x1f0] sm:$0xff]  ;;  %v3760_v19 = vld [vmem:[#allocation5 + $0x1f8] sm:$0xff] }
 0x978   :  { %7047 = vmatpush3.bf16.msra.mxu0 %v7046_v2  ;;  %v6996_v2 = vpack.c.bf16 %v3750_v27, %v3749_v60  ;;  %v7016_v27 = vpack.c.bf16 %v3760_v19, %v3759_v35  ;;  %v4115_v19 = vld [vmem:[#allocation7] sm:$0xff] }
 0x979   :  { %7049 = vmatprep.subr.bf16.mxu0 %v7048_v39  ;;  %v3751_v39 = vld [vmem:[#allocation5 + $0x1b0] sm:$0xff] }
 0x97c   :  { %7051 = vmatpush3.bf16.msra.mxu0 %v7050_v21  ;;  %v7000_v21 = vpack.c.bf16 %v3752_v36, %v3751_v39  ;;  %v9409_v39 = vld [vmem:[#allocation48_spill] sm:$0xff]  ;;  %v7053_v36 = vpack.c.bf16 %v3794_v3, %v3793_v7  ;;  %v4121_v3 = vld [vmem:[#allocation7 + $0x30] sm:$0xff] }
 0x97d   :  { %7076 = vmatprep.subr.bf16.mxu0 %v9258_v63  ;;  %vm3647_vm13 = vcmp.gt.f32.partialorder %v9409_v39, 1.0 }
 0x97f   :  { %4541 = vmatmul.mubr.msk.f32.vlgmr.msra.gmra.mrb[32].mxu0 %vm3649_vm10, %v9262_v41 }
 0x980   :  { %6078 = vmatprep.mubr.msk.f32.mxu0 %vm7335_vm4, %v9266_v52 }
 0x9c9   :  { %v3394_v43 = vpop.xlane.xlu1 %3393 }
 0x9ca   :  { %v3395_v8 = vrot.slane %v3394_v43, 4 }
 0x9cc   :  { %v3396_v42 = vadd.f32 %v3395_v8, %v3394_v43  ;;  %v3735_v43 = vld [vmem:[#allocation5 + $0x130] sm:$0xff]  ;;  %v3736_v8 = vld [vmem:[#allocation5 + $0x138] sm:$0xff] }
 0x9ce   :  { %v3397_v20 = vrot.slane %v3396_v42, 2 }
 0x9d0   :  { %v3398_v0 = vadd.f32 %v3397_v20, %v3396_v42  ;;  %v3753_v42 = vld [vmem:[#allocation5 + $0x1c0] sm:$0xff]  ;;  %v3754_v20 = vld [vmem:[#allocation5 + $0x1c8] sm:$0xff] }
 0x9d2   :  { %v3399_v13 = vrot.slane %v3398_v0, 1 }
 0x9d4   :  { %v3400_v57 = vadd.f32 %v3399_v13, %v3398_v0  ;;  %v7002_v0 = vpack.c.bf16 %v3736_v8, %v3735_v43  ;;  %v7004_v13 = vpack.c.bf16 %v3754_v20, %v3753_v42  ;;  %v3797_v8 = vld [vmem:[#allocation5 + $0x320] sm:$0xff]  ;;  %v3798_v42 = vld [vmem:[#allocation5 + $0x328] sm:$0xff] }
 0x9d5   :  { %v7059_v20 = vpack.c.bf16 %v3798_v42, %v3797_v8  ;;  %v4125_v8 = vld [vmem:[#allocation7 + $0x50] sm:$0xff]  ;;  %v4126_v42 = vld [vmem:[#allocation7 + $0x58] sm:$0xff] }
 0x9d6   :  { %7150 = vpush %v3400_v57  ;;  %v3738_v57 = vld [vmem:[#allocation5 + $0x148] sm:$0xff] }
 0xa10   :  { %v3493_v44 = vpop.f32.mrb[28].mxu0 }
 0xa11   :  { %v3494_v50 = vadd.f32 %v8878_v61, %v3493_v44  ;;  %v5975_v59 = vpop.f32.mrb[29].mxu0  ;;  %v3755_v44 = vld [vmem:[#allocation5 + $0x1d0] sm:$0xff] }
 0xa13   :  { %v3498_v33 = vadd.f32 %v3497_v49, %v3494_v50  ;;  %v3756_v50 = vld [vmem:[#allocation5 + $0x1d8] sm:$0xff] }
 0xa14   :  { %v7008_v59 = vpack.c.bf16 %v3756_v50, %v3755_v44  ;;  %v3802_v44 = vld [vmem:[#allocation5 + $0x348] sm:$0xff] }
 0xa15   :  { %v8885_v51 = vsub.f32 %v3498_v33, %v4502_v38  ;;  %v3757_v33 = vld [vmem:[#allocation5 + $0x1e0] sm:$0xff] }
 0xa16   :  { %v7012_v38 = vpack.c.bf16 %v3758_v53, %v3757_v33  ;;  %v3806_v33 = vld [vmem:[#allocation5 + $0x368] sm:$0xff] }
 0xa17   :  { %3505 = vadd.xlane.f32.xlu0 %v8885_v51  ;;  %vm3500_vm12 = vcmp.gt.f32.partialorder %v8885_v51, 1.0  ;;  %v3503_v32 = vmul.f32 %v8885_v51, %v8885_v51  ;;  %v7071_v53 = vpack.c.bf16 %v3806_v33, %v3805_v22  ;;  %v8944_v33 = vld [vmem:[%s9085_s6] ss:$0 sm:$0xff] }
 0xa18   :  { %6009 = vmatmul.mubr.msk.f32.vlgmr.msra.gmra.mrb[28].mxu1 %vm3500_vm12, %v9262_v41 }
 0xa19   :  { %6991 = vmatpush3.bf16.msra.mxu1 %v6990_v58  ;;  %4538 = vmatprep.mubr.msk.f32.mxu1 %vm3648_vm11, %v9262_v41  ;;  %v8897_v34 = vadd.f32 %v3503_v32, %v8758_v28  ;;  %v3737_v28 = vld [vmem:[#allocation5 + $0x140] sm:$0xff]  ;;  %v3743_v32 = vld [vmem:[#allocation5 + $0x170] sm:$0xff] }
 0xa1a   :  { %6993 = vmatprep.subr.bf16.mxu1 %v6992_v54  ;;  %v7006_v49 = vpack.c.bf16 %v3738_v57, %v3737_v28  ;;  %v3741_v58 = vld [vmem:[#allocation5 + $0x160] sm:$0xff]  ;;  %v3742_v54 = vld [vmem:[#allocation5 + $0x168] sm:$0xff] }
 0xa1b   :  { %v7014_v60 = vpack.c.bf16 %v3742_v54, %v3741_v58  ;;  %v3801_v57 = vld [vmem:[#allocation5 + $0x340] sm:$0xff] }
 0xa1c   :  { %v7065_v50 = vpack.c.bf16 %v3802_v44, %v3801_v57  ;;  %v9410_v54 = vld [vmem:[#allocation52_spill] sm:$0xff] }
 0xa1d   :  { %6995 = vmatpush3.bf16.msra.mxu1 %v6994_v24  ;;  %v3744_v24 = vld [vmem:[#allocation5 + $0x178] sm:$0xff]  ;;  %vm3651_vm14 = vcmp.gt.f32.partialorder %v9410_v54, 1.0  ;;  %v4127_v44 = vld [vmem:[#allocation7 + $0x60] sm:$0xff] }
 0xa1e   :  { %6997 = vmatprep.subr.bf16.mxu1 %v6996_v2  ;;  %v7018_v2 = vpack.c.bf16 %v3744_v24, %v3743_v32 }
 0xa21   :  { %6999 = vmatpush3.bf16.msra.mxu1 %v6998_v4  ;;  %v3795_v4 = vld [vmem:[#allocation5 + $0x310] sm:$0xff] }
 0xa22   :  { %7001 = vmatprep.subr.bf16.mxu1 %v7000_v21  ;;  %v3796_v21 = vld [vmem:[#allocation5 + $0x318] sm:$0xff] }
 0xa23   :  { %v7056_v43 = vpack.c.bf16 %v3796_v21, %v3795_v4  ;;  %v4123_v4 = vld [vmem:[#allocation7 + $0x40] sm:$0xff]  ;;  %v4124_v21 = vld [vmem:[#allocation7 + $0x48] sm:$0xff] }
 0xa25   :  { %7003 = vmatpush3.bf16.msra.mxu1 %v7002_v0  ;;  %v3799_v0 = vld [vmem:[#allocation5 + $0x330] sm:$0xff] }
 0xa26   :  { %7005 = vmatprep.subr.bf16.mxu1 %v7004_v13  ;;  %v3800_v13 = vld [vmem:[#allocation5 + $0x338] sm:$0xff] }
 0xa27   :  { %v7062_v28 = vpack.c.bf16 %v3800_v13, %v3799_v0 }
 0xa29   :  { %7007 = vmatpush3.bf16.msra.mxu1 %v7006_v49  ;;  %v3803_v49 = vld [vmem:[#allocation5 + $0x350] sm:$0xff] }
 0xa2a   :  { %7009 = vmatprep.subr.bf16.mxu1 %v7008_v59  ;;  %v3804_v59 = vld [vmem:[#allocation5 + $0x358] sm:$0xff] }
 0xa2b   :  { %v7068_v18 = vpack.c.bf16 %v3804_v59, %v3803_v49 }
 0xa2d   :  { %7011 = vmatpush3.bf16.msra.mxu1 %v7010_v26  ;;  %v3807_v26 = vld [vmem:[#allocation5 + $0x370] sm:$0xff] }
 0xa2e   :  { %7013 = vmatprep.subr.bf16.mxu1 %v7012_v38  ;;  %v3808_v38 = vld [vmem:[#allocation5 + $0x378] sm:$0xff] }
 0xa2f   :  { %v7074_v58 = vpack.c.bf16 %v3808_v38, %v3807_v26  ;;  %v3609_v38 = vmul.f32 0.9, %v8807_v5 }
 0xa31   :  { %7015 = vmatpush3.bf16.msra.mxu1 %v7014_v60  ;;  %v4117_v60 = vld [vmem:[#allocation7 + $0x10] sm:$0xff] }
 0xa32   :  { %7017 = vmatprep.subr.bf16.mxu1 %v7016_v27 }
 0xa35   :  { %7019 = vmatpush3.bf16.msra.mxu1 %v7018_v2  ;;  %v4119_v2 = vld [vmem:[#allocation7 + $0x20] sm:$0xff] }
 0xa36   :  { %7052 = vmatprep.subr.bf16.mxu1 %v9258_v63 }
 0xa38   :  { %4539 = vmatmul.mubr.msk.f32.vlgmr.msra.gmra.mrb[30].mxu1 %vm3647_vm13, %v9262_v41 }
 0xa39   :  { %7054 = vmatpush3.bf16.msra.mxu1 %v7053_v36  ;;  %6043 = vmatprep.mubr.msk.f32.mxu1 %vm7335_vm4, %v9266_v52 }
 0xa3a   :  { %7055 = vmatprep.subr.bf16.mxu1 %v9258_v63 }
 0xa3d   :  { %7057 = vmatpush3.bf16.msra.mxu1 %v7056_v43  ;;  %v7089_v43 = vpack.c.bf16 %v4124_v21, %v4123_v4 }
 0xa3e   :  { %7058 = vmatprep.subr.bf16.mxu1 %v9258_v63 }
 0xa41   :  { %7060 = vmatpush3.bf16.msra.mxu1 %v7059_v20  ;;  %v7092_v20 = vpack.c.bf16 %v4126_v42, %v4125_v8 }
 0xa42   :  { %7061 = vmatprep.subr.bf16.mxu1 %v9258_v63 }
 0xa45   :  { %7063 = vmatpush3.bf16.msra.mxu1 %v7062_v28 }
 0xa46   :  { %7064 = vmatprep.subr.bf16.mxu1 %v9258_v63 }
 0xa49   :  { %7066 = vmatpush3.bf16.msra.mxu1 %v7065_v50  ;;  %v4128_v50 = vld [vmem:[#allocation7 + $0x68] sm:$0xff] }
 0xa4a   :  { %7067 = vmatprep.subr.bf16.mxu1 %v9258_v63  ;;  %v7095_v49 = vpack.c.bf16 %v4128_v50, %v4127_v44  ;;  %v9414_v50 = vld [vmem:[#allocation22_spill] sm:$0xff] }
 0xa4d   :  { %7069 = vmatpush3.bf16.msra.mxu1 %v7068_v18 }
 0xa4e   :  { %7070 = vmatprep.subr.bf16.mxu1 %v9258_v63 }
 0xa51   :  { %7072 = vmatpush3.bf16.msra.mxu1 %v7071_v53 }
 0xa52   :  { %7073 = vmatprep.subr.bf16.mxu1 %v9258_v63 }
 0xa55   :  { %7075 = vmatpush3.bf16.msra.mxu1 %v7074_v58 }
 0xa56   :  { %7100 = vmatprep.subr.bf16.mxu1 %v9258_v63 }
 0xa58   :  { %6044 = vmatmul.mubr.msk.f32.vlgmr.msra.gmra.mrb[32].mxu1 %vm3651_vm14, %v9262_v41 }
 0xa59   :  { %7102 = vmatpush3.bf16.msra.mxu1 %v8833_v12  ;;  %6113 = vmatprep.mubr.msk.f32.mxu1 %vm7335_vm4, %v9266_v52  ;;  %v5362_v12 = vpop.f32.mrb[30].mxu0 }
 0xa5a   :  { %7103 = vmatprep.subr.bf16.mxu1 %v9258_v63 }
 0xa5d   :  { %7105 = vmatpush3.bf16.msra.mxu1 %v8836_v17  ;;  %v5363_v17 = vpop.f32.mrb[31].mxu0 }
 0xa5e   :  { %7106 = vmatprep.subr.bf16.mxu1 %v9258_v63  ;;  %v8929_v35 = vadd.f32 %v5363_v17, %v5362_v12 }
 0xa61   :  { %7108 = vmatpush3.bf16.msra.mxu1 %v8840_v56  ;;  %v5432_v56 = vpop.f32.mrb[32].mxu0 }
 0xa62   :  { %7109 = vmatprep.subr.bf16.mxu1 %v9258_v63 }
 0xa65   :  { %7111 = vmatpush3.bf16.msra.mxu1 %v8844_v6  ;;  %v5433_v6 = vpop.f32.mrb[33].mxu0 }
 0xa66   :  { %7112 = vmatprep.subr.bf16.mxu1 %v9258_v63  ;;  %v5434_v27 = vadd.f32 %v5433_v6, %v5432_v56 }
 0xa69   :  { %7114 = vmatpush3.bf16.msra.mxu1 %v8849_v11  ;;  %v4116_v11 = vld [vmem:[#allocation7 + $0x8] sm:$0xff] }
 0xa6a   :  { %7115 = vmatprep.subr.bf16.mxu1 %v9258_v63  ;;  %v7077_v32 = vpack.c.bf16 %v4116_v11, %v4115_v19 }
 0xa6c   :  { %7078 = vmatpush3.bf16.msra.mxu0 %v7077_v32 }
 0xa6d   :  { %7117 = vmatpush3.bf16.msra.mxu1 %v8853_v16  ;;  %v4118_v16 = vld [vmem:[#allocation7 + $0x18] sm:$0xff]  ;;  %7079 = vmatprep.subr.bf16.mxu0 %v9258_v63 }
 0xa6e   :  { %7118 = vmatprep.subr.bf16.mxu1 %v9258_v63  ;;  %v7080_v24 = vpack.c.bf16 %v4118_v16, %v4117_v60  ;;  %v4096_v16 = vmul.f32 0.9, %v8819_v47  ;;  %v7178_v47 = vld [vmem:[#allocation2 + $0x8] sm:$0xff] }
 0xa6f   :  { %v119_v42 = vmul.f32 %v7178_v47, %v7178_v47 }
 0xa70   :  { %7081 = vmatpush3.bf16.msra.mxu0 %v7080_v24 }
 0xa71   :  { %7120 = vmatpush3.bf16.msra.mxu1 %v8857_v23  ;;  %v4120_v23 = vld [vmem:[#allocation7 + $0x28] sm:$0xff]  ;;  %7082 = vmatprep.subr.bf16.mxu0 %v9258_v63 }
 0xa72   :  { %7121 = vmatprep.subr.bf16.mxu1 %v9258_v63  ;;  %v7083_v7 = vpack.c.bf16 %v4120_v23, %v4119_v2  ;;  %v4521_v23 = vsel %vm3388_vm3, 1.0, %v9266_v52 }
 0xa74   :  { %7084 = vmatpush3.bf16.msra.mxu0 %v7083_v7 }
 0xa75   :  { %7123 = vmatpush3.bf16.msra.mxu1 %v8861_v30  ;;  %v4122_v30 = vld [vmem:[#allocation7 + $0x38] sm:$0xff]  ;;  %7085 = vmatprep.subr.bf16.mxu0 %v9258_v63 }
 0xa76   :  { %v7086_v36 = vpack.c.bf16 %v4122_v30, %v4121_v3 }
 0xa78   :  { %7087 = vmatpush3.bf16.msra.mxu0 %v7086_v36 }
 0xa79   :  { %7088 = vmatprep.subr.bf16.mxu0 %v9258_v63 }
 0xa7c   :  { %7090 = vmatpush3.bf16.msra.mxu0 %v7089_v43 }
 0xa7d   :  { %7091 = vmatprep.subr.bf16.mxu0 %v9258_v63 }
 0xa80   :  { %7093 = vmatpush3.bf16.msra.mxu0 %v7092_v20  ;;  %v9412_v20 = vld [vmem:[#allocation18_spill] sm:$0xff] }
 0xa81   :  { %7094 = vmatprep.subr.bf16.mxu0 %v9258_v63 }
 0xa84   :  { %7096 = vmatpush3.bf16.msra.mxu0 %v7095_v49  ;;  %v1534_v49 = vmul.f32 %v9414_v50, %v9414_v50 }
 0xa85   :  { %7097 = vmatprep.subr.bf16.mxu0 %v9258_v63 }
 0xa88   :  { %7099 = vmatpush3.bf16.msra.mxu0 %v8801_v62  ;;  %v4535_v62 = vld [vmem:[%s9081_s2] ss:$0 sm:$0xff]  ;;  %s7125_s2 = spop %7124 }
 0xa89   :  { %v3883_v5 = vadd.f32 %v8929_v35, %v4535_v62  ;;  %s7127_s29 = spop %7126  ;;  %s147_s1 = smul.f32 %s7125_s2, %s7125_s2 }
 0xa8a   :  { %s7129_s30 = spop %7128  ;;  %s563_s9 = smul.f32 %s7127_s29, %s7127_s29 }
 0xa8b   :  { %s7131_s28 = spop %7130  ;;  %s673_s13 = smul.f32 %s7129_s30, %s7129_s30 }
 0xa8c   :  { %s851_s3 = smul.f32 %s7131_s28, %s7131_s28  ;;  %s7133_s22 = spop %7132 }
 0xa8d   :  { %s7135_s5 = spop %7134  ;;  %s1269_s17 = smul.f32 %s7133_s22, %s7133_s22 }
 0xa8e   :  { %s7137_s10 = spop %7136  ;;  %s852_s11 = sadd.f32 %s851_s3, %s147_s1 }
 0xa8f   :  { %s1562_s12 = smul.f32 %s7137_s10, %s7137_s10  ;;  %s7139_s14 = spop %7138 }
 0xa90   :  { %s7141_s18 = spop %7140  ;;  %s1381_s19 = smul.f32 %s7135_s5, %s7135_s5 }
 0xa91   :  { %s7143_s0 = spop %7142  ;;  %s1563_s20 = sadd.f32 %s1562_s12, %s852_s11 }
 0xa92   :  { %s2273_s21 = smul.f32 %s7143_s0, %s7143_s0  ;;  %s7145_s24 = spop %7144 }
 0xa93   :  { %s1980_s23 = smul.f32 %s7139_s14, %s7139_s14  ;;  %s1270_s25 = sadd.f32 %s1269_s17, %s563_s9 }
 0xa94   :  { %s7147_s4 = spop %7146  ;;  %s1382_s26 = sadd.f32 %s1381_s19, %s673_s13 }
 0xa95   :  { %s7149_s27 = spop %7148  ;;  %s2274_s6 = sadd.f32 %s2273_s21, %s1563_s20 }
 0xa96   :  { %s2984_s2 = smul.f32 %s7149_s27, %s7149_s27  ;;  %s1981_s29 = sadd.f32 %s1980_s23, %s1270_s25 }
 0xa97   :  { %s7151_s28 = spop %7150  ;;  %s2092_s1 = smul.f32 %s7141_s18, %s7141_s18 }
 0xa98   :  { %s2691_s30 = smul.f32 %s7145_s24, %s7145_s24  ;;  %s2985_s15 = sadd.f32 %s2984_s2, %s2274_s6 }
 0xa99   :  { %s2803_s22 = smul.f32 %s7147_s4, %s7147_s4  ;;  %s2093_s11 = sadd.f32 %s2092_s1, %s1382_s26 }
 0xa9a   :  { %s3402_s12 = smul.f32 %s7151_s28, %s7151_s28  ;;  %s2692_s14 = sadd.f32 %s2691_s30, %s1981_s29 }
 0xa9b   :  { %s2804_s9 = sadd.f32 %s2803_s22, %s2093_s11  ;;  %s7337_s22 = smov [#allocation10]  }
 0xa9c   :  { %s3403_s19 = sadd.f32 %s3402_s12, %s2692_s14  ;;  %s7338_s12 = smov [#allocation11]  }
 0xa9d   :  { %s4403_s14 = sshll.u32 %s7338_s12, 4  ;;  %s4404_s14 = int_to_ptr.vmem [resolvable:$true] %s4403_s14 }
 0xaa4   :  { %v3506_v0 = vpop.xlane.xlu0 %3505 }
 0xaa5   :  { %v3507_v13 = vrot.slane %v3506_v0, 4 }
 0xaa7   :  { %v3508_v28 = vadd.f32 %v3507_v13, %v3506_v0  ;;  %v823_v0 = vmul.f32 %v9412_v20, %v9412_v20  ;;  %v7179_v13 = vld [vmem:[#allocation2] sm:$0xff] }
 0xaa9   :  { %v3509_v57 = vrot.slane %v3508_v28, 2  ;;  %v830_v44 = vadd.f32 %v823_v0, %v119_v42  ;;  %v9423_v42 = vld [vmem:[#allocation25_spill] sm:$0xff]  ;;  %v9424_v0 = vld [vmem:[#allocation35_spill] sm:$0xff] }
 0xaaa   :  { %v827_v20 = vmul.f32 %v9423_v42, %v9423_v42  ;;  %v3667_v42 = vmul.f32 %v9404_v14, %v9404_v14  ;;  %v3671_v14 = vmul.f32 %v9406_v10, %v9406_v10 }
 0xaab   :  { %v3510_v59 = vadd.f32 %v3509_v57, %v3508_v28  ;;  %v118_v28 = vmul.f32 %v7179_v13, %v7179_v13  ;;  %v9413_v57 = vld [vmem:[#allocation19_spill] sm:$0xff]  ;;  %v2246_v13 = vmul.f32 %v9424_v0, %v9424_v0 }
 0xaad   :  { %v3511_v18 = vrot.slane %v3510_v59, 1 }
 0xaaf   :  { %v3512_v22 = vadd.f32 %v3511_v18, %v3510_v59  ;;  %v7180_v59 = vld [vmem:[#allocation2 + $0x10] sm:$0xff] }
 0xab0   :  { %v120_v18 = vmul.f32 %v7180_v59, %v7180_v59 }
 0xab1   :  { %7152 = vpush %v3512_v22  ;;  %v9415_v22 = vld [vmem:[#allocation21_spill] sm:$0xff] }
 0xae2   :  { %s7153_s3 = spop %7152 }
 0xae3   :  { %s3514_s0 = smul.f32 %s7153_s3, %s7153_s3 }
 0xae5   :  { %s3515_s20 = sadd.f32 %s3514_s0, %s2804_s9 }
 0xaeb   :  { %v3605_v53 = vpop.f32.mrb[28].mxu1 }
 0xaec   :  { %v3606_v26 = vadd.f32 %v8944_v33, %v3605_v53  ;;  %v6010_v58 = vpop.f32.mrb[29].mxu1  ;;  %v824_v53 = vmul.f32 %v9415_v22, %v9415_v22 }
 0xaee   :  { %v3610_v12 = vadd.f32 %v3609_v38, %v3606_v26  ;;  %v9416_v38 = vld [vmem:[#allocation23_spill] sm:$0xff] }
 0xaef   :  { %v1533_v58 = vmul.f32 %v9416_v38, %v9416_v38 }
 0xaf0   :  { %v8949_v17 = vsub.f32 %v3610_v12, %v8811_v31  ;;  %v7181_v12 = vld [vmem:[#allocation2 + $0x18] sm:$0xff] }
 0xaf1   :  { %v121_v62 = vmul.f32 %v7181_v12, %v7181_v12  ;;  %v7184_v12 = vld [vmem:[#allocation2 + $0x30] sm:$0xff] }
 0xaf2   :  { %vm3612_vm4 = vcmp.gt.f32.partialorder %v8949_v17, 1.0 }
 0xaf3   :  { %v8953_v63 = vsel %vm3612_vm4, 1.0, %v9266_v52 }
 0xaf4   :  { %3616 = vst [vmem:[#allocation10 + $0x20] sm:$0xff] %v8953_v63 }
 0xb0b   :  { %v5397_v56 = vpop.f32.mrb[30].mxu1 }
 0xb0c   :  { %v5398_v6 = vpop.f32.mrb[31].mxu1 }
 0xb0d   :  { %v5399_v19 = vadd.f32 %v5398_v6, %v5397_v56  ;;  %v9417_v56 = vld [vmem:[#allocation20_spill] sm:$0xff] }
 0xb0e   :  { %v825_v6 = vmul.f32 %v9417_v56, %v9417_v56 }
 0xb0f   :  { %v3953_v11 = vadd.f32 %v5399_v19, %v3883_v5  ;;  %v1541_v5 = vadd.f32 %v1534_v49, %v830_v44  ;;  %v9418_v19 = vld [vmem:[#allocation33_spill] sm:$0xff] }
 0xb10   :  { %v9425_v49 = vld [vmem:[#allocation29_spill] sm:$0xff] }
 0xb11   :  { %v4023_v60 = vadd.f32 %v5434_v27, %v3953_v11  ;;  %v9411_v27 = vld [vmem:[#allocation80_spill] sm:$0xff]  ;;  %v2245_v11 = vmul.f32 %v9418_v19, %v9418_v19  ;;  %v1537_v59 = vmul.f32 %v9425_v49, %v9425_v49 }
 0xb12   :  { %v3688_v30 = vrot.slane %v9411_v27, 4 }
 0xb14   :  { %v3689_v36 = vadd.f32 %v3688_v30, %v9411_v27  ;;  %v9421_v27 = vld [vmem:[#allocation24_spill] sm:$0xff] }
 0xb15   :  { %v826_v30 = vmul.f32 %v9421_v27, %v9421_v27  ;;  %v2959_v27 = vmul.f32 %v9375_v15, %v9375_v15  ;;  %v3669_v15 = vmul.f32 %v9408_v48, %v9408_v48  ;;  %v3672_v48 = vmul.f32 %v9410_v54, %v9410_v54 }
 0xb16   :  { %v3690_v4 = vrot.slane %v3689_v36, 2 }
 0xb18   :  { %v3691_v21 = vadd.f32 %v3690_v4, %v3689_v36  ;;  %v9422_v36 = vld [vmem:[#allocation30_spill] sm:$0xff] }
 0xb19   :  { %v2244_v4 = vmul.f32 %v9422_v36, %v9422_v36  ;;  %v3666_v36 = vmul.f32 %v9405_v37, %v9405_v37  ;;  %v2961_v37 = vmul.f32 %v9399_v29, %v9399_v29 }
 0xb1a   :  { %v3692_v43 = vrot.slane %v3691_v21, 1 }
 0xb1c   :  { %v3693_v8 = vadd.f32 %v3692_v43, %v3691_v21  ;;  %v2252_v21 = vadd.f32 %v2245_v11, %v1541_v5  ;;  %v9429_v11 = vld [vmem:[#allocation36_spill] sm:$0xff] }
 0xb1e   :  { %7154 = vpush %v3693_v8  ;;  %v7183_v8 = vld [vmem:[#allocation2 + $0x28] sm:$0xff] }
 0xb1f   :  { %v123_v47 = vmul.f32 %v7183_v8, %v7183_v8 }
 0xb2b   :  { %v4092_v31 = vpop.f32.mrb[32].mxu1 }
 0xb2c   :  { %v4093_v32 = vadd.f32 %v4092_v31, %v4023_v60  ;;  %v6045_v24 = vpop.f32.mrb[33].mxu1  ;;  %v831_v60 = vadd.f32 %v824_v53, %v120_v18  ;;  %v9419_v31 = vld [vmem:[#allocation27_spill] sm:$0xff]  ;;  %v9426_v18 = vld [vmem:[#allocation34_spill] sm:$0xff] }
 0xb2d   :  { %v832_v24 = vadd.f32 %v825_v6, %v121_v62  ;;  %v2247_v22 = vmul.f32 %v9426_v18, %v9426_v18  ;;  %v124_v62 = vmul.f32 %v7184_v12, %v7184_v12  ;;  %v9428_v6 = vld [vmem:[#allocation31_spill] sm:$0xff] }
 0xb2e   :  { %v4097_v2 = vadd.f32 %v4096_v16, %v4093_v32  ;;  %v1535_v32 = vmul.f32 %v9419_v31, %v9419_v31  ;;  %v1538_v5 = vmul.f32 %v9428_v6, %v9428_v6 }
 0xb30   :  { %v4098_v7 = vsub.f32 %v4097_v2, %v4521_v23  ;;  %v9420_v2 = vld [vmem:[#allocation26_spill] sm:$0xff]  ;;  %v1542_v43 = vadd.f32 %v1535_v32, %v831_v60  ;;  %v2248_v60 = vmul.f32 %v9429_v11, %v9429_v11  ;;  %v2958_v32 = vmul.f32 %v9378_v40, %v9378_v40 }
 0xb31   :  { %v1536_v23 = vmul.f32 %v9420_v2, %v9420_v2 }
 0xb32   :  { %4104 = vadd.xlane.f32.xlu0 %v4098_v7  ;;  %vm4099_vm0 = vcmp.gt.f32.partialorder %v4098_v7, 1.0  ;;  %v4102_v3 = vmul.f32 %v4098_v7, %v4098_v7  ;;  %v7182_v7 = vld [vmem:[#allocation2 + $0x20] sm:$0xff]  ;;  %v2253_v53 = vadd.f32 %v2246_v13, %v1542_v43 }
 0xb33   :  { %6079 = vmatmul.mubr.msk.f32.vlgmr.msra.gmra.mrb[34].mxu0 %vm4099_vm0, %v9262_v41  ;;  %v1543_v44 = vadd.f32 %v1536_v23, %v832_v24  ;;  %v9431_v23 = vld [vmem:[#allocation37_spill] sm:$0xff] }
 0xb34   :  { %v8966_v35 = vadd.f32 %v4102_v3, %v8829_v55  ;;  %v822_v55 = vmul.f32 %v9413_v57, %v9413_v57  ;;  %v122_v3 = vmul.f32 %v7182_v7, %v7182_v7  ;;  %v2955_v57 = vmul.f32 %v9370_v1, %v9370_v1  ;;  %v9427_v1 = vld [vmem:[#allocation28_spill] sm:$0xff] }
 0xb35   :  { %v828_v56 = vmul.f32 %v9427_v1, %v9427_v1  ;;  %v2254_v31 = vadd.f32 %v2247_v22, %v1543_v44  ;;  %v2249_v7 = vmul.f32 %v9431_v23, %v9431_v23 }
 0xb36   :  { %v829_v26 = vadd.f32 %v822_v55, %v118_v28  ;;  %v2956_v55 = vmul.f32 %v9367_v9, %v9367_v9  ;;  %v833_v50 = vadd.f32 %v826_v30, %v122_v3  ;;  %v834_v9 = vadd.f32 %v827_v20, %v123_v47 }
 0xb37   :  { %v2965_v8 = vadd.f32 %v2958_v32, %v2254_v31  ;;  %v2960_v47 = vmul.f32 %v9372_v45, %v9372_v45  ;;  %v3668_v20 = vmul.f32 %v9409_v39, %v9409_v39 }
 0xb38   :  { %v1540_v16 = vadd.f32 %v1533_v58, %v829_v26  ;;  %v2957_v26 = vmul.f32 %v9389_v46, %v9389_v46  ;;  %v2963_v58 = vadd.f32 %v2956_v55, %v2252_v21  ;;  %v1544_v19 = vadd.f32 %v1537_v59, %v833_v50  ;;  %v9432_v21 = vld [vmem:[#allocation38_spill] sm:$0xff] }
 0xb39   :  { %v835_v46 = vadd.f32 %v828_v56, %v124_v62  ;;  %v1545_v2 = vadd.f32 %v1538_v5, %v834_v9  ;;  %v2250_v40 = vmul.f32 %v9432_v21, %v9432_v21  ;;  %v3676_v50 = vadd.f32 %v3669_v15, %v2965_v8 }
 0xb3a   :  { %v2251_v28 = vadd.f32 %v2244_v4, %v1540_v16  ;;  %v9430_v16 = vld [vmem:[#allocation32_spill] sm:$0xff]  ;;  %v2255_v3 = vadd.f32 %v2248_v60, %v1544_v19  ;;  %v2964_v30 = vadd.f32 %v2957_v26, %v2253_v53  ;;  %v3674_v55 = vadd.f32 %v3667_v42, %v2963_v58 }
 0xb3b   :  { %v1539_v24 = vmul.f32 %v9430_v16, %v9430_v16  ;;  %v2256_v43 = vadd.f32 %v2249_v7, %v1545_v2  ;;  %v4208_v5 = vmul.f32 0.9, %v8885_v51  ;;  %v4524_v60 = vsel %vm3500_vm12, 1.0, %v9266_v52 }
 0xb3c   :  { %v2962_v38 = vadd.f32 %v2955_v57, %v2251_v28  ;;  %v2966_v13 = vadd.f32 %v2959_v27, %v2255_v3  ;;  %v3670_v28 = vmul.f32 %v9407_v25, %v9407_v25  ;;  %v3675_v45 = vadd.f32 %v3668_v20, %v2964_v30 }
 0xb3d   :  { %v1546_v4 = vadd.f32 %v1539_v24, %v835_v46  ;;  %v2967_v44 = vadd.f32 %v2960_v47, %v2256_v43 }
 0xb3e   :  { %v3673_v57 = vadd.f32 %v3666_v36, %v2962_v38  ;;  %v3677_v59 = vadd.f32 %v3670_v28, %v2966_v13 }
 0xb3f   :  { %v2257_v0 = vadd.f32 %v2250_v40, %v1546_v4  ;;  %v3678_v29 = vadd.f32 %v3671_v14, %v2967_v44 }
 0xb40   :  { %v4330_v39 = vadd.f32 %v3674_v55, %v3673_v57  ;;  %v4328_v55 = vlaneseq }
 0xb41   :  { %v2968_v49 = vadd.f32 %v2961_v37, %v2257_v0 }
 0xb42   :  { %v4331_v18 = vadd.f32 %v4330_v39, %v3675_v45  ;;  %v4329_v45 = vshrl.u32 %v4328_v55, 7  ;;  %v4320_v39 = vmul.f32 0.9, %v8949_v17 }
 0xb43   :  { %v3679_v53 = vadd.f32 %v3672_v48, %v2968_v49 }
 0xb44   :  { %v4332_v22 = vadd.f32 %v4331_v18, %v3676_v50  ;;  %vm4349_vm7 = vcmp.eq.s32.totalorder %v4329_v45, 0  ;;  %vm4365_vm8 = vcmp.eq.s32.totalorder %v4329_v45, 1  ;;  %vm4381_vm2 = vcmp.eq.s32.totalorder %v4329_v45, 2 }
 0xb46   :  { %v4333_v26 = vadd.f32 %v4332_v22, %v3677_v59 }
 0xb48   :  { %v4334_v25 = vadd.f32 %v4333_v26, %v3678_v29 }
 0xb4a   :  { %v4335_v38 = vadd.f32 %v4334_v25, %v3679_v53 }
 0xb4c   :  { %4336 = vadd.xlane.f32.xlu0 %v4335_v38 }
 0xb4f   :  { %s7155_s10 = spop %7154 }
 0xb50   :  { %s3695_s5 = smul.f32 %s7155_s10, %s7155_s10 }
 0xb52   :  { %s3696_s13 = sadd.f32 %s3695_s5, %s2985_s15  ;;  %s4390_s5 = sshll.u32 %s7337_s22, 4  ;;  %s4391_s5 = int_to_ptr.vmem [resolvable:$true] %s4390_s5 }
 0xb53   :  { %s7273_s0 = scalar_lea.vmem %s4391_s5, 768  ;;  %p7278_p5 = scmp.lt.s32.totalorder %s4391_s5, %s4391_s5 }
 0xb54   :  { %s4345_s25 = smul.f32 0.00015943877, %s3696_s13  ;;  %p7274_p4 = scmp.ne.s32.totalorder %s4391_s5, %s7273_s0 }
 0xb55   :  { %p7279_p6 = scmp.lt.s32.totalorder %s7273_s0, %s7273_s0 }
 0xb57   :  { %p7280_p7 = por %p7279_p6, %p7278_p5 }
 0xb59   :  { %p7281_p8 = pnand %p7280_p7, %p7274_p4 }
 0xbbf   :  { %v4105_v58 = vpop.xlane.xlu0 %4104 }
 0xbc0   :  { %v4106_v12 = vrot.slane %v4105_v58, 4 }
 0xbc2   :  { %v4107_v62 = vadd.f32 %v4106_v12, %v4105_v58 }
 0xbc4   :  { %v4108_v1 = vrot.slane %v4107_v62, 2 }
 0xbc6   :  { %v4109_v10 = vadd.f32 %v4108_v1, %v4107_v62 }
 0xbc8   :  { %v4110_v56 = vrot.slane %v4109_v10, 1 }
 0xbca   :  { %v4111_v9 = vadd.f32 %v4110_v56, %v4109_v10 }
 0xbcc   :  { %7156 = vpush %v4111_v9 }
 0xbfd   :  { %s7157_s16 = spop %7156 }
 0xbfe   :  { %s4113_s17 = smul.f32 %s7157_s16, %s7157_s16 }
 0xc00   :  { %s4114_s21 = sadd.f32 %s4113_s17, %s3403_s19 }
 0xc02   :  { %s4361_s6 = smul.f32 0.00390625, %s4114_s21 }
 0xc06   :  { %v4204_v6 = vpop.f32.mrb[34].mxu0 }
 0xc07   :  { %v4205_v54 = vadd.f32 %v8878_v61, %v4204_v6  ;;  %v6080_v19 = vpop.f32.mrb[35].mxu0  ;;  %v4337_v61 = vpop.xlane.xlu0 %4336 }
 0xc08   :  { %v4338_v16 = vrot.slane %v4337_v61, 4 }
 0xc09   :  { %v4209_v11 = vadd.f32 %v4208_v5, %v4205_v54 }
 0xc0a   :  { %v4339_v24 = vadd.f32 %v4338_v16, %v4337_v61 }
 0xc0b   :  { %v4210_v31 = vsub.f32 %v4209_v11, %v4524_v60 }
 0xc0c   :  { %v4340_v2 = vrot.slane %v4339_v24, 2 }
 0xc0d   :  { %4216 = vadd.xlane.f32.xlu1 %v4210_v31  ;;  %vm4211_vm1 = vcmp.gt.f32.partialorder %v4210_v31, 1.0  ;;  %v4214_v32 = vmul.f32 %v4210_v31, %v4210_v31 }
 0xc0e   :  { %6114 = vmatmul.mubr.msk.f32.vlgmr.msra.gmra.mrb[34].mxu1 %vm4211_vm1, %v9262_v41  ;;  %v4341_v3 = vadd.f32 %v4340_v2, %v4339_v24 }
 0xc0f   :  { %v4215_v46 = vadd.f32 %v4214_v32, %v8897_v34 }
 0xc10   :  { %v4342_v40 = vrot.slane %v4341_v3, 1 }
 0xc11   :  { %4352 = vadd.xlane.f32.xlu1 %v8966_v35  ;;  %4368 = vadd.xlane.f32.xlu0 %v4215_v46 }
 0xc12   :  { %v4343_v42 = vadd.f32 %v4342_v40, %v4341_v3 }
 0xc9a   :  { %v4217_v23 = vpop.xlane.xlu1 %4216 }
 0xc9b   :  { %v4218_v7 = vrot.slane %v4217_v23, 4 }
 0xc9d   :  { %v4219_v51 = vadd.f32 %v4218_v7, %v4217_v23 }
 0xc9e   :  { %v4353_v27 = vpop.xlane.xlu1 %4352  ;;  %v4369_v30 = vpop.xlane.xlu0 %4368 }
 0xc9f   :  { %v4220_v36 = vrot.slane %v4219_v51, 2  ;;  %v4354_v4 = vrot.slane %v4353_v27, 4  ;;  %v4370_v21 = vrot.slane %v4369_v30, 4 }
 0xca1   :  { %v4355_v41 = vadd.f32 %v4354_v4, %v4353_v27  ;;  %v4371_v43 = vadd.f32 %v4370_v21, %v4369_v30  ;;  %v4221_v34 = vadd.f32 %v4220_v36, %v4219_v51 }
 0xca3   :  { %v4356_v8 = vrot.slane %v4355_v41, 2  ;;  %v4372_v35 = vrot.slane %v4371_v43, 2  ;;  %v4222_v47 = vrot.slane %v4221_v34, 1 }
 0xca5   :  { %v4357_v20 = vadd.f32 %v4356_v8, %v4355_v41  ;;  %v4373_v15 = vadd.f32 %v4372_v35, %v4371_v43  ;;  %v4223_v0 = vadd.f32 %v4222_v47, %v4221_v34 }
 0xca7   :  { %7158 = vpush %v4223_v0  ;;  %v4358_v37 = vrot.slane %v4357_v20, 1  ;;  %v4374_v13 = vrot.slane %v4373_v15, 1 }
 0xca8   :  { %7160 = vpush %v4343_v42 }
 0xca9   :  { %v4359_v28 = vadd.f32 %v4358_v37, %v4357_v20  ;;  %v4375_v57 = vadd.f32 %v4374_v13, %v4373_v15 }
 0xcab   :  { %7162 = vpush %v4359_v28 }
 0xcac   :  { %7164 = vpush %v4375_v57 }
 0xcd8   :  { %s7159_s23 = spop %7158 }
 0xcd9   :  { %s4225_s18 = smul.f32 %s7159_s23, %s7159_s23  ;;  %s7161_s27 = spop %7160 }
 0xcda   :  { %s4346_s24 = ssub.f32 %s7161_s27, %s4345_s25 }
 0xcdb   :  { %s4226_s4 = sadd.f32 %s4225_s18, %s3515_s20 }
 0xcdc   :  { %s4347_s2 = smul.f32 0.0001594642, %s4346_s24  ;;  %s7163_s10 = spop %7162 }
 0xcdd   :  { %s4362_s26 = ssub.f32 %s7163_s10, %s4361_s6  ;;  %s4377_s1 = smul.f32 0.00390625, %s4226_s4 }
 0xcde   :  { %s4348_s29 = smul.f32 0.16666667, %s4347_s2  ;;  %s7165_s15 = spop %7164 }
 0xcdf   :  { %s4363_s28 = smul.f32 0.003921569, %s4362_s26  ;;  %s4378_s3 = ssub.f32 %s7165_s15, %s4377_s1 }
 0xce0   :  { %v4350_v14 = vstv %s4348_s29 }
 0xce1   :  { %s4364_s16 = smul.f32 0.16666667, %s4363_s28  ;;  %v4316_v44 = vpop.f32.mrb[34].mxu1  ;;  %v4351_v18 = vsel %vm4349_vm7, %v4350_v14, 0.0 }
 0xce2   :  { %v4317_v50 = vadd.f32 %v8944_v33, %v4316_v44  ;;  %v6115_v49 = vpop.f32.mrb[35].mxu1  ;;  %s4379_s30 = smul.f32 0.003921569, %s4378_s3 }
 0xce3   :  { %v4366_v48 = vstv %s4364_s16 }
 0xce4   :  { %v4321_v59 = vadd.f32 %v4320_v39, %v4317_v50  ;;  %v4367_v29 = vsel %vm4365_vm8, %v4366_v48, %v4351_v18  ;;  %s4380_s11 = smul.f32 0.16666667, %s4379_s30 }
 0xce6   :  { %v4322_v22 = vsub.f32 %v4321_v59, %v8953_v63  ;;  %v4382_v53 = vstv %s4380_s11 }
 0xce7   :  { %v4383_v17 = vsel %vm4381_vm2, %v4382_v53, %v4367_v29 }
 0xce8   :  { %vm4323_vm6 = vcmp.gt.f32.partialorder %v4322_v22, 1.0  ;;  %4384 = vst [vmem:[#allocation11] sm:$0xf] %v4383_v17 }
 0xce9   :  { %v4549_v33 = vsel %vm4323_vm6, 1.0, %v9266_v52 }
 0xcea   :  { %4327 = vst [vmem:[#allocation10 + $0x28] sm:$0xff] %v4549_v33 }
 0xceb   :  { %7284 = shalt.err (!%p7281_p8)
}
 0xcec   :  { %s7285_s13 = scalar_lea.hbm %s9086_s7, 768 }
 0xced   :  { %p7286_p9 = scmp.ne.s32.totalorder %s9086_s7, %s7285_s13  ;;  %p7289_p10 = scmp.lt.u32.totalorder %s7285_s13, %s9086_s7 }
 0xcef   :  { %p7291_p11 = pnand %p7289_p10, %p7286_p9 }
 0xcf1   :  { %7294 = shalt.err (!%p7291_p11)
}
 0xcf2   :  { %s9433_s25 = smov 8   ;;  %s9434_s18 = smov 128  }
 0xcf3   :  { %4396 = dma.vmem_to_hbm [thread:$0]  %s4391_s5, 768, %s9086_s7, [#allocation4], %s9434_s18, %s9434_s18, %s9433_s25  }
 0xcf4   :  { %s7295_s4 = scalar_lea.vmem %s4404_s14, 64  ;;  %p7300_p13 = scmp.lt.s32.totalorder %s4404_s14, %s4404_s14 }
 0xcf5   :  { %p7296_p12 = scmp.ne.s32.totalorder %s4404_s14, %s7295_s4  ;;  %p7301_p0 = scmp.lt.s32.totalorder %s7295_s4, %s7295_s4 }
 0xcf7   :  { %p7302_p1 = por %p7301_p0, %p7300_p13 }
 0xcf9   :  { %p7303_p2 = pnand %p7302_p1, %p7296_p12 }
 0xcfb   :  { %7306 = shalt.err (!%p7303_p2)
}
 0xcfc   :  { %s7307_s10 = scalar_lea.hbm %s9087_s8, 64 }
 0xcfd   :  { %p7308_p3 = scmp.ne.s32.totalorder %s9087_s8, %s7307_s10  ;;  %p7311_p4 = scmp.lt.u32.totalorder %s7307_s10, %s9087_s8 }
 0xcff   :  { %p7313_p5 = pnand %p7311_p4, %p7308_p3 }
 0xd01   :  { %7316 = shalt.err (!%p7313_p5)
}
 0xd02   :  { %4406 = dma.vmem_to_hbm [thread:$0]  %s4404_s14, 64, %s9087_s8, [#allocation12]  }
 0xd03   :  { %7323 = dma.done.wait [#allocation4], 768  }
 0xd04   :  { %7324 = vsyncadd [#allocation4], 4294966528 }
 0xd05   :  { %7325 = dma.done.wait [#allocation12], 64  }
 0xd06   :  { %7326 = vsyncadd [#allocation12], 4294967232 }
 0xd07   :  { %4413 = vsyncpa [#allocation3], 1 }
 0xd08   :  { %4414 = vsyncpa [#allocation6], 1 }
 0xd09   :  { %4415 = vsyncpa [#allocation9], 1 }
 0xd0a   :  { %4416 = vsyncpa [#allocation4], 1 }
 0xd0b   :  { %4417 = vsyncpa [#allocation12], 1 }

</bundles_post_ra>
